<compile_context>
chip_gen: v6e
topology: v6e:2x2x1
jax: 0.10.0
libtpu: 0.0.40
codegen_flags: <defaults>
</compile_context>

<pallas_src>
import functools

import jax
import jax.numpy as jnp
from jax import lax
from jax.experimental import pallas as pl
from jax.experimental.pallas import tpu as pltpu


def _round_up(x, m):
    return ((x + m - 1) // m) * m


# ----------------------------- fused critic kernel ---------------------------
def _critic_kernel(
    x_ref, y_ref, a_ref,
    w1_ref, b1_ref, w2_ref, b2_ref, w3_ref, b3_ref,      # encoder MLP
    wz_ref, wa_ref, bd1_ref, wd2_ref, bd2_ref,           # latent dynamics
    wp1_ref, bp1_ref, wp2_ref, bp2_ref,                  # quasimetric projector
    gmat_ref, csum_ref,                                  # precomputed IQE 0/1 matrices
    alpha_ref,                                           # SMEM scalar: sigmoid(raw_alpha)
    d_ref,                                               # output (block_b, 1)
    *, comp_size, num_comps, has_action, compute_dtype):
    f32 = jnp.float32
    cd = compute_dtype

    def dot(u, w):
        return jnp.dot(u.astype(cd), w.astype(cd), preferred_element_type=f32)

    # -------- encoder (shared weights, applied to x and y) --------
    def encode(v):
        h1 = jnp.maximum(dot(v, w1_ref[...]) + b1_ref[...], 0.0)
        h2 = jnp.maximum(dot(h1, w2_ref[...]) + b2_ref[...], 0.0)
        return dot(h2, w3_ref[...]) + b3_ref[...]

    zx = encode(x_ref[...].astype(f32))
    zy = encode(y_ref[...].astype(f32))

    # -------- latent dynamics (residual MLP on [z, a]) --------
    if has_action:
        a = a_ref[...].astype(f32)
        h = jnp.maximum(dot(zx, wz_ref[...]) + dot(a, wa_ref[...]) + bd1_ref[...], 0.0)
        zx = zx + dot(h, wd2_ref[...]) + bd2_ref[...]

    # -------- quasimetric model: projector + IQE + maxmean --------
    def project(z):
        hh = jnp.maximum(dot(z, wp1_ref[...]) + bp1_ref[...], 0.0)
        return dot(hh, wp2_ref[...]) + bp2_ref[...]

    px = project(zx)                       # (b, D) interval left endpoints (f32)
    py = project(zy)
    right = jnp.maximum(px, py)            # interval right endpoints

    bb, D = px.shape
    C = comp_size
    K = num_comps
    NEG = jnp.float32(-1e30)               # acts as -inf; assumes |endpoints| << 1e30

    # Gather the m-th interval (x / right) of each lane's component with an exact
    # 0/1 matmul:  xv_all[b, m*D + f] = px[b, (f//C)*C + m]
    xv_all = jnp.dot(px, gmat_ref[...], preferred_element_type=f32)      # (b, C*D)
    rv_all = jnp.dot(right, gmat_ref[...], preferred_element_type=f32)   # (b, C*D)

    pos = lax.broadcasted_iota(jnp.int32, (1, D), 1) % C   # within-component index p

    # Sort-free union of intervals (per component):
    #   union = sum_i max(0, r_i - max(x_i, M_i)),
    #   M_i   = max r_j over intervals j of the same component that start before i
    #           (ties on x broken by index).
    m_run = jnp.full((bb, D), NEG, dtype=f32)
    for m in range(C):                                    # unrolled, C is small
        xv = xv_all[:, m * D:(m + 1) * D]
        rv = rv_all[:, m * D:(m + 1) * D]
        before = (xv < px) | ((xv == px) & (m < pos))
        m_run = jnp.maximum(m_run, jnp.where(before, rv, NEG))
    contrib = jnp.maximum(right - jnp.maximum(px, m_run), 0.0)           # (b, D)

    # Per-component sums, broadcast lane-dense across each component's lanes.
    comp_sum = jnp.dot(contrib, csum_ref[...], preferred_element_type=f32)  # (b, D)
    mx = jnp.max(comp_sum, axis=-1, keepdims=True)                       # max over components
    mn = jnp.sum(contrib, axis=-1, keepdims=True) * (1.0 / K)            # mean over components

    alpha = alpha_ref[0, 0]                                              # sigmoid(raw_alpha)
    d_ref[...] = (alpha * mx + (1.0 - alpha) * mn).astype(d_ref.dtype)


# --------------------------- QuasimetricCritic wrapper -----------------------
def quasimetric_critic_forward(enc_p, dyn_p, quasi_p, x, y, action=None, *,
                               comp_size, block_b=128, compute_dtype=jnp.float32):
    # TODO(synk): raw_lagrange_multiplier / encoder_environment exist on the module
    # but are not used in forward(); they are intentionally not modeled here.
    w1, b1, w2, b2, w3, b3 = enc_p
    wz, wa, bd1, wd2, bd2 = dyn_p
    wp1, bp1, wp2, bp2, raw_alpha = quasi_p

    B, OBS = x.shape
    H = w1.shape[1]
    L = w3.shape[1]
    PH = wp1.shape[1]
    D = wp2.shape[1]
    C = comp_size
    assert D % C == 0
    K = D // C
    ACT = wa.shape[0]

    has_action = action is not None
    if action is None:
        action = jnp.zeros((B, ACT), jnp.float32)

    # batch tiling (+ padding so every block is full)
    bb = min(block_b, _round_up(B, 8))
    B_pad = _round_up(B, bb)
    if B_pad != B:
        pad = ((0, B_pad - B), (0, 0))
        x = jnp.pad(x, pad)
        y = jnp.pad(y, pad)
        action = jnp.pad(action, pad)

    # batch-invariant IQE matrices (hoisted out of the kernel)
    t = jnp.arange(D, dtype=jnp.int32)[:, None]                # (D, 1)
    col = jnp.arange(C * D, dtype=jnp.int32)[None, :]          # (1, C*D); col = m*D + f
    gmat = ((((col % D) // C) * C + (col // D)) == t).astype(jnp.float32)   # (D, C*D)
    f_idx = jnp.arange(D, dtype=jnp.int32)[None, :]
    csum = ((t // C) == (f_idx // C)).astype(jnp.float32)                   # (D, D)

    # maxmean weight: sigmoid applied once, passed as SMEM scalar
    alpha = jax.nn.sigmoid(raw_alpha.reshape(1, 1).astype(jnp.float32))

    row = lambda i: (i, 0)
    rep = lambda i: (0, 0)

    kern = functools.partial(_critic_kernel, comp_size=C, num_comps=K,
                             has_action=has_action, compute_dtype=compute_dtype)

    out = pl.pallas_call(
        kern,
        out_shape=jax.ShapeDtypeStruct((B_pad, 1), jnp.float32),
        grid=(B_pad // bb,),
        in_specs=[
            pl.BlockSpec((bb, OBS), row),
            pl.BlockSpec((bb, OBS), row),
            pl.BlockSpec((bb, ACT), row),
            # encoder weights
            pl.BlockSpec((OBS, H), rep), pl.BlockSpec((1, H), rep),
            pl.BlockSpec((H, H), rep), pl.BlockSpec((1, H), rep),
            pl.BlockSpec((H, L), rep), pl.BlockSpec((1, L), rep),
            # dynamics weights
            pl.BlockSpec((L, H), rep), pl.BlockSpec((ACT, H), rep),
            pl.BlockSpec((1, H), rep),
            pl.BlockSpec((H, L), rep), pl.BlockSpec((1, L), rep),
            # projector weights
            pl.BlockSpec((L, PH), rep), pl.BlockSpec((1, PH), rep),
            pl.BlockSpec((PH, D), rep), pl.BlockSpec((1, D), rep),
            # IQE constants
            pl.BlockSpec((D, C * D), rep), pl.BlockSpec((D, D), rep),
            # alpha scalar in SMEM
            pl.BlockSpec(memory_space=pltpu.MemorySpace.SMEM),
        ],
        out_specs=pl.BlockSpec((bb, 1), row),
        compiler_params=pltpu.CompilerParams(
            dimension_semantics=("parallel",)),
    )(x, y, action, w1, b1, w2, b2, w3, b3, wz, wa, bd1, wd2, bd2,
      wp1, bp1, wp2, bp2, gmat, csum, alpha)
    return out[:B, 0]


# ------------------------------ pure-JAX reference ---------------------------
def _ref_forward(enc_p, dyn_p, quasi_p, x, y, action, comp_size):
    hp = jax.lax.Precision.HIGHEST

    def mlp(v, p):
        w1, b1, w2, b2, w3, b3 = p
        h1 = jax.nn.relu(jnp.dot(v, w1, precision=hp) + b1)
        h2 = jax.nn.relu(jnp.dot(h1, w2, precision=hp) + b2)
        return jnp.dot(h2, w3, precision=hp) + b3

    B = x.shape[0]
    z = mlp(jnp.concatenate([x, y], axis=0), enc_p)
    zx, zy = z[:B], z[B:]

    wz, wa, b1, w2, b2 = dyn_p
    if action is not None:
        h = jax.nn.relu(jnp.dot(zx, wz, precision=hp)
                        + jnp.dot(action, wa, precision=hp) + b1)
        zx = zx + jnp.dot(h, w2, precision=hp) + b2

    wp1, bp1, wp2, bp2, raw_alpha = quasi_p

    def proj(z_):
        hh = jax.nn.relu(jnp.dot(z_, wp1, precision=hp) + bp1)
        return jnp.dot(hh, wp2, precision=hp) + bp2

    px, py = proj(zx), proj(zy)
    Bq, D = px.shape
    C = comp_size
    K = D // C
    xx = px.reshape(Bq, K, C)
    yy = py.reshape(Bq, K, C)
    valid = (xx < yy).astype(jnp.float32)
    xy = jnp.concatenate([xx, yy], axis=-1)
    ixy = jnp.argsort(xy, axis=-1)
    sxy = jnp.take_along_axis(xy, ixy, axis=-1)
    neg_inc = jnp.take_along_axis(valid, ixy % C, axis=-1) * jnp.where(ixy < C, -1.0, 1.0)
    neg_cum = jnp.cumsum(neg_inc, axis=-1)
    neg_f = jnp.where(neg_cum < 0, -1.0, 0.0)
    neg_incf = jnp.concatenate([neg_f[..., :1], jnp.diff(neg_f, axis=-1)], axis=-1)
    d_comp = (sxy * neg_incf).sum(-1)                     # (B, K)
    alpha = jax.nn.sigmoid(raw_alpha[0, 0])
    return alpha * d_comp.max(-1) + (1.0 - alpha) * d_comp.mean(-1)


# ----------------------------------- main -------------------------------------
if __name__ == "__main__":
    B, OBS, ACT = 50, 16, 4          # batch, obs dim, action dim
    HID, LAT = 64, 32                # encoder hidden / latent size
    PROJ_H, QDIM, CSIZE = 64, 64, 8  # projector hidden, IQE dim, IQE component size

    keys = jax.random.split(jax.random.PRNGKey(0), 20)
    init = lambda k, s: jax.random.normal(k, s, dtype=jnp.float32) * 0.1

    enc_p = (init(keys[0], (OBS, HID)), init(keys[1], (1, HID)),
             init(keys[2], (HID, HID)), init(keys[3], (1, HID)),
             init(keys[4], (HID, LAT)), init(keys[5], (1, LAT)))
    dyn_p = (init(keys[6], (LAT, HID)), init(keys[7], (ACT, HID)), init(keys[8], (1, HID)),
             init(keys[9], (HID, LAT)), init(keys[10], (1, LAT)))
    quasi_p = (init(keys[11], (LAT, PROJ_H)), init(keys[12], (1, PROJ_H)),
               init(keys[13], (PROJ_H, QDIM)), init(keys[14], (1, QDIM)),
               jnp.zeros((1, 1), jnp.float32))   # raw_alpha -> alpha = 0.5

    x = jax.random.normal(keys[15], (B, OBS), dtype=jnp.float32)
    y = jax.random.normal(keys[16], (B, OBS), dtype=jnp.float32)
    action = jax.random.normal(keys[17], (B, ACT), dtype=jnp.float32)

    d_ref = _ref_forward(enc_p, dyn_p, quasi_p, x, y, action, CSIZE)

    # single fused kernel, one batch tile (padded to a multiple of 8)
    d = quasimetric_critic_forward(enc_p, dyn_p, quasi_p, x, y, action=action,
                                   comp_size=CSIZE)
    d = jax.block_until_ready(d)
    assert d.shape == (B,)
    assert jnp.allclose(d, d_ref, atol=2e-3, rtol=2e-3), (d, d_ref)

    # same kernel with a smaller batch tile -> multi-step grid + padding path
    d2 = quasimetric_critic_forward(enc_p, dyn_p, quasi_p, x, y, action=action,
                                    comp_size=CSIZE, block_b=16)
    d2 = jax.block_until_ready(d2)
    assert jnp.allclose(d2, d_ref, atol=2e-3, rtol=2e-3), (d2, d_ref)

    print("KERNEL_OK")
</pallas_src>

<mosaic_0001>
module attributes {stable_mosaic.version = 11 : i64} {
  func.func @_critic_kernel(%arg0: i32, %arg1: memref<56x16xf32, #tpu.memory_space<vmem>>, %arg2: memref<56x16xf32, #tpu.memory_space<vmem>>, %arg3: memref<56x4xf32, #tpu.memory_space<vmem>>, %arg4: memref<16x64xf32, #tpu.memory_space<vmem>>, %arg5: memref<1x64xf32, #tpu.memory_space<vmem>>, %arg6: memref<64x64xf32, #tpu.memory_space<vmem>>, %arg7: memref<1x64xf32, #tpu.memory_space<vmem>>, %arg8: memref<64x32xf32, #tpu.memory_space<vmem>>, %arg9: memref<1x32xf32, #tpu.memory_space<vmem>>, %arg10: memref<32x64xf32, #tpu.memory_space<vmem>>, %arg11: memref<4x64xf32, #tpu.memory_space<vmem>>, %arg12: memref<1x64xf32, #tpu.memory_space<vmem>>, %arg13: memref<64x32xf32, #tpu.memory_space<vmem>>, %arg14: memref<1x32xf32, #tpu.memory_space<vmem>>, %arg15: memref<32x64xf32, #tpu.memory_space<vmem>>, %arg16: memref<1x64xf32, #tpu.memory_space<vmem>>, %arg17: memref<64x64xf32, #tpu.memory_space<vmem>>, %arg18: memref<1x64xf32, #tpu.memory_space<vmem>>, %arg19: memref<64x512xf32, #tpu.memory_space<vmem>>, %arg20: memref<64x64xf32, #tpu.memory_space<vmem>>, %arg21: memref<1x1xf32, #tpu.memory_space<smem>>, %arg22: memref<56x1xf32, #tpu.memory_space<vmem>>) attributes {dimension_semantics = [#tpu.dimension_semantics<parallel>], iteration_bounds = array<i64: 1>, scalar_prefetch = 0 : i64, scratch_operands = 0 : i64, tpu.core_type = #tpu.core_type<tc>, window_params = [{transform_indices = @transform_0, window_bounds = array<i64: 56, 16>}, {transform_indices = @transform_1, window_bounds = array<i64: 56, 16>}, {transform_indices = @transform_2, window_bounds = array<i64: 56, 4>}, {pipeline_mode = #tpu.pipeline_mode<synchronous>, transform_indices = @transform_3, window_bounds = array<i64: 16, 64>}, {pipeline_mode = #tpu.pipeline_mode<synchronous>, transform_indices = @transform_4, window_bounds = array<i64: 1, 64>}, {pipeline_mode = #tpu.pipeline_mode<synchronous>, transform_indices = @transform_5, window_bounds = array<i64: 64, 64>}, {pipeline_mode = #tpu.pipeline_mode<synchronous>, transform_indices = @transform_6, window_bounds = array<i64: 1, 64>}, {pipeline_mode = #tpu.pipeline_mode<synchronous>, transform_indices = @transform_7, window_bounds = array<i64: 64, 32>}, {pipeline_mode = #tpu.pipeline_mode<synchronous>, transform_indices = @transform_8, window_bounds = array<i64: 1, 32>}, {pipeline_mode = #tpu.pipeline_mode<synchronous>, transform_indices = @transform_9, window_bounds = array<i64: 32, 64>}, {pipeline_mode = #tpu.pipeline_mode<synchronous>, transform_indices = @transform_10, window_bounds = array<i64: 4, 64>}, {pipeline_mode = #tpu.pipeline_mode<synchronous>, transform_indices = @transform_11, window_bounds = array<i64: 1, 64>}, {pipeline_mode = #tpu.pipeline_mode<synchronous>, transform_indices = @transform_12, window_bounds = array<i64: 64, 32>}, {pipeline_mode = #tpu.pipeline_mode<synchronous>, transform_indices = @transform_13, window_bounds = array<i64: 1, 32>}, {pipeline_mode = #tpu.pipeline_mode<synchronous>, transform_indices = @transform_14, window_bounds = array<i64: 32, 64>}, {pipeline_mode = #tpu.pipeline_mode<synchronous>, transform_indices = @transform_15, window_bounds = array<i64: 1, 64>}, {pipeline_mode = #tpu.pipeline_mode<synchronous>, transform_indices = @transform_16, window_bounds = array<i64: 64, 64>}, {pipeline_mode = #tpu.pipeline_mode<synchronous>, transform_indices = @transform_17, window_bounds = array<i64: 1, 64>}, {pipeline_mode = #tpu.pipeline_mode<synchronous>, transform_indices = @transform_18, window_bounds = array<i64: 64, 512>}, {pipeline_mode = #tpu.pipeline_mode<synchronous>, transform_indices = @transform_19, window_bounds = array<i64: 64, 64>}, {transform_indices = @transform_20, window_bounds = array<i64: 1, 1>}, {transform_indices = @transform_21, window_bounds = array<i64: 56, 1>}]} {
    %c0 = arith.constant 0 : index
    %c0_0 = arith.constant 0 : index
    %0 = vector.load %arg1[%c0, %c0_0] : memref<56x16xf32, #tpu.memory_space<vmem>>, vector<56x16xf32>
    %c0_1 = arith.constant 0 : index
    %c0_2 = arith.constant 0 : index
    %1 = vector.load %arg4[%c0_1, %c0_2] : memref<16x64xf32, #tpu.memory_space<vmem>>, vector<16x64xf32>
    %cst = arith.constant dense<0.000000e+00> : vector<56x64xf32>
    %2 = tpu.matmul %0, %1, %cst {dimension_numbers = #tpu.dot_dimension_numbers<[1], [0], [0], [1], [0, 0, 1, 1], [], []>} : vector<56x16xf32>, vector<16x64xf32>, vector<56x64xf32> -> vector<56x64xf32>
    %c0_3 = arith.constant 0 : index
    %c0_4 = arith.constant 0 : index
    %3 = vector.load %arg5[%c0_3, %c0_4] : memref<1x64xf32, #tpu.memory_space<vmem>>, vector<1x64xf32>
    %4 = vector.broadcast %3 : vector<1x64xf32> to vector<56x64xf32>
    %5 = arith.addf %2, %4 : vector<56x64xf32>
    %cst_5 = arith.constant 0.000000e+00 : f32
    %6 = vector.broadcast %cst_5 : f32 to vector<56x64xf32>
    %7 = arith.maximumf %5, %6 : vector<56x64xf32>
    %c0_6 = arith.constant 0 : index
    %c0_7 = arith.constant 0 : index
    %8 = vector.load %arg6[%c0_6, %c0_7] : memref<64x64xf32, #tpu.memory_space<vmem>>, vector<64x64xf32>
    %cst_8 = arith.constant dense<0.000000e+00> : vector<56x64xf32>
    %9 = tpu.matmul %7, %8, %cst_8 {dimension_numbers = #tpu.dot_dimension_numbers<[1], [0], [0], [1], [0, 0, 1, 1], [], []>} : vector<56x64xf32>, vector<64x64xf32>, vector<56x64xf32> -> vector<56x64xf32>
    %c0_9 = arith.constant 0 : index
    %c0_10 = arith.constant 0 : index
    %10 = vector.load %arg7[%c0_9, %c0_10] : memref<1x64xf32, #tpu.memory_space<vmem>>, vector<1x64xf32>
    %11 = vector.broadcast %10 : vector<1x64xf32> to vector<56x64xf32>
    %12 = arith.addf %9, %11 : vector<56x64xf32>
    %cst_11 = arith.constant 0.000000e+00 : f32
    %13 = vector.broadcast %cst_11 : f32 to vector<56x64xf32>
    %14 = arith.maximumf %12, %13 : vector<56x64xf32>
    %c0_12 = arith.constant 0 : index
    %c0_13 = arith.constant 0 : index
    %15 = vector.load %arg8[%c0_12, %c0_13] : memref<64x32xf32, #tpu.memory_space<vmem>>, vector<64x32xf32>
    %cst_14 = arith.constant dense<0.000000e+00> : vector<56x32xf32>
    %16 = tpu.matmul %14, %15, %cst_14 {dimension_numbers = #tpu.dot_dimension_numbers<[1], [0], [0], [1], [0, 0, 1, 1], [], []>} : vector<56x64xf32>, vector<64x32xf32>, vector<56x32xf32> -> vector<56x32xf32>
    %c0_15 = arith.constant 0 : index
    %c0_16 = arith.constant 0 : index
    %17 = vector.load %arg9[%c0_15, %c0_16] : memref<1x32xf32, #tpu.memory_space<vmem>>, vector<1x32xf32>
    %18 = vector.broadcast %17 : vector<1x32xf32> to vector<56x32xf32>
    %19 = arith.addf %16, %18 : vector<56x32xf32>
    %c0_17 = arith.constant 0 : index
    %c0_18 = arith.constant 0 : index
    %20 = vector.load %arg2[%c0_17, %c0_18] : memref<56x16xf32, #tpu.memory_space<vmem>>, vector<56x16xf32>
    %c0_19 = arith.constant 0 : index
    %c0_20 = arith.constant 0 : index
    %21 = vector.load %arg4[%c0_19, %c0_20] : memref<16x64xf32, #tpu.memory_space<vmem>>, vector<16x64xf32>
    %cst_21 = arith.constant dense<0.000000e+00> : vector<56x64xf32>
    %22 = tpu.matmul %20, %21, %cst_21 {dimension_numbers = #tpu.dot_dimension_numbers<[1], [0], [0], [1], [0, 0, 1, 1], [], []>} : vector<56x16xf32>, vector<16x64xf32>, vector<56x64xf32> -> vector<56x64xf32>
    %c0_22 = arith.constant 0 : index
    %c0_23 = arith.constant 0 : index
    %23 = vector.load %arg5[%c0_22, %c0_23] : memref<1x64xf32, #tpu.memory_space<vmem>>, vector<1x64xf32>
    %24 = vector.broadcast %23 : vector<1x64xf32> to vector<56x64xf32>
    %25 = arith.addf %22, %24 : vector<56x64xf32>
    %cst_24 = arith.constant 0.000000e+00 : f32
    %26 = vector.broadcast %cst_24 : f32 to vector<56x64xf32>
    %27 = arith.maximumf %25, %26 : vector<56x64xf32>
    %c0_25 = arith.constant 0 : index
    %c0_26 = arith.constant 0 : index
    %28 = vector.load %arg6[%c0_25, %c0_26] : memref<64x64xf32, #tpu.memory_space<vmem>>, vector<64x64xf32>
    %cst_27 = arith.constant dense<0.000000e+00> : vector<56x64xf32>
    %29 = tpu.matmul %27, %28, %cst_27 {dimension_numbers = #tpu.dot_dimension_numbers<[1], [0], [0], [1], [0, 0, 1, 1], [], []>} : vector<56x64xf32>, vector<64x64xf32>, vector<56x64xf32> -> vector<56x64xf32>
    %c0_28 = arith.constant 0 : index
    %c0_29 = arith.constant 0 : index
    %30 = vector.load %arg7[%c0_28, %c0_29] : memref<1x64xf32, #tpu.memory_space<vmem>>, vector<1x64xf32>
    %31 = vector.broadcast %30 : vector<1x64xf32> to vector<56x64xf32>
    %32 = arith.addf %29, %31 : vector<56x64xf32>
    %cst_30 = arith.constant 0.000000e+00 : f32
    %33 = vector.broadcast %cst_30 : f32 to vector<56x64xf32>
    %34 = arith.maximumf %32, %33 : vector<56x64xf32>
    %c0_31 = arith.constant 0 : index
    %c0_32 = arith.constant 0 : index
    %35 = vector.load %arg8[%c0_31, %c0_32] : memref<64x32xf32, #tpu.memory_space<vmem>>, vector<64x32xf32>
    %cst_33 = arith.constant dense<0.000000e+00> : vector<56x32xf32>
    %36 = tpu.matmul %34, %35, %cst_33 {dimension_numbers = #tpu.dot_dimension_numbers<[1], [0], [0], [1], [0, 0, 1, 1], [], []>} : vector<56x64xf32>, vector<64x32xf32>, vector<56x32xf32> -> vector<56x32xf32>
    %c0_34 = arith.constant 0 : index
    %c0_35 = arith.constant 0 : index
    %37 = vector.load %arg9[%c0_34, %c0_35] : memref<1x32xf32, #tpu.memory_space<vmem>>, vector<1x32xf32>
    %38 = vector.broadcast %37 : vector<1x32xf32> to vector<56x32xf32>
    %39 = arith.addf %36, %38 : vector<56x32xf32>
    %c0_36 = arith.constant 0 : index
    %c0_37 = arith.constant 0 : index
    %40 = vector.load %arg3[%c0_36, %c0_37] : memref<56x4xf32, #tpu.memory_space<vmem>>, vector<56x4xf32>
    %c0_38 = arith.constant 0 : index
    %c0_39 = arith.constant 0 : index
    %41 = vector.load %arg10[%c0_38, %c0_39] : memref<32x64xf32, #tpu.memory_space<vmem>>, vector<32x64xf32>
    %cst_40 = arith.constant dense<0.000000e+00> : vector<56x64xf32>
    %42 = tpu.matmul %19, %41, %cst_40 {dimension_numbers = #tpu.dot_dimension_numbers<[1], [0], [0], [1], [0, 0, 1, 1], [], []>} : vector<56x32xf32>, vector<32x64xf32>, vector<56x64xf32> -> vector<56x64xf32>
    %c0_41 = arith.constant 0 : index
    %c0_42 = arith.constant 0 : index
    %43 = vector.load %arg11[%c0_41, %c0_42] : memref<4x64xf32, #tpu.memory_space<vmem>>, vector<4x64xf32>
    %cst_43 = arith.constant dense<0.000000e+00> : vector<56x64xf32>
    %44 = tpu.matmul %40, %43, %cst_43 {dimension_numbers = #tpu.dot_dimension_numbers<[1], [0], [0], [1], [0, 0, 1, 1], [], []>} : vector<56x4xf32>, vector<4x64xf32>, vector<56x64xf32> -> vector<56x64xf32>
    %45 = arith.addf %42, %44 : vector<56x64xf32>
    %c0_44 = arith.constant 0 : index
    %c0_45 = arith.constant 0 : index
    %46 = vector.load %arg12[%c0_44, %c0_45] : memref<1x64xf32, #tpu.memory_space<vmem>>, vector<1x64xf32>
    %47 = vector.broadcast %46 : vector<1x64xf32> to vector<56x64xf32>
    %48 = arith.addf %45, %47 : vector<56x64xf32>
    %cst_46 = arith.constant 0.000000e+00 : f32
    %49 = vector.broadcast %cst_46 : f32 to vector<56x64xf32>
    %50 = arith.maximumf %48, %49 : vector<56x64xf32>
    %c0_47 = arith.constant 0 : index
    %c0_48 = arith.constant 0 : index
    %51 = vector.load %arg13[%c0_47, %c0_48] : memref<64x32xf32, #tpu.memory_space<vmem>>, vector<64x32xf32>
    %cst_49 = arith.constant dense<0.000000e+00> : vector<56x32xf32>
    %52 = tpu.matmul %50, %51, %cst_49 {dimension_numbers = #tpu.dot_dimension_numbers<[1], [0], [0], [1], [0, 0, 1, 1], [], []>} : vector<56x64xf32>, vector<64x32xf32>, vector<56x32xf32> -> vector<56x32xf32>
    %53 = arith.addf %19, %52 : vector<56x32xf32>
    %c0_50 = arith.constant 0 : index
    %c0_51 = arith.constant 0 : index
    %54 = vector.load %arg14[%c0_50, %c0_51] : memref<1x32xf32, #tpu.memory_space<vmem>>, vector<1x32xf32>
    %55 = vector.broadcast %54 : vector<1x32xf32> to vector<56x32xf32>
    %56 = arith.addf %53, %55 : vector<56x32xf32>
    %c0_52 = arith.constant 0 : index
    %c0_53 = arith.constant 0 : index
    %57 = vector.load %arg15[%c0_52, %c0_53] : memref<32x64xf32, #tpu.memory_space<vmem>>, vector<32x64xf32>
    %cst_54 = arith.constant dense<0.000000e+00> : vector<56x64xf32>
    %58 = tpu.matmul %56, %57, %cst_54 {dimension_numbers = #tpu.dot_dimension_numbers<[1], [0], [0], [1], [0, 0, 1, 1], [], []>} : vector<56x32xf32>, vector<32x64xf32>, vector<56x64xf32> -> vector<56x64xf32>
    %c0_55 = arith.constant 0 : index
    %c0_56 = arith.constant 0 : index
    %59 = vector.load %arg16[%c0_55, %c0_56] : memref<1x64xf32, #tpu.memory_space<vmem>>, vector<1x64xf32>
    %60 = vector.broadcast %59 : vector<1x64xf32> to vector<56x64xf32>
    %61 = arith.addf %58, %60 : vector<56x64xf32>
    %cst_57 = arith.constant 0.000000e+00 : f32
    %62 = vector.broadcast %cst_57 : f32 to vector<56x64xf32>
    %63 = arith.maximumf %61, %62 : vector<56x64xf32>
    %c0_58 = arith.constant 0 : index
    %c0_59 = arith.constant 0 : index
    %64 = vector.load %arg17[%c0_58, %c0_59] : memref<64x64xf32, #tpu.memory_space<vmem>>, vector<64x64xf32>
    %cst_60 = arith.constant dense<0.000000e+00> : vector<56x64xf32>
    %65 = tpu.matmul %63, %64, %cst_60 {dimension_numbers = #tpu.dot_dimension_numbers<[1], [0], [0], [1], [0, 0, 1, 1], [], []>} : vector<56x64xf32>, vector<64x64xf32>, vector<56x64xf32> -> vector<56x64xf32>
    %c0_61 = arith.constant 0 : index
    %c0_62 = arith.constant 0 : index
    %66 = vector.load %arg18[%c0_61, %c0_62] : memref<1x64xf32, #tpu.memory_space<vmem>>, vector<1x64xf32>
    %67 = vector.broadcast %66 : vector<1x64xf32> to vector<56x64xf32>
    %68 = arith.addf %65, %67 : vector<56x64xf32>
    %c0_63 = arith.constant 0 : index
    %c0_64 = arith.constant 0 : index
    %69 = vector.load %arg15[%c0_63, %c0_64] : memref<32x64xf32, #tpu.memory_space<vmem>>, vector<32x64xf32>
    %cst_65 = arith.constant dense<0.000000e+00> : vector<56x64xf32>
    %70 = tpu.matmul %39, %69, %cst_65 {dimension_numbers = #tpu.dot_dimension_numbers<[1], [0], [0], [1], [0, 0, 1, 1], [], []>} : vector<56x32xf32>, vector<32x64xf32>, vector<56x64xf32> -> vector<56x64xf32>
    %c0_66 = arith.constant 0 : index
    %c0_67 = arith.constant 0 : index
    %71 = vector.load %arg16[%c0_66, %c0_67] : memref<1x64xf32, #tpu.memory_space<vmem>>, vector<1x64xf32>
    %72 = vector.broadcast %71 : vector<1x64xf32> to vector<56x64xf32>
    %73 = arith.addf %70, %72 : vector<56x64xf32>
    %cst_68 = arith.constant 0.000000e+00 : f32
    %74 = vector.broadcast %cst_68 : f32 to vector<56x64xf32>
    %75 = arith.maximumf %73, %74 : vector<56x64xf32>
    %c0_69 = arith.constant 0 : index
    %c0_70 = arith.constant 0 : index
    %76 = vector.load %arg17[%c0_69, %c0_70] : memref<64x64xf32, #tpu.memory_space<vmem>>, vector<64x64xf32>
    %cst_71 = arith.constant dense<0.000000e+00> : vector<56x64xf32>
    %77 = tpu.matmul %75, %76, %cst_71 {dimension_numbers = #tpu.dot_dimension_numbers<[1], [0], [0], [1], [0, 0, 1, 1], [], []>} : vector<56x64xf32>, vector<64x64xf32>, vector<56x64xf32> -> vector<56x64xf32>
    %c0_72 = arith.constant 0 : index
    %c0_73 = arith.constant 0 : index
    %78 = vector.load %arg18[%c0_72, %c0_73] : memref<1x64xf32, #tpu.memory_space<vmem>>, vector<1x64xf32>
    %79 = vector.broadcast %78 : vector<1x64xf32> to vector<56x64xf32>
    %80 = arith.addf %77, %79 : vector<56x64xf32>
    %81 = arith.maximumf %68, %80 : vector<56x64xf32>
    %c0_74 = arith.constant 0 : index
    %c0_75 = arith.constant 0 : index
    %82 = vector.load %arg19[%c0_74, %c0_75] : memref<64x512xf32, #tpu.memory_space<vmem>>, vector<64x512xf32>
    %cst_76 = arith.constant dense<0.000000e+00> : vector<56x512xf32>
    %83 = tpu.matmul %68, %82, %cst_76 {dimension_numbers = #tpu.dot_dimension_numbers<[1], [0], [0], [1], [0, 0, 1, 1], [], []>} : vector<56x64xf32>, vector<64x512xf32>, vector<56x512xf32> -> vector<56x512xf32>
    %c0_77 = arith.constant 0 : index
    %c0_78 = arith.constant 0 : index
    %84 = vector.load %arg19[%c0_77, %c0_78] : memref<64x512xf32, #tpu.memory_space<vmem>>, vector<64x512xf32>
    %cst_79 = arith.constant dense<0.000000e+00> : vector<56x512xf32>
    %85 = tpu.matmul %81, %84, %cst_79 {dimension_numbers = #tpu.dot_dimension_numbers<[1], [0], [0], [1], [0, 0, 1, 1], [], []>} : vector<56x64xf32>, vector<64x512xf32>, vector<56x512xf32> -> vector<56x512xf32>
    %86 = tpu.iota {dimensions = array<i32: 1>} : vector<1x64xi32>
    %c8_i32 = arith.constant 8 : i32
    %c0_i32 = arith.constant 0 : i32
    %87 = arith.cmpi eq, %c8_i32, %c0_i32 : i32
    %c1_i32 = arith.constant 1 : i32
    %88 = arith.select %87, %c1_i32, %c8_i32 : i32
    %89 = vector.broadcast %88 : i32 to vector<1x64xi32>
    %90 = arith.remsi %86, %89 : vector<1x64xi32>
    %c0_i32_80 = arith.constant 0 : i32
    %91 = vector.broadcast %c0_i32_80 : i32 to vector<1x64xi32>
    %92 = arith.cmpi ne, %90, %91 : vector<1x64xi32>
    %c0_i32_81 = arith.constant 0 : i32
    %93 = vector.broadcast %c0_i32_81 : i32 to vector<1x64xi32>
    %94 = arith.cmpi slt, %90, %93 : vector<1x64xi32>
    %c0_i32_82 = arith.constant 0 : i32
    %95 = arith.cmpi slt, %88, %c0_i32_82 : i32
    %96 = vector.broadcast %95 : i1 to vector<1x64xi1>
    %97 = vector.broadcast %96 : vector<1x64xi1> to vector<1x64xi1>
    %98 = arith.xori %94, %97 : vector<1x64xi1>
    %99 = arith.andi %98, %92 : vector<1x64xi1>
    %100 = vector.broadcast %88 : i32 to vector<1x64xi32>
    %101 = arith.addi %90, %100 : vector<1x64xi32>
    %102 = arith.select %99, %101, %90 : vector<1x64xi1>, vector<1x64xi32>
    %cst_83 = arith.constant -1.000000e+30 : f32
    %103 = vector.broadcast %cst_83 : f32 to vector<56x64xf32>
    %104 = vector.extract_strided_slice %83 {offsets = [0, 0], sizes = [56, 64], strides = [1, 1]} : vector<56x512xf32> to vector<56x64xf32>
    %105 = vector.extract_strided_slice %85 {offsets = [0, 0], sizes = [56, 64], strides = [1, 1]} : vector<56x512xf32> to vector<56x64xf32>
    %106 = arith.cmpf olt, %104, %68 : vector<56x64xf32>
    %107 = arith.cmpf oeq, %104, %68 : vector<56x64xf32>
    %c0_i32_84 = arith.constant 0 : i32
    %108 = vector.broadcast %c0_i32_84 : i32 to vector<1x64xi32>
    %109 = arith.cmpi sgt, %102, %108 : vector<1x64xi32>
    %110 = vector.broadcast %109 : vector<1x64xi1> to vector<56x64xi1>
    %111 = arith.andi %107, %110 : vector<56x64xi1>
    %112 = arith.ori %106, %111 : vector<56x64xi1>
    %cst_85 = arith.constant -1.000000e+30 : f32
    %113 = vector.broadcast %cst_85 : f32 to vector<56x64xf32>
    %114 = arith.select %112, %105, %113 : vector<56x64xi1>, vector<56x64xf32>
    %115 = arith.maximumf %103, %114 : vector<56x64xf32>
    %116 = vector.extract_strided_slice %83 {offsets = [0, 64], sizes = [56, 64], strides = [1, 1]} : vector<56x512xf32> to vector<56x64xf32>
    %117 = vector.extract_strided_slice %85 {offsets = [0, 64], sizes = [56, 64], strides = [1, 1]} : vector<56x512xf32> to vector<56x64xf32>
    %118 = arith.cmpf olt, %116, %68 : vector<56x64xf32>
    %119 = arith.cmpf oeq, %116, %68 : vector<56x64xf32>
    %c1_i32_86 = arith.constant 1 : i32
    %120 = vector.broadcast %c1_i32_86 : i32 to vector<1x64xi32>
    %121 = arith.cmpi sgt, %102, %120 : vector<1x64xi32>
    %122 = vector.broadcast %121 : vector<1x64xi1> to vector<56x64xi1>
    %123 = arith.andi %119, %122 : vector<56x64xi1>
    %124 = arith.ori %118, %123 : vector<56x64xi1>
    %cst_87 = arith.constant -1.000000e+30 : f32
    %125 = vector.broadcast %cst_87 : f32 to vector<56x64xf32>
    %126 = arith.select %124, %117, %125 : vector<56x64xi1>, vector<56x64xf32>
    %127 = arith.maximumf %115, %126 : vector<56x64xf32>
    %128 = vector.extract_strided_slice %83 {offsets = [0, 128], sizes = [56, 64], strides = [1, 1]} : vector<56x512xf32> to vector<56x64xf32>
    %129 = vector.extract_strided_slice %85 {offsets = [0, 128], sizes = [56, 64], strides = [1, 1]} : vector<56x512xf32> to vector<56x64xf32>
    %130 = arith.cmpf olt, %128, %68 : vector<56x64xf32>
    %131 = arith.cmpf oeq, %128, %68 : vector<56x64xf32>
    %c2_i32 = arith.constant 2 : i32
    %132 = vector.broadcast %c2_i32 : i32 to vector<1x64xi32>
    %133 = arith.cmpi sgt, %102, %132 : vector<1x64xi32>
    %134 = vector.broadcast %133 : vector<1x64xi1> to vector<56x64xi1>
    %135 = arith.andi %131, %134 : vector<56x64xi1>
    %136 = arith.ori %130, %135 : vector<56x64xi1>
    %cst_88 = arith.constant -1.000000e+30 : f32
    %137 = vector.broadcast %cst_88 : f32 to vector<56x64xf32>
    %138 = arith.select %136, %129, %137 : vector<56x64xi1>, vector<56x64xf32>
    %139 = arith.maximumf %127, %138 : vector<56x64xf32>
    %140 = vector.extract_strided_slice %83 {offsets = [0, 192], sizes = [56, 64], strides = [1, 1]} : vector<56x512xf32> to vector<56x64xf32>
    %141 = vector.extract_strided_slice %85 {offsets = [0, 192], sizes = [56, 64], strides = [1, 1]} : vector<56x512xf32> to vector<56x64xf32>
    %142 = arith.cmpf olt, %140, %68 : vector<56x64xf32>
    %143 = arith.cmpf oeq, %140, %68 : vector<56x64xf32>
    %c3_i32 = arith.constant 3 : i32
    %144 = vector.broadcast %c3_i32 : i32 to vector<1x64xi32>
    %145 = arith.cmpi sgt, %102, %144 : vector<1x64xi32>
    %146 = vector.broadcast %145 : vector<1x64xi1> to vector<56x64xi1>
    %147 = arith.andi %143, %146 : vector<56x64xi1>
    %148 = arith.ori %142, %147 : vector<56x64xi1>
    %cst_89 = arith.constant -1.000000e+30 : f32
    %149 = vector.broadcast %cst_89 : f32 to vector<56x64xf32>
    %150 = arith.select %148, %141, %149 : vector<56x64xi1>, vector<56x64xf32>
    %151 = arith.maximumf %139, %150 : vector<56x64xf32>
    %152 = vector.extract_strided_slice %83 {offsets = [0, 256], sizes = [56, 64], strides = [1, 1]} : vector<56x512xf32> to vector<56x64xf32>
    %153 = vector.extract_strided_slice %85 {offsets = [0, 256], sizes = [56, 64], strides = [1, 1]} : vector<56x512xf32> to vector<56x64xf32>
    %154 = arith.cmpf olt, %152, %68 : vector<56x64xf32>
    %155 = arith.cmpf oeq, %152, %68 : vector<56x64xf32>
    %c4_i32 = arith.constant 4 : i32
    %156 = vector.broadcast %c4_i32 : i32 to vector<1x64xi32>
    %157 = arith.cmpi sgt, %102, %156 : vector<1x64xi32>
    %158 = vector.broadcast %157 : vector<1x64xi1> to vector<56x64xi1>
    %159 = arith.andi %155, %158 : vector<56x64xi1>
    %160 = arith.ori %154, %159 : vector<56x64xi1>
    %cst_90 = arith.constant -1.000000e+30 : f32
    %161 = vector.broadcast %cst_90 : f32 to vector<56x64xf32>
    %162 = arith.select %160, %153, %161 : vector<56x64xi1>, vector<56x64xf32>
    %163 = arith.maximumf %151, %162 : vector<56x64xf32>
    %164 = vector.extract_strided_slice %83 {offsets = [0, 320], sizes = [56, 64], strides = [1, 1]} : vector<56x512xf32> to vector<56x64xf32>
    %165 = vector.extract_strided_slice %85 {offsets = [0, 320], sizes = [56, 64], strides = [1, 1]} : vector<56x512xf32> to vector<56x64xf32>
    %166 = arith.cmpf olt, %164, %68 : vector<56x64xf32>
    %167 = arith.cmpf oeq, %164, %68 : vector<56x64xf32>
    %c5_i32 = arith.constant 5 : i32
    %168 = vector.broadcast %c5_i32 : i32 to vector<1x64xi32>
    %169 = arith.cmpi sgt, %102, %168 : vector<1x64xi32>
    %170 = vector.broadcast %169 : vector<1x64xi1> to vector<56x64xi1>
    %171 = arith.andi %167, %170 : vector<56x64xi1>
    %172 = arith.ori %166, %171 : vector<56x64xi1>
    %cst_91 = arith.constant -1.000000e+30 : f32
    %173 = vector.broadcast %cst_91 : f32 to vector<56x64xf32>
    %174 = arith.select %172, %165, %173 : vector<56x64xi1>, vector<56x64xf32>
    %175 = arith.maximumf %163, %174 : vector<56x64xf32>
    %176 = vector.extract_strided_slice %83 {offsets = [0, 384], sizes = [56, 64], strides = [1, 1]} : vector<56x512xf32> to vector<56x64xf32>
    %177 = vector.extract_strided_slice %85 {offsets = [0, 384], sizes = [56, 64], strides = [1, 1]} : vector<56x512xf32> to vector<56x64xf32>
    %178 = arith.cmpf olt, %176, %68 : vector<56x64xf32>
    %179 = arith.cmpf oeq, %176, %68 : vector<56x64xf32>
    %c6_i32 = arith.constant 6 : i32
    %180 = vector.broadcast %c6_i32 : i32 to vector<1x64xi32>
    %181 = arith.cmpi sgt, %102, %180 : vector<1x64xi32>
    %182 = vector.broadcast %181 : vector<1x64xi1> to vector<56x64xi1>
    %183 = arith.andi %179, %182 : vector<56x64xi1>
    %184 = arith.ori %178, %183 : vector<56x64xi1>
    %cst_92 = arith.constant -1.000000e+30 : f32
    %185 = vector.broadcast %cst_92 : f32 to vector<56x64xf32>
    %186 = arith.select %184, %177, %185 : vector<56x64xi1>, vector<56x64xf32>
    %187 = arith.maximumf %175, %186 : vector<56x64xf32>
    %188 = vector.extract_strided_slice %83 {offsets = [0, 448], sizes = [56, 64], strides = [1, 1]} : vector<56x512xf32> to vector<56x64xf32>
    %189 = vector.extract_strided_slice %85 {offsets = [0, 448], sizes = [56, 64], strides = [1, 1]} : vector<56x512xf32> to vector<56x64xf32>
    %190 = arith.cmpf olt, %188, %68 : vector<56x64xf32>
    %191 = arith.cmpf oeq, %188, %68 : vector<56x64xf32>
    %c7_i32 = arith.constant 7 : i32
    %192 = vector.broadcast %c7_i32 : i32 to vector<1x64xi32>
    %193 = arith.cmpi sgt, %102, %192 : vector<1x64xi32>
    %194 = vector.broadcast %193 : vector<1x64xi1> to vector<56x64xi1>
    %195 = arith.andi %191, %194 : vector<56x64xi1>
    %196 = arith.ori %190, %195 : vector<56x64xi1>
    %cst_93 = arith.constant -1.000000e+30 : f32
    %197 = vector.broadcast %cst_93 : f32 to vector<56x64xf32>
    %198 = arith.select %196, %189, %197 : vector<56x64xi1>, vector<56x64xf32>
    %199 = arith.maximumf %187, %198 : vector<56x64xf32>
    %200 = arith.maximumf %68, %199 : vector<56x64xf32>
    %201 = arith.subf %81, %200 : vector<56x64xf32>
    %cst_94 = arith.constant 0.000000e+00 : f32
    %202 = vector.broadcast %cst_94 : f32 to vector<56x64xf32>
    %203 = arith.maximumf %201, %202 : vector<56x64xf32>
    %c0_95 = arith.constant 0 : index
    %c0_96 = arith.constant 0 : index
    %204 = vector.load %arg20[%c0_95, %c0_96] : memref<64x64xf32, #tpu.memory_space<vmem>>, vector<64x64xf32>
    %cst_97 = arith.constant dense<0.000000e+00> : vector<56x64xf32>
    %205 = tpu.matmul %203, %204, %cst_97 {dimension_numbers = #tpu.dot_dimension_numbers<[1], [0], [0], [1], [0, 0, 1, 1], [], []>} : vector<56x64xf32>, vector<64x64xf32>, vector<56x64xf32> -> vector<56x64xf32>
    %cst_98 = arith.constant dense<0xFF800000> : vector<56xf32>
    %206 = vector.multi_reduction <maximumf>, %205, %cst_98 [1] : vector<56x64xf32> to vector<56xf32>
    %207 = vector.shape_cast %206 : vector<56xf32> to vector<56x1xf32>
    %cst_99 = arith.constant dense<0.000000e+00> : vector<56xf32>
    %208 = vector.multi_reduction <add>, %203, %cst_99 [1] : vector<56x64xf32> to vector<56xf32>
    %209 = vector.shape_cast %208 : vector<56xf32> to vector<56x1xf32>
    %cst_100 = arith.constant 1.250000e-01 : f32
    %210 = vector.broadcast %cst_100 : f32 to vector<56x1xf32>
    %211 = arith.mulf %209, %210 : vector<56x1xf32>
    %c0_101 = arith.constant 0 : index
    %c0_102 = arith.constant 0 : index
    %212 = memref.load %arg21[%c0_101, %c0_102] : memref<1x1xf32, #tpu.memory_space<smem>>
    %213 = vector.broadcast %212 : f32 to vector<56x1xf32>
    %214 = arith.mulf %213, %207 : vector<56x1xf32>
    %cst_103 = arith.constant 1.000000e+00 : f32
    %215 = arith.subf %cst_103, %212 : f32
    %216 = vector.broadcast %215 : f32 to vector<56x1xf32>
    %217 = arith.mulf %216, %211 : vector<56x1xf32>
    %218 = arith.addf %214, %217 : vector<56x1xf32>
    %c0_104 = arith.constant 0 : index
    %c0_105 = arith.constant 0 : index
    %219 = vector.load %arg22[%c0_104, %c0_105] : memref<56x1xf32, #tpu.memory_space<vmem>>, vector<56x1xf32>
    tpu.vector_store %arg22[%c0_104, %c0_105], %218 {strides = array<i32>} : memref<56x1xf32, #tpu.memory_space<vmem>>, vector<56x1xf32>,
    return
  }
  func.func @transform_0(%arg0: i32) -> (i32, i32) {
    %c0_i32 = arith.constant 0 : i32
    %c0_i32_0 = arith.constant 0 : i32
    return %arg0, %c0_i32 : i32, i32
  }
  func.func @transform_1(%arg0: i32) -> (i32, i32) {
    %c0_i32 = arith.constant 0 : i32
    %c0_i32_0 = arith.constant 0 : i32
    return %arg0, %c0_i32 : i32, i32
  }
  func.func @transform_2(%arg0: i32) -> (i32, i32) {
    %c0_i32 = arith.constant 0 : i32
    %c0_i32_0 = arith.constant 0 : i32
    return %arg0, %c0_i32 : i32, i32
  }
  func.func @transform_3(%arg0: i32) -> (i32, i32) {
    %c0_i32 = arith.constant 0 : i32
    %c0_i32_0 = arith.constant 0 : i32
    %c0_i32_1 = arith.constant 0 : i32
    return %c0_i32, %c0_i32_0 : i32, i32
  }
  func.func @transform_4(%arg0: i32) -> (i32, i32) {
    %c0_i32 = arith.constant 0 : i32
    %c0_i32_0 = arith.constant 0 : i32
    %c0_i32_1 = arith.constant 0 : i32
    return %c0_i32, %c0_i32_0 : i32, i32
  }
  func.func @transform_5(%arg0: i32) -> (i32, i32) {
    %c0_i32 = arith.constant 0 : i32
    %c0_i32_0 = arith.constant 0 : i32
    %c0_i32_1 = arith.constant 0 : i32
    return %c0_i32, %c0_i32_0 : i32, i32
  }
  func.func @transform_6(%arg0: i32) -> (i32, i32) {
    %c0_i32 = arith.constant 0 : i32
    %c0_i32_0 = arith.constant 0 : i32
    %c0_i32_1 = arith.constant 0 : i32
    return %c0_i32, %c0_i32_0 : i32, i32
  }
  func.func @transform_7(%arg0: i32) -> (i32, i32) {
    %c0_i32 = arith.constant 0 : i32
    %c0_i32_0 = arith.constant 0 : i32
    %c0_i32_1 = arith.constant 0 : i32
    return %c0_i32, %c0_i32_0 : i32, i32
  }
  func.func @transform_8(%arg0: i32) -> (i32, i32) {
    %c0_i32 = arith.constant 0 : i32
    %c0_i32_0 = arith.constant 0 : i32
    %c0_i32_1 = arith.constant 0 : i32
    return %c0_i32, %c0_i32_0 : i32, i32
  }
  func.func @transform_9(%arg0: i32) -> (i32, i32) {
    %c0_i32 = arith.constant 0 : i32
    %c0_i32_0 = arith.constant 0 : i32
    %c0_i32_1 = arith.constant 0 : i32
    return %c0_i32, %c0_i32_0 : i32, i32
  }
  func.func @transform_10(%arg0: i32) -> (i32, i32) {
    %c0_i32 = arith.constant 0 : i32
    %c0_i32_0 = arith.constant 0 : i32
    %c0_i32_1 = arith.constant 0 : i32
    return %c0_i32, %c0_i32_0 : i32, i32
  }
  func.func @transform_11(%arg0: i32) -> (i32, i32) {
    %c0_i32 = arith.constant 0 : i32
    %c0_i32_0 = arith.constant 0 : i32
    %c0_i32_1 = arith.constant 0 : i32
    return %c0_i32, %c0_i32_0 : i32, i32
  }
  func.func @transform_12(%arg0: i32) -> (i32, i32) {
    %c0_i32 = arith.constant 0 : i32
    %c0_i32_0 = arith.constant 0 : i32
    %c0_i32_1 = arith.constant 0 : i32
    return %c0_i32, %c0_i32_0 : i32, i32
  }
  func.func @transform_13(%arg0: i32) -> (i32, i32) {
    %c0_i32 = arith.constant 0 : i32
    %c0_i32_0 = arith.constant 0 : i32
    %c0_i32_1 = arith.constant 0 : i32
    return %c0_i32, %c0_i32_0 : i32, i32
  }
  func.func @transform_14(%arg0: i32) -> (i32, i32) {
    %c0_i32 = arith.constant 0 : i32
    %c0_i32_0 = arith.constant 0 : i32
    %c0_i32_1 = arith.constant 0 : i32
    return %c0_i32, %c0_i32_0 : i32, i32
  }
  func.func @transform_15(%arg0: i32) -> (i32, i32) {
    %c0_i32 = arith.constant 0 : i32
    %c0_i32_0 = arith.constant 0 : i32
    %c0_i32_1 = arith.constant 0 : i32
    return %c0_i32, %c0_i32_0 : i32, i32
  }
  func.func @transform_16(%arg0: i32) -> (i32, i32) {
    %c0_i32 = arith.constant 0 : i32
    %c0_i32_0 = arith.constant 0 : i32
    %c0_i32_1 = arith.constant 0 : i32
    return %c0_i32, %c0_i32_0 : i32, i32
  }
  func.func @transform_17(%arg0: i32) -> (i32, i32) {
    %c0_i32 = arith.constant 0 : i32
    %c0_i32_0 = arith.constant 0 : i32
    %c0_i32_1 = arith.constant 0 : i32
    return %c0_i32, %c0_i32_0 : i32, i32
  }
  func.func @transform_18(%arg0: i32) -> (i32, i32) {
    %c0_i32 = arith.constant 0 : i32
    %c0_i32_0 = arith.constant 0 : i32
    %c0_i32_1 = arith.constant 0 : i32
    return %c0_i32, %c0_i32_0 : i32, i32
  }
  func.func @transform_19(%arg0: i32) -> (i32, i32) {
    %c0_i32 = arith.constant 0 : i32
    %c0_i32_0 = arith.constant 0 : i32
    %c0_i32_1 = arith.constant 0 : i32
    return %c0_i32, %c0_i32_0 : i32, i32
  }
  func.func @transform_20(%arg0: i32) -> (i32, i32) {
    %c0_i32 = arith.constant 0 : i32
    %c0_i32_0 = arith.constant 0 : i32
    %c0_i32_1 = arith.constant 0 : i32
    return %c0_i32, %c0_i32_0 : i32, i32
  }
  func.func @transform_21(%arg0: i32) -> (i32, i32) {
    %c0_i32 = arith.constant 0 : i32
    %c0_i32_0 = arith.constant 0 : i32
    return %arg0, %c0_i32 : i32, i32
  }
}

</mosaic_0001>

<bundles_post_ra>
// kernel: tpu_custom_call.1
= control target key start
LH: loop header
LB: loop body
LE: loop exit
PB: predicated region body
PF: predicated region fallthrough
CT: control target
= control target key end

     0   :  { %s6515_s0 = inlined_call_operand.vmem [shape: f32[56,16], index: 0, kind: input, shape index: {}]   ;;  %s6516_s1 = inlined_call_operand.vmem [shape: f32[56,16], index: 1, kind: input, shape index: {}]   ;;  %s6517_s2 = inlined_call_operand.vmem [shape: f32[56,4], index: 2, kind: input, shape index: {}]   ;;  %s6518_s3 = inlined_call_operand.hbm [shape: f32[16,64], index: 3, kind: input, shape index: {}]   ;;  %s6519_s4 = inlined_call_operand.vmem [shape: f32[1,64], index: 4, kind: input, shape index: {}]   ;;  %s6520_s5 = inlined_call_operand.vmem [shape: f32[64,64], index: 5, kind: input, shape index: {}]   ;;  %s6521_s6 = inlined_call_operand.vmem [shape: f32[1,64], index: 6, kind: input, shape index: {}]   ;;  %s6522_s7 = inlined_call_operand.vmem [shape: f32[64,32], index: 7, kind: input, shape index: {}]   ;;  %s6523_s8 = inlined_call_operand.vmem [shape: f32[1,32], index: 8, kind: input, shape index: {}]   ;;  %s6524_s9 = inlined_call_operand.hbm [shape: f32[32,64], index: 9, kind: input, shape index: {}]   ;;  %s6525_s10 = inlined_call_operand.vmem [shape: f32[4,64], index: 10, kind: input, shape index: {}]   ;;  %s6526_s11 = inlined_call_operand.vmem [shape: f32[1,64], index: 11, kind: input, shape index: {}]   ;;  %s6527_s12 = inlined_call_operand.vmem [shape: f32[64,32], index: 12, kind: input, shape index: {}]   ;;  %s6528_s13 = inlined_call_operand.vmem [shape: f32[1,32], index: 13, kind: input, shape index: {}]   ;;  %s6529_s14 = inlined_call_operand.hbm [shape: f32[32,64], index: 14, kind: input, shape index: {}]   ;;  %s6530_s15 = inlined_call_operand.vmem [shape: f32[1,64], index: 15, kind: input, shape index: {}]   ;;  %s6531_s16 = inlined_call_operand.vmem [shape: f32[64,64], index: 16, kind: input, shape index: {}]   ;;  %s6532_s17 = inlined_call_operand.vmem [shape: f32[1,64], index: 17, kind: input, shape index: {}]   ;;  %s6533_s18 = inlined_call_operand.vmem [shape: f32[64,512], index: 18, kind: input, shape index: {}]   ;;  %s6534_s19 = inlined_call_operand.hbm [shape: f32[64,64], index: 19, kind: input, shape index: {}]   ;;  %s6535_s20 = inlined_call_operand.<no memory space> [shape: f32[1,1], index: 20, kind: input, shape index: {}]   ;;  %s6536_s21 = inlined_call_operand.vmem [shape: f32[56,1], index: 21, kind: output, shape index: {}]  }
   0x1   :  { %6606 = sst [smem:[#allocation41_spill]] %s6515_s0 }
   0x2   :  { %6607 = sst [smem:[#allocation42_spill]] %s6516_s1 }
   0x3   :  { %6608 = sst [smem:[#allocation43_spill]] %s6517_s2 }
   0x4   :  { %6609 = sst [smem:[#allocation44_spill]] %s6518_s3 }
   0x5   :  { %6610 = sst [smem:[#allocation45_spill]] %s6519_s4 }
   0x6   :  { %6611 = sst [smem:[#allocation46_spill]] %s6520_s5 }
   0x7   :  { %27 = vsyncpa [#allocation4], 0 }
   0x8   :  { %28 = vsyncpa [#allocation6], 0 }
   0x9   :  { %29 = vsyncpa [#allocation9], 0  ;;  %s4040_s2 = smov [#allocation5]   ;;  %s4041_s26 = smov [#allocation3]  }
   0xa   :  { %s63_s25 = sshll.u32 %s4040_s2, 4  ;;  %s41_s27 = sshll.u32 %s4041_s26, 4  ;;  %s64_s25 = int_to_ptr.vmem [resolvable:$true] %s63_s25  ;;  %s42_s27 = int_to_ptr.vmem [resolvable:$true] %s41_s27 }
   0xb   :  { %s3962_s3 = scalar_lea.vmem %s64_s25, 512  ;;  %p3967_p1 = scmp.lt.s32.totalorder %s64_s25, %s64_s25 }
   0xc   :  { %p3963_p0 = scmp.ne.s32.totalorder %s64_s25, %s3962_s3  ;;  %p3968_p2 = scmp.lt.s32.totalorder %s3962_s3, %s3962_s3 }
   0xe   :  { %p3969_p3 = por %p3968_p2, %p3967_p1 }
  0x10   :  { %p3970_p4 = pnand %p3969_p3, %p3963_p0 }
  0x12   :  { %3973 = shalt.err (!%p3970_p4)
}
  0x13   :  { %s4042_s28 = smov 128   ;;  %s4043_s29 = smov 8  }
  0x14   :  { %69 = dma.hbm_to_vmem [thread:$0]  %s6524_s9, 512, %s64_s25, [#allocation6], %s4042_s28, %s4042_s28, %s4043_s29  }
  0x15   :  { %s3982_s30 = scalar_lea.vmem %s42_s27, 256  ;;  %p3987_p6 = scmp.lt.s32.totalorder %s42_s27, %s42_s27 }
  0x16   :  { %p3983_p5 = scmp.ne.s32.totalorder %s42_s27, %s3982_s30  ;;  %p3988_p7 = scmp.lt.s32.totalorder %s3982_s30, %s3982_s30 }
  0x18   :  { %p3989_p8 = por %p3988_p7, %p3987_p6 }
  0x1a   :  { %p3990_p9 = pnand %p3989_p8, %p3983_p5 }
  0x1c   :  { %3993 = shalt.err (!%p3990_p9)
}
  0x1d   :  { %s6612_s23 = sld [smem:[#allocation44_spill]]  ;;  %s4044_s1 = smov [#allocation7]  }
  0x1e   :  { %s83_s24 = sshll.u32 %s4044_s1, 4  ;;  %s4045_s2 = smov [#allocation8]   ;;  %s84_s24 = int_to_ptr.vmem [resolvable:$true] %s83_s24 }
  0x1f   :  { %s103_s26 = sshll.u32 %s4045_s2, 4  ;;  %s4002_s9 = scalar_lea.vmem %s84_s24, 512  ;;  %s104_s26 = int_to_ptr.vmem [resolvable:$true] %s103_s26 }
  0x20   :  { %p4003_p10 = scmp.ne.s32.totalorder %s84_s24, %s4002_s9  ;;  %p4007_p11 = scmp.lt.s32.totalorder %s84_s24, %s84_s24 }
  0x21   :  { %p4008_p12 = scmp.lt.s32.totalorder %s4002_s9, %s4002_s9 }
  0x23   :  { %47 = dma.hbm_to_vmem [thread:$0]  %s6612_s23, 256, %s42_s27, [#allocation4], %s4042_s28, %s4042_s28, %s4043_s29  }
  0x24   :  { %p4009_p13 = por %p4008_p12, %p4007_p11 }
  0x26   :  { %p4010_p0 = pnand %p4009_p13, %p4003_p10 }
  0x28   :  { %4013 = shalt.err (!%p4010_p0)
}
  0x29   :  { %89 = dma.hbm_to_vmem [thread:$0]  %s6529_s14, 512, %s84_s24, [#allocation6], %s4042_s28, %s4042_s28, %s4043_s29  }
  0x2a   :  { %s4022_s27 = scalar_lea.vmem %s104_s26, 1024  ;;  %p4027_p2 = scmp.lt.s32.totalorder %s104_s26, %s104_s26 }
  0x2b   :  { %p4023_p1 = scmp.ne.s32.totalorder %s104_s26, %s4022_s27  ;;  %p4028_p3 = scmp.lt.s32.totalorder %s4022_s27, %s4022_s27 }
  0x2d   :  { %p4029_p4 = por %p4028_p3, %p4027_p2 }
  0x2f   :  { %p4030_p5 = pnand %p4029_p4, %p4023_p1 }
  0x31   :  { %4033 = shalt.err (!%p4030_p5)
}
  0x32   :  { %109 = dma.hbm_to_vmem [thread:$0]  %s6534_s19, 1024, %s104_s26, [#allocation9], %s4042_s28, %s4042_s28, %s4043_s29  }
  0x33   :  { %4034 = dma.done.wait [#allocation4], 256  }
  0x34   :  { %4035 = vsyncadd [#allocation4], 4294967040 }
  0x35   :  { %4036 = dma.done.wait [#allocation6], 1024  }
  0x36   :  { %4037 = vsyncadd [#allocation6], 4294966272 }
  0x37   :  { %4038 = dma.done.wait [#allocation9], 1024  }
  0x38   :  { %4039 = vsyncadd [#allocation9], 4294966272  ;;  %v6554_v0 = vmov 0.0   ;;  %vm6541_vm0 = vmmov 0   ;;  %v4190_v1 = vld [vmem:[#allocation3 + $0x8] sm:$0xff]  ;;  %v4192_v2 = vld [vmem:[#allocation3] sm:$0xff] }
  0x39   :  { %3472 = vmatprep.subr.mxu0 %v6554_v0  ;;  %3476 = vmatprep.mubr.msk.f32.mxu0 %vm6541_vm0, %v6554_v0  ;;  %s6613_s28 = sld [smem:[#allocation41_spill]]  ;;  %vm140_vm1 = vcmask 130048   ;;  %v4299_v18 = vld [vmem:[%s6522_s7 + $0x38] sm:$0xff]  ;;  %v4304_v19 = vld [vmem:[%s6522_s7 + $0x30] sm:$0xff]  ;;  %v4311_v20 = vld [vmem:[%s6522_s7 + $0x28] sm:$0xff]  ;;  %vm6543_vm2 = vcmask 523264  }
  0x3a   :  { %3497 = vmatprep.subr.mxu1 %v6554_v0  ;;  %3513 = vmatprep.mubr.msk.f32.mxu1 %vm6541_vm0, %v6554_v0  ;;  %s6614_s5 = sld [smem:[#allocation46_spill]]  ;;  %v4318_v21 = vld [vmem:[%s6522_s7 + $0x20] sm:$0xff]  ;;  %v4325_v22 = vld [vmem:[%s6522_s7 + $0x18] sm:$0xff]  ;;  %v4332_v23 = vld [vmem:[%s6522_s7 + $0x10] sm:$0xff]  ;;  %vm967_vm3 = vcmask 1043456   ;;  %vm945_vm4 = vcmask 31744  }
  0x3b   :  { %3473 = vmatpush3.msra.mxu0 %v4190_v1  ;;  %v4339_v24 = vld [vmem:[%s6522_s7 + $0x8] sm:$0xff]  ;;  %s6615_s3 = sld [smem:[#allocation45_spill]]  ;;  %v4441_v61 = vld [vmem:[%s6522_s7] sm:$0xff]  ;;  %vm1071_vm5 = vcmask 261120  }
  0x3c   :  { %3474 = vmatprep.subr.mxu0 %v6554_v0  ;;  %s6616_s0 = sld [smem:[#allocation42_spill]]  ;;  %v4450_v62 = vld [vmem:[%s6521_s6] ss:$0 sm:$0xff] }
  0x3d   :  { %3475 = vmatpush3.msra.mxu0 %v4192_v2  ;;  %s6617_s4 = sld [smem:[#allocation43_spill]] }
  0x3e   :  { %3534 = vmatprep.subr.mxu0 %v6554_v0 }
  0x3f   :  { %v124_v3 = vld [vmem:[%s6613_s28] sm:$0xff]  ;;  %v125_v6 = vld [vmem:[%s6613_s28 + $0x8] sm:$0xff]  ;;  %v126_v9 = vld [vmem:[%s6613_s28 + $0x10] sm:$0xff] }
  0x40   :  { %v4203_v4 = vld [vmem:[%s6614_s5 + $0x38] sm:$0xff]  ;;  %v4208_v5 = vld [vmem:[%s6614_s5 + $0x30] sm:$0xff]  ;;  %3477 = vmatmul.mubr.msk.f32.vlgmr.msra.gmra.mxu0 %vm140_vm1, %v124_v3  ;;  %v4221_v7 = vld [vmem:[%s6614_s5 + $0x28] sm:$0xff] }
  0x41   :  { %3498 = vmatpush3.msra.mxu1 %v4203_v4  ;;  %3479 = vmatprep.mubr.msk.f32.mxu0 %vm6541_vm0, %v6554_v0  ;;  %v4229_v8 = vld [vmem:[%s6614_s5 + $0x20] sm:$0xff]  ;;  %v4242_v10 = vld [vmem:[%s6614_s5 + $0x18] sm:$0xff]  ;;  %v4249_v11 = vld [vmem:[%s6614_s5 + $0x10] sm:$0xff] }
  0x42   :  { %3499 = vmatprep.subr.mxu1 %v6554_v0  ;;  %v127_v12 = vld [vmem:[%s6613_s28 + $0x18] sm:$0xff]  ;;  %v128_v13 = vld [vmem:[%s6613_s28 + $0x20] sm:$0xff]  ;;  %v129_v14 = vld [vmem:[%s6613_s28 + $0x28] sm:$0xff]  ;;  %3535 = vmatpush3.msra.mxu0 %v4299_v18 }
  0x43   :  { %3500 = vmatpush3.msra.mxu1 %v4208_v5  ;;  %v130_v15 = vld [vmem:[%s6613_s28 + $0x30] sm:$0xff]  ;;  %v4285_v16 = vld [vmem:[%s6614_s5 + $0x8] sm:$0xff]  ;;  %v4292_v17 = vld [vmem:[%s6614_s5] sm:$0xff]  ;;  %3536 = vmatprep.subr.mxu0 %v6554_v0 }
  0x44   :  { %3501 = vmatprep.subr.mxu1 %v6554_v0  ;;  %3480 = vmatmul.mubr.msk.f32.gmra.mxu0 %vm140_vm1, %v125_v6  ;;  %v4348_v25 = vld [vmem:[%s6615_s3] ss:$0 sm:$0xff]  ;;  %v550_v55 = vld [vmem:[%s6616_s0 + $0x8] sm:$0xff]  ;;  %v551_v56 = vld [vmem:[%s6616_s0 + $0x10] sm:$0xff]  ;;  %s3128_s3 = ssub.f32 1.0, %s6535_s20 }
  0x45   :  { %3502 = vmatpush3.msra.mxu1 %v4221_v7  ;;  %3482 = vmatprep.mubr.msk.f32.mxu0 %vm6541_vm0, %v6554_v0  ;;  %v549_v54 = vld [vmem:[%s6616_s0] sm:$0xff]  ;;  %v552_v57 = vld [vmem:[%s6616_s0 + $0x18] sm:$0xff]  ;;  %v554_v59 = vld [vmem:[%s6616_s0 + $0x28] sm:$0xff] }
  0x46   :  { %3503 = vmatprep.subr.mxu1 %v6554_v0  ;;  %3537 = vmatpush3.msra.mxu0 %v4304_v19  ;;  %v553_v58 = vld [vmem:[%s6616_s0 + $0x20] sm:$0xff]  ;;  %v555_v60 = vld [vmem:[%s6616_s0 + $0x30] sm:$0xff] }
  0x47   :  { %3504 = vmatpush3.msra.mxu1 %v4229_v8  ;;  %3538 = vmatprep.subr.mxu0 %v6554_v0 }
  0x48   :  { %3505 = vmatprep.subr.mxu1 %v6554_v0  ;;  %3483 = vmatmul.mubr.msk.f32.gmra.mxu0 %vm140_vm1, %v126_v9 }
  0x49   :  { %3506 = vmatpush3.msra.mxu1 %v4242_v10  ;;  %3485 = vmatprep.mubr.msk.f32.mxu0 %vm6541_vm0, %v6554_v0 }
  0x4a   :  { %3507 = vmatprep.subr.mxu1 %v6554_v0  ;;  %3539 = vmatpush3.msra.mxu0 %v4311_v20 }
  0x4b   :  { %3508 = vmatpush3.msra.mxu1 %v4249_v11  ;;  %3540 = vmatprep.subr.mxu0 %v6554_v0 }
  0x4c   :  { %3509 = vmatprep.subr.mxu1 %v6554_v0  ;;  %3486 = vmatmul.mubr.msk.f32.gmra.mxu0 %vm140_vm1, %v127_v12 }
  0x4d   :  { %3488 = vmatprep.mubr.msk.f32.mxu0 %vm6541_vm0, %v6554_v0  ;;  %3510 = vmatpush3.msra.mxu1 %v4285_v16 }
  0x4e   :  { %3511 = vmatprep.subr.mxu1 %v6554_v0  ;;  %3541 = vmatpush3.msra.mxu0 %v4318_v21 }
  0x4f   :  { %3512 = vmatpush3.msra.mxu1 %v4292_v17  ;;  %3542 = vmatprep.subr.mxu0 %v6554_v0 }
  0x50   :  { %3489 = vmatmul.mubr.msk.f32.gmra.mxu0 %vm140_vm1, %v128_v13  ;;  %3571 = vmatprep.subr.mxu1 %v6554_v0 }
  0x51   :  { %3491 = vmatprep.mubr.msk.f32.mxu0 %vm6541_vm0, %v6554_v0  ;;  %3543 = vmatpush3.msra.mxu0 %v4325_v22 }
  0x52   :  { %3544 = vmatprep.subr.mxu0 %v6554_v0 }
  0x53   :  { %3545 = vmatpush3.msra.mxu0 %v4332_v23 }
  0x54   :  { %3492 = vmatmul.mubr.msk.f32.gmra.mxu0 %vm140_vm1, %v129_v14  ;;  %3546 = vmatprep.subr.mxu0 %v6554_v0 }
  0x55   :  { %3494 = vmatprep.mubr.msk.f32.mxu0 %vm6541_vm0, %v6554_v0  ;;  %3547 = vmatpush3.msra.mxu0 %v4339_v24 }
  0x56   :  { %3548 = vmatprep.subr.mxu0 %v6554_v0 }
  0x57   :  { %3549 = vmatpush3.msra.mxu0 %v4441_v61 }
  0x58   :  { %3495 = vmatmul.mubr.msk.f32.gmra.mxu0 %vm140_vm1, %v130_v15  ;;  %3596 = vmatprep.subr.mxu0 %v6554_v0 }
  0x59   :  { %3550 = vmatprep.mubr.msk.f32.mxu0 %vm6541_vm0, %v6554_v0 }
 0x100   :  { %v228_v26 = vpop.f32.mrf.mxu0 }
 0x101   :  { %v229_v27 = vadd.f32 %v4348_v25, %v228_v26 }
 0x102   :  { %v3478_v28 = vpop.f32.mrf.mxu0 }
 0x103   :  { %v262_v29 = vmax.f32 %v229_v27, 0.0 }
 0x104   :  { %v233_v30 = vpop.f32.mrf.mxu0 }
 0x105   :  { %v234_v31 = vadd.f32 %v4348_v25, %v233_v30  ;;  %3514 = vmatmul.mubr.msk.f32.vlgmr.msra.gmra.mxu1 %vm6543_vm2, %v262_v29 }
 0x106   :  { %3572 = vmatpush3.msra.mxu1 %v4190_v1  ;;  %v3481_v32 = vpop.f32.mrf.mxu0  ;;  %3516 = vmatprep.mubr.msk.f32.mxu1 %vm6541_vm0, %v6554_v0 }
 0x107   :  { %v263_v33 = vmax.f32 %v234_v31, 0.0  ;;  %3573 = vmatprep.subr.mxu1 %v6554_v0 }
 0x108   :  { %v238_v34 = vpop.f32.mrf.mxu0  ;;  %3574 = vmatpush3.msra.mxu1 %v4192_v2 }
 0x109   :  { %v239_v35 = vadd.f32 %v4348_v25, %v238_v34  ;;  %3517 = vmatmul.mubr.msk.f32.gmra.mxu1 %vm6543_vm2, %v263_v33  ;;  %3928 = vmatprep.subr.mxu1 %v6554_v0 }
 0x10a   :  { %v3484_v36 = vpop.f32.mrf.mxu0  ;;  %3519 = vmatprep.mubr.msk.f32.mxu1 %vm6541_vm0, %v6554_v0 }
 0x10b   :  { %v264_v37 = vmax.f32 %v239_v35, 0.0 }
 0x10c   :  { %v243_v38 = vpop.f32.mrf.mxu0 }
 0x10d   :  { %v244_v39 = vadd.f32 %v4348_v25, %v243_v38  ;;  %3520 = vmatmul.mubr.msk.f32.gmra.mxu1 %vm6543_vm2, %v264_v37 }
 0x10e   :  { %v3487_v40 = vpop.f32.mrf.mxu0  ;;  %3522 = vmatprep.mubr.msk.f32.mxu1 %vm6541_vm0, %v6554_v0 }
 0x10f   :  { %v265_v41 = vmax.f32 %v244_v39, 0.0 }
 0x110   :  { %v248_v42 = vpop.f32.mrf.mxu0 }
 0x111   :  { %v249_v43 = vadd.f32 %v4348_v25, %v248_v42  ;;  %3523 = vmatmul.mubr.msk.f32.gmra.mxu1 %vm6543_vm2, %v265_v41 }
 0x112   :  { %v3490_v44 = vpop.f32.mrf.mxu0  ;;  %3525 = vmatprep.mubr.msk.f32.mxu1 %vm6541_vm0, %v6554_v0 }
 0x113   :  { %v266_v45 = vmax.f32 %v249_v43, 0.0 }
 0x114   :  { %v253_v46 = vpop.f32.mrf.mxu0 }
 0x115   :  { %v254_v47 = vadd.f32 %v4348_v25, %v253_v46  ;;  %3526 = vmatmul.mubr.msk.f32.gmra.mxu1 %vm6543_vm2, %v266_v45 }
 0x116   :  { %v3493_v48 = vpop.f32.mrf.mxu0  ;;  %3528 = vmatprep.mubr.msk.f32.mxu1 %vm6541_vm0, %v6554_v0 }
 0x117   :  { %v267_v49 = vmax.f32 %v254_v47, 0.0 }
 0x118   :  { %v258_v50 = vpop.f32.mrf.mxu0 }
 0x119   :  { %v259_v51 = vadd.f32 %v4348_v25, %v258_v50  ;;  %3529 = vmatmul.mubr.msk.f32.gmra.mxu1 %vm6543_vm2, %v267_v49 }
 0x11a   :  { %v3496_v52 = vpop.f32.mrf.mxu0  ;;  %3531 = vmatprep.mubr.msk.f32.mxu1 %vm6541_vm0, %v6554_v0 }
 0x11b   :  { %v268_v53 = vmax.f32 %v259_v51, 0.0 }
 0x11d   :  { %3532 = vmatmul.mubr.msk.f32.gmra.mxu1 %vm6543_vm2, %v268_v53 }
 0x11e   :  { %3575 = vmatprep.mubr.msk.f32.mxu1 %vm6541_vm0, %v6554_v0 }
 0x121   :  { %3576 = vmatmul.mubr.msk.f32.vlgmr.msra.gmra.mxu1 %vm140_vm1, %v549_v54 }
 0x122   :  { %3578 = vmatprep.mubr.msk.f32.mxu1 %vm6541_vm0, %v6554_v0  ;;  %3936 = vmatpush3.msra.mxu1 %v4299_v18 }
 0x123   :  { %3929 = vmatprep.subr.mxu1 %v6554_v0 }
 0x124   :  { %3937 = vmatpush3.msra.mxu1 %v4304_v19 }
 0x125   :  { %3579 = vmatmul.mubr.msk.f32.gmra.mxu1 %vm140_vm1, %v550_v55  ;;  %3930 = vmatprep.subr.mxu1 %v6554_v0 }
 0x126   :  { %3581 = vmatprep.mubr.msk.f32.mxu1 %vm6541_vm0, %v6554_v0  ;;  %3938 = vmatpush3.msra.mxu1 %v4311_v20 }
 0x127   :  { %3931 = vmatprep.subr.mxu1 %v6554_v0 }
 0x128   :  { %3939 = vmatpush3.msra.mxu1 %v4318_v21 }
 0x129   :  { %3582 = vmatmul.mubr.msk.f32.gmra.mxu1 %vm140_vm1, %v551_v56  ;;  %3932 = vmatprep.subr.mxu1 %v6554_v0 }
 0x12a   :  { %3584 = vmatprep.mubr.msk.f32.mxu1 %vm6541_vm0, %v6554_v0  ;;  %3940 = vmatpush3.msra.mxu1 %v4325_v22 }
 0x12b   :  { %3933 = vmatprep.subr.mxu1 %v6554_v0 }
 0x12c   :  { %3941 = vmatpush3.msra.mxu1 %v4332_v23 }
 0x12d   :  { %3585 = vmatmul.mubr.msk.f32.gmra.mxu1 %vm140_vm1, %v552_v57  ;;  %3934 = vmatprep.subr.mxu1 %v6554_v0 }
 0x12e   :  { %3587 = vmatprep.mubr.msk.f32.mxu1 %vm6541_vm0, %v6554_v0  ;;  %3942 = vmatpush3.msra.mxu1 %v4339_v24 }
 0x12f   :  { %3935 = vmatprep.subr.mxu1 %v6554_v0 }
 0x130   :  { %3943 = vmatpush3.msra.mxu1 %v4441_v61 }
 0x131   :  { %3588 = vmatmul.mubr.msk.f32.gmra.mxu1 %vm140_vm1, %v553_v58  ;;  %3693 = vmatprep.subr.mxu1 %v6554_v0 }
 0x132   :  { %3590 = vmatprep.mubr.msk.f32.mxu1 %vm6541_vm0, %v6554_v0 }
 0x135   :  { %3591 = vmatmul.mubr.msk.f32.gmra.mxu1 %vm140_vm1, %v554_v59 }
 0x136   :  { %3593 = vmatprep.mubr.msk.f32.mxu1 %vm6541_vm0, %v6554_v0 }
 0x139   :  { %3594 = vmatmul.mubr.msk.f32.gmra.mxu1 %vm140_vm1, %v555_v60 }
 0x13a   :  { %3652 = vmatprep.mubr.msk.f32.mxu1 %vm6541_vm0, %v6554_v0 }
 0x1c5   :  { %v372_v63 = vpop.f32.mrf.mxu1 }
 0x1c6   :  { %v373_v1 = vadd.f32 %v4450_v62, %v372_v63 }
 0x1c7   :  { %v3515_v2 = vpop.f32.mrf.mxu1 }
 0x1c8   :  { %v406_v3 = vmax.f32 %v373_v1, 0.0 }
 0x1c9   :  { %v377_v6 = vpop.f32.mrf.mxu1 }
 0x1ca   :  { %v378_v9 = vadd.f32 %v4450_v62, %v377_v6  ;;  %3551 = vmatmul.mubr.msk.f32.vlgmr.msra.gmra.mxu0 %vm6543_vm2, %v406_v3 }
 0x1cb   :  { %3597 = vmatpush3.msra.mxu0 %v4203_v4  ;;  %v3518_v12 = vpop.f32.mrf.mxu1  ;;  %3553 = vmatprep.mubr.msk.f32.mxu0 %vm6541_vm0, %v6554_v0 }
 0x1cc   :  { %v407_v13 = vmax.f32 %v378_v9, 0.0  ;;  %3598 = vmatprep.subr.mxu0 %v6554_v0 }
 0x1cd   :  { %v382_v14 = vpop.f32.mrf.mxu1  ;;  %3599 = vmatpush3.msra.mxu0 %v4208_v5 }
 0x1ce   :  { %v383_v15 = vadd.f32 %v4450_v62, %v382_v14  ;;  %3554 = vmatmul.mubr.msk.f32.gmra.mxu0 %vm6543_vm2, %v407_v13  ;;  %3600 = vmatprep.subr.mxu0 %v6554_v0 }
 0x1cf   :  { %v3521_v26 = vpop.f32.mrf.mxu1  ;;  %3556 = vmatprep.mubr.msk.f32.mxu0 %vm6541_vm0, %v6554_v0  ;;  %3601 = vmatpush3.msra.mxu0 %v4221_v7 }
 0x1d0   :  { %v408_v4 = vmax.f32 %v383_v15, 0.0  ;;  %3602 = vmatprep.subr.mxu0 %v6554_v0 }
 0x1d1   :  { %v387_v27 = vpop.f32.mrf.mxu1  ;;  %3603 = vmatpush3.msra.mxu0 %v4229_v8 }
 0x1d2   :  { %v388_v5 = vadd.f32 %v4450_v62, %v387_v27  ;;  %3557 = vmatmul.mubr.msk.f32.gmra.mxu0 %vm6543_vm2, %v408_v4  ;;  %3604 = vmatprep.subr.mxu0 %v6554_v0  ;;  %v944_v27 = vld [vmem:[%s6525_s10] sm:$0xf] }
 0x1d3   :  { %v3524_v28 = vpop.f32.mrf.mxu1  ;;  %3559 = vmatprep.mubr.msk.f32.mxu0 %vm6541_vm0, %v6554_v0  ;;  %3605 = vmatpush3.msra.mxu0 %v4242_v10 }
 0x1d4   :  { %v409_v29 = vmax.f32 %v388_v5, 0.0  ;;  %3606 = vmatprep.subr.mxu0 %v6554_v0 }
 0x1d5   :  { %v392_v7 = vpop.f32.mrf.mxu1  ;;  %3607 = vmatpush3.msra.mxu0 %v4249_v11 }
 0x1d6   :  { %v393_v8 = vadd.f32 %v4450_v62, %v392_v7  ;;  %3560 = vmatmul.mubr.msk.f32.gmra.mxu0 %vm6543_vm2, %v409_v29  ;;  %3608 = vmatprep.subr.mxu0 %v6554_v0  ;;  %v933_v7 = vld [vmem:[%s6617_s4] sm:$0xff] }
 0x1d7   :  { %v3527_v30 = vpop.f32.mrf.mxu1  ;;  %3562 = vmatprep.mubr.msk.f32.mxu0 %vm6541_vm0, %v6554_v0  ;;  %3609 = vmatpush3.msra.mxu0 %v4285_v16 }
 0x1d8   :  { %v410_v31 = vmax.f32 %v393_v8, 0.0  ;;  %3610 = vmatprep.subr.mxu0 %v6554_v0  ;;  %v943_v30 = vld [vmem:[#allocation5 + $0x18] sm:$0xff] }
 0x1d9   :  { %v397_v10 = vpop.f32.mrf.mxu1  ;;  %3611 = vmatpush3.msra.mxu0 %v4292_v17 }
 0x1da   :  { %v398_v11 = vadd.f32 %v4450_v62, %v397_v10  ;;  %3563 = vmatmul.mubr.msk.f32.gmra.mxu0 %vm6543_vm2, %v410_v31  ;;  %3633 = vmatprep.subr.mxu0 %v6554_v0 }
 0x1db   :  { %v3530_v32 = vpop.f32.mrf.mxu1  ;;  %3565 = vmatprep.mubr.msk.f32.mxu0 %vm6541_vm0, %v6554_v0 }
 0x1dc   :  { %v411_v33 = vmax.f32 %v398_v11, 0.0  ;;  %v942_v11 = vld [vmem:[#allocation5 + $0x10] sm:$0xff] }
 0x1dd   :  { %v402_v34 = vpop.f32.mrf.mxu1 }
 0x1de   :  { %v403_v16 = vadd.f32 %v4450_v62, %v402_v34  ;;  %3566 = vmatmul.mubr.msk.f32.gmra.mxu0 %vm6543_vm2, %v411_v33  ;;  %v941_v34 = vld [vmem:[#allocation5 + $0x8] sm:$0xff] }
 0x1df   :  { %v3533_v35 = vpop.f32.mrf.mxu1  ;;  %3568 = vmatprep.mubr.msk.f32.mxu0 %vm6541_vm0, %v6554_v0 }
 0x1e0   :  { %v412_v17 = vmax.f32 %v403_v16, 0.0  ;;  %v934_v35 = vld [vmem:[%s6617_s4 + $0x8] sm:$0xff] }
 0x1e1   :  { %v643_v36 = vpop.f32.mrf.mxu1 }
 0x1e2   :  { %v644_v37 = vadd.f32 %v4348_v25, %v643_v36  ;;  %3569 = vmatmul.mubr.msk.f32.gmra.mxu0 %vm6543_vm2, %v412_v17  ;;  %v940_v36 = vld [vmem:[#allocation5] sm:$0xff] }
 0x1e3   :  { %v3577_v38 = vpop.f32.mrf.mxu1  ;;  %3612 = vmatprep.mubr.msk.f32.mxu0 %vm6541_vm0, %v6554_v0 }
 0x1e4   :  { %v677_v39 = vmax.f32 %v644_v37, 0.0 }
 0x1e5   :  { %v648_v40 = vpop.f32.mrf.mxu1 }
 0x1e6   :  { %v649_v41 = vadd.f32 %v4348_v25, %v648_v40  ;;  %3613 = vmatmul.mubr.msk.f32.vlgmr.msra.gmra.mxu0 %vm6543_vm2, %v677_v39  ;;  %v935_v40 = vld [vmem:[%s6617_s4 + $0x10] sm:$0xff] }
 0x1e7   :  { %v3580_v42 = vpop.f32.mrf.mxu1  ;;  %3615 = vmatprep.mubr.msk.f32.mxu0 %vm6541_vm0, %v6554_v0  ;;  %3634 = vmatpush3.msra.mxu0 %v4299_v18 }
 0x1e8   :  { %v678_v43 = vmax.f32 %v649_v41, 0.0  ;;  %3635 = vmatprep.subr.mxu0 %v6554_v0 }
 0x1e9   :  { %v653_v44 = vpop.f32.mrf.mxu1  ;;  %3636 = vmatpush3.msra.mxu0 %v4304_v19 }
 0x1ea   :  { %v654_v45 = vadd.f32 %v4348_v25, %v653_v44  ;;  %3616 = vmatmul.mubr.msk.f32.gmra.mxu0 %vm6543_vm2, %v678_v43  ;;  %3637 = vmatprep.subr.mxu0 %v6554_v0 }
 0x1eb   :  { %v3583_v46 = vpop.f32.mrf.mxu1  ;;  %3618 = vmatprep.mubr.msk.f32.mxu0 %vm6541_vm0, %v6554_v0  ;;  %3638 = vmatpush3.msra.mxu0 %v4311_v20 }
 0x1ec   :  { %v679_v47 = vmax.f32 %v654_v45, 0.0  ;;  %3639 = vmatprep.subr.mxu0 %v6554_v0  ;;  %v936_v45 = vld [vmem:[%s6617_s4 + $0x18] sm:$0xff] }
 0x1ed   :  { %v658_v18 = vpop.f32.mrf.mxu1  ;;  %3640 = vmatpush3.msra.mxu0 %v4318_v21 }
 0x1ee   :  { %v659_v19 = vadd.f32 %v4348_v25, %v658_v18  ;;  %3619 = vmatmul.mubr.msk.f32.gmra.mxu0 %vm6543_vm2, %v679_v47  ;;  %3641 = vmatprep.subr.mxu0 %v6554_v0 }
 0x1ef   :  { %v3586_v48 = vpop.f32.mrf.mxu1  ;;  %3621 = vmatprep.mubr.msk.f32.mxu0 %vm6541_vm0, %v6554_v0  ;;  %3642 = vmatpush3.msra.mxu0 %v4325_v22 }
 0x1f0   :  { %v680_v49 = vmax.f32 %v659_v19, 0.0  ;;  %3643 = vmatprep.subr.mxu0 %v6554_v0  ;;  %v937_v48 = vld [vmem:[%s6617_s4 + $0x20] sm:$0xff] }
 0x1f1   :  { %v663_v20 = vpop.f32.mrf.mxu1  ;;  %3644 = vmatpush3.msra.mxu0 %v4332_v23 }
 0x1f2   :  { %v664_v21 = vadd.f32 %v4348_v25, %v663_v20  ;;  %3622 = vmatmul.mubr.msk.f32.gmra.mxu0 %vm6543_vm2, %v680_v49  ;;  %3645 = vmatprep.subr.mxu0 %v6554_v0 }
 0x1f3   :  { %v3589_v50 = vpop.f32.mrf.mxu1  ;;  %3624 = vmatprep.mubr.msk.f32.mxu0 %vm6541_vm0, %v6554_v0  ;;  %3646 = vmatpush3.msra.mxu0 %v4339_v24 }
 0x1f4   :  { %v681_v51 = vmax.f32 %v664_v21, 0.0  ;;  %3647 = vmatprep.subr.mxu0 %v6554_v0  ;;  %v4618_v50 = vld [vmem:[%s6523_s8] ss:$0 sm:$0xff]  ;;  %s4049_s8 = smov 64  }
 0x1f5   :  { %v668_v22 = vpop.f32.mrf.mxu1  ;;  %3648 = vmatpush3.msra.mxu0 %v4441_v61 }
 0x1f6   :  { %v669_v23 = vadd.f32 %v4348_v25, %v668_v22  ;;  %3625 = vmatmul.mubr.msk.f32.gmra.mxu0 %vm6543_vm2, %v681_v51  ;;  %3670 = vmatprep.subr.mxu0 %v6554_v0  ;;  %v939_v22 = vld [vmem:[%s6617_s4 + $0x30] sm:$0xff] }
 0x1f7   :  { %v3592_v52 = vpop.f32.mrf.mxu1  ;;  %3627 = vmatprep.mubr.msk.f32.mxu0 %vm6541_vm0, %v6554_v0 }
 0x1f8   :  { %v682_v53 = vmax.f32 %v669_v23, 0.0 }
 0x1f9   :  { %v673_v54 = vpop.f32.mrf.mxu1 }
 0x1fa   :  { %v674_v24 = vadd.f32 %v4348_v25, %v673_v54  ;;  %3628 = vmatmul.mubr.msk.f32.gmra.mxu0 %vm6543_vm2, %v682_v53 }
 0x1fb   :  { %v3595_v55 = vpop.f32.mrf.mxu1  ;;  %3630 = vmatprep.mubr.msk.f32.mxu0 %vm6541_vm0, %v6554_v0 }
 0x1fc   :  { %v683_v56 = vmax.f32 %v674_v24, 0.0 }
 0x1fe   :  { %3631 = vmatmul.mubr.msk.f32.gmra.mxu0 %vm6543_vm2, %v683_v56  ;;  %v1221_v56 = vld [vmem:[%s6527_s12 + $0x38] sm:$0xff] }
 0x1ff   :  { %3649 = vmatprep.mubr.msk.f32.mxu0 %vm6541_vm0, %v6554_v0 }
 0x28a   :  { %v4540_v57 = vpop.f32.mrf.mxu0 }
 0x28b   :  { %v4630_v51 = vadd.f32 %v4618_v50, %v4540_v57  ;;  %v1220_v57 = vld [vmem:[%s6527_s12 + $0x30] sm:$0xff] }
 0x28c   :  { %v3552_v58 = vpop.f32.mrf.mxu0 }
 0x28d   :  { %v1219_v58 = vld [vmem:[%s6527_s12 + $0x28] sm:$0xff] }
 0x28e   :  { %v4542_v59 = vpop.f32.mrf.mxu0 }
 0x28f   :  { %v4644_v23 = vadd.f32 %v4618_v50, %v4542_v59  ;;  %v1218_v59 = vld [vmem:[%s6527_s12 + $0x20] sm:$0xff] }
 0x290   :  { %v3555_v60 = vpop.f32.mrf.mxu0 }
 0x291   :  { %v1217_v60 = vld [vmem:[%s6527_s12 + $0x18] sm:$0xff] }
 0x292   :  { %v4544_v61 = vpop.f32.mrf.mxu0 }
 0x293   :  { %v4655_v52 = vadd.f32 %v4618_v50, %v4544_v61  ;;  %v1216_v61 = vld [vmem:[%s6527_s12 + $0x10] sm:$0xff] }
 0x294   :  { %v3558_v25 = vpop.f32.mrf.mxu0 }
 0x295   :  { %v1215_v25 = vld [vmem:[%s6527_s12 + $0x8] sm:$0xff] }
 0x296   :  { %v4546_v63 = vpop.f32.mrf.mxu0 }
 0x297   :  { %v4663_v53 = vadd.f32 %v4618_v50, %v4546_v63  ;;  %v1214_v63 = vld [vmem:[%s6527_s12] sm:$0xff] }
 0x298   :  { %v3561_v1 = vpop.f32.mrf.mxu0 }
 0x299   :  { %v4725_v1 = vld [vmem:[#allocation7 + $0x18] sm:$0xff] }
 0x29a   :  { %v4548_v2 = vpop.f32.mrf.mxu0 }
 0x29b   :  { %v4671_v54 = vadd.f32 %v4618_v50, %v4548_v2  ;;  %v4727_v2 = vld [vmem:[#allocation7 + $0x10] sm:$0xff] }
 0x29c   :  { %v3564_v3 = vpop.f32.mrf.mxu0 }
 0x29d   :  { %v4731_v3 = vld [vmem:[#allocation7 + $0x8] sm:$0xff] }
 0x29e   :  { %v4550_v6 = vpop.f32.mrf.mxu0 }
 0x29f   :  { %v4679_v24 = vadd.f32 %v4618_v50, %v4550_v6  ;;  %v4735_v6 = vld [vmem:[#allocation7] sm:$0xff] }
 0x2a0   :  { %v3567_v9 = vpop.f32.mrf.mxu0 }
 0x2a2   :  { %v4552_v12 = vpop.f32.mrf.mxu0 }
 0x2a3   :  { %v4687_v55 = vadd.f32 %v4618_v50, %v4552_v12 }
 0x2a4   :  { %v3570_v13 = vpop.f32.mrf.mxu0 }
 0x2a6   :  { %v771_v14 = vpop.f32.mrf.mxu0 }
 0x2a7   :  { %v772_v15 = vadd.f32 %v4450_v62, %v771_v14 }
 0x2a8   :  { %v3614_v26 = vpop.f32.mrf.mxu0 }
 0x2a9   :  { %v805_v4 = vmax.f32 %v772_v15, 0.0 }
 0x2aa   :  { %v776_v5 = vpop.f32.mrf.mxu0 }
 0x2ab   :  { %v777_v28 = vadd.f32 %v4450_v62, %v776_v5  ;;  %3650 = vmatmul.mubr.msk.f32.vlgmr.msra.gmra.mxu0 %vm6543_vm2, %v805_v4 }
 0x2ac   :  { %v3617_v29 = vpop.f32.mrf.mxu0  ;;  %3671 = vmatpush3.msk.msra.mxu0 %vm967_vm3, %v944_v27  ;;  %3672 = vmatprep.mubr.msk.f32.mxu0 %vm6541_vm0, %v6554_v0 }
 0x2ad   :  { %v806_v8 = vmax.f32 %v777_v28, 0.0  ;;  %3722 = vmatprep.subr.mxu0 %v6554_v0 }
 0x2ae   :  { %v781_v31 = vpop.f32.mrf.mxu0 }
 0x2af   :  { %v782_v10 = vadd.f32 %v4450_v62, %v781_v31  ;;  %3653 = vmatmul.mubr.msk.f32.vlgmr.msra.gmra.mxu1 %vm6543_vm2, %v806_v8  ;;  %3673 = vmatmul.mubr.msk.f32.vlgmr.msra.gmra.mxu0 %vm945_vm4, %v933_v7 }
 0x2b0   :  { %3694 = vmatpush3.msra.mxu1 %v943_v30  ;;  %v3620_v32 = vpop.f32.mrf.mxu0  ;;  %3655 = vmatprep.mubr.msk.f32.mxu1 %vm6541_vm0, %v6554_v0 }
 0x2b1   :  { %v807_v33 = vmax.f32 %v782_v10, 0.0  ;;  %3695 = vmatprep.subr.mxu1 %v6554_v0  ;;  %3675 = vmatprep.mubr.msk.f32.mxu0 %vm6541_vm0, %v6554_v0 }
 0x2b2   :  { %v786_v16 = vpop.f32.mrf.mxu0  ;;  %3696 = vmatpush3.msra.mxu1 %v942_v11  ;;  %3723 = vmatpush3.msra.mxu0 %v1221_v56 }
 0x2b3   :  { %v787_v17 = vadd.f32 %v4450_v62, %v786_v16  ;;  %3656 = vmatmul.mubr.msk.f32.gmra.mxu1 %vm6543_vm2, %v807_v33  ;;  %3697 = vmatprep.subr.mxu1 %v6554_v0 }
 0x2b4   :  { %v3623_v37 = vpop.f32.mrf.mxu0  ;;  %3658 = vmatprep.mubr.msk.f32.mxu1 %vm6541_vm0, %v6554_v0  ;;  %3698 = vmatpush3.msra.mxu1 %v941_v34 }
 0x2b5   :  { %v808_v38 = vmax.f32 %v787_v17, 0.0  ;;  %3699 = vmatprep.subr.mxu1 %v6554_v0  ;;  %3676 = vmatmul.mubr.msk.f32.gmra.mxu0 %vm945_vm4, %v934_v35 }
 0x2b6   :  { %v791_v39 = vpop.f32.mrf.mxu0  ;;  %3700 = vmatpush3.msra.mxu1 %v940_v36  ;;  %3678 = vmatprep.mubr.msk.f32.mxu0 %vm6541_vm0, %v6554_v0 }
 0x2b7   :  { %v792_v41 = vadd.f32 %v4450_v62, %v791_v39  ;;  %3659 = vmatmul.mubr.msk.f32.gmra.mxu1 %vm6543_vm2, %v808_v38  ;;  %3759 = vmatprep.subr.mxu1 %v6554_v0  ;;  %v3219_v39 = vld [vmem:[%s6526_s11] ss:$0 sm:$0xff] }
 0x2b8   :  { %v3626_v42 = vpop.f32.mrf.mxu0  ;;  %3661 = vmatprep.mubr.msk.f32.mxu1 %vm6541_vm0, %v6554_v0  ;;  %3724 = vmatprep.subr.mxu0 %v6554_v0 }
 0x2b9   :  { %v809_v43 = vmax.f32 %v792_v41, 0.0  ;;  %3679 = vmatmul.mubr.msk.f32.gmra.mxu0 %vm945_vm4, %v935_v40 }
 0x2ba   :  { %v796_v44 = vpop.f32.mrf.mxu0  ;;  %3681 = vmatprep.mubr.msk.f32.mxu0 %vm6541_vm0, %v6554_v0  ;;  %3725 = vmatpush3.msra.mxu0 %v1220_v57 }
 0x2bb   :  { %v797_v46 = vadd.f32 %v4450_v62, %v796_v44  ;;  %3662 = vmatmul.mubr.msk.f32.gmra.mxu1 %vm6543_vm2, %v809_v43  ;;  %3726 = vmatprep.subr.mxu0 %v6554_v0 }
 0x2bc   :  { %v3629_v47 = vpop.f32.mrf.mxu0  ;;  %3664 = vmatprep.mubr.msk.f32.mxu1 %vm6541_vm0, %v6554_v0  ;;  %3727 = vmatpush3.msra.mxu0 %v1219_v58 }
 0x2bd   :  { %v810_v18 = vmax.f32 %v797_v46, 0.0  ;;  %3682 = vmatmul.mubr.msk.f32.gmra.mxu0 %vm945_vm4, %v936_v45  ;;  %3728 = vmatprep.subr.mxu0 %v6554_v0 }
 0x2be   :  { %v801_v19 = vpop.f32.mrf.mxu0  ;;  %3684 = vmatprep.mubr.msk.f32.mxu0 %vm6541_vm0, %v6554_v0  ;;  %3729 = vmatpush3.msra.mxu0 %v1218_v59 }
 0x2bf   :  { %v802_v49 = vadd.f32 %v4450_v62, %v801_v19  ;;  %3665 = vmatmul.mubr.msk.f32.gmra.mxu1 %vm6543_vm2, %v810_v18  ;;  %v938_v62 = vld [vmem:[%s6617_s4 + $0x28] sm:$0xff]  ;;  %3730 = vmatprep.subr.mxu0 %v6554_v0 }
 0x2c0   :  { %v3632_v20 = vpop.f32.mrf.mxu0  ;;  %3667 = vmatprep.mubr.msk.f32.mxu1 %vm6541_vm0, %v6554_v0  ;;  %3731 = vmatpush3.msra.mxu0 %v1217_v60 }
 0x2c1   :  { %v811_v21 = vmax.f32 %v802_v49, 0.0  ;;  %3685 = vmatmul.mubr.msk.f32.gmra.mxu0 %vm945_vm4, %v937_v48  ;;  %3732 = vmatprep.subr.mxu0 %v6554_v0 }
 0x2c2   :  { %3687 = vmatprep.mubr.msk.f32.mxu0 %vm6541_vm0, %v6554_v0  ;;  %3733 = vmatpush3.msra.mxu0 %v1216_v61 }
 0x2c3   :  { %3668 = vmatmul.mubr.msk.f32.gmra.mxu1 %vm6543_vm2, %v811_v21  ;;  %3734 = vmatprep.subr.mxu0 %v6554_v0 }
 0x2c4   :  { %3701 = vmatprep.mubr.msk.f32.mxu1 %vm6541_vm0, %v6554_v0  ;;  %3735 = vmatpush3.msra.mxu0 %v1215_v25 }
 0x2c5   :  { %3688 = vmatmul.mubr.msk.f32.gmra.mxu0 %vm945_vm4, %v938_v62  ;;  %3736 = vmatprep.subr.mxu0 %v6554_v0 }
 0x2c6   :  { %3690 = vmatprep.mubr.msk.f32.mxu0 %vm6541_vm0, %v6554_v0  ;;  %3737 = vmatpush3.msra.mxu0 %v1214_v63 }
 0x2c7   :  { %3702 = vmatmul.mubr.msk.f32.vlgmr.msra.gmra.mxu1 %vm1071_vm5, %v4630_v51  ;;  %3788 = vmatprep.subr.mxu0 %v6554_v0 }
 0x2c8   :  { %3704 = vmatprep.mubr.msk.f32.mxu1 %vm6541_vm0, %v6554_v0  ;;  %3760 = vmatpush3.msra.mxu1 %v4725_v1 }
 0x2c9   :  { %3691 = vmatmul.mubr.msk.f32.gmra.mxu0 %vm945_vm4, %v939_v22  ;;  %3761 = vmatprep.subr.mxu1 %v6554_v0 }
 0x2ca   :  { %3738 = vmatprep.mubr.msk.f32.mxu0 %vm6541_vm0, %v6554_v0  ;;  %3762 = vmatpush3.msra.mxu1 %v4727_v2 }
 0x2cb   :  { %3705 = vmatmul.mubr.msk.f32.gmra.mxu1 %vm1071_vm5, %v4644_v23  ;;  %3763 = vmatprep.subr.mxu1 %v6554_v0 }
 0x2cc   :  { %3707 = vmatprep.mubr.msk.f32.mxu1 %vm6541_vm0, %v6554_v0  ;;  %3764 = vmatpush3.msra.mxu1 %v4731_v3 }
 0x2cd   :  { %3765 = vmatprep.subr.mxu1 %v6554_v0 }
 0x2ce   :  { %3766 = vmatpush3.msra.mxu1 %v4735_v6 }
 0x2cf   :  { %3708 = vmatmul.mubr.msk.f32.gmra.mxu1 %vm1071_vm5, %v4655_v52  ;;  %3825 = vmatprep.subr.mxu1 %v6554_v0 }
 0x2d0   :  { %3710 = vmatprep.mubr.msk.f32.mxu1 %vm6541_vm0, %v6554_v0 }
 0x2d3   :  { %3711 = vmatmul.mubr.msk.f32.gmra.mxu1 %vm1071_vm5, %v4663_v53 }
 0x2d4   :  { %3713 = vmatprep.mubr.msk.f32.mxu1 %vm6541_vm0, %v6554_v0 }
 0x2d7   :  { %3714 = vmatmul.mubr.msk.f32.gmra.mxu1 %vm1071_vm5, %v4671_v54 }
 0x2d8   :  { %3716 = vmatprep.mubr.msk.f32.mxu1 %vm6541_vm0, %v6554_v0 }
 0x2db   :  { %3717 = vmatmul.mubr.msk.f32.gmra.mxu1 %vm1071_vm5, %v4679_v24 }
 0x2dc   :  { %3719 = vmatprep.mubr.msk.f32.mxu1 %vm6541_vm0, %v6554_v0 }
 0x2df   :  { %3720 = vmatmul.mubr.msk.f32.gmra.mxu1 %vm1071_vm5, %v4687_v55 }
 0x2e0   :  { %3767 = vmatprep.mubr.msk.f32.mxu1 %vm6541_vm0, %v6554_v0 }
 0x36b   :  { %v4741_v9 = vpop.f32.mrf.mxu0 }
 0x36d   :  { %v3651_v12 = vpop.f32.mrf.mxu0 }
 0x36f   :  { %v4743_v13 = vpop.f32.mrf.mxu1  ;;  %v1037_v14 = vpop.f32.mrf.mxu0 }
 0x371   :  { %v3654_v15 = vpop.f32.mrf.mxu1  ;;  %v3674_v26 = vpop.f32.mrf.mxu0 }
 0x373   :  { %v4745_v4 = vpop.f32.mrf.mxu1 }
 0x375   :  { %v3657_v27 = vpop.f32.mrf.mxu1  ;;  %v1042_v5 = vpop.f32.mrf.mxu0 }
 0x377   :  { %v4747_v28 = vpop.f32.mrf.mxu1  ;;  %v3677_v29 = vpop.f32.mrf.mxu0 }
 0x379   :  { %v3660_v7 = vpop.f32.mrf.mxu1  ;;  %v1047_v8 = vpop.f32.mrf.mxu0 }
 0x37b   :  { %v4749_v30 = vpop.f32.mrf.mxu1  ;;  %v3680_v31 = vpop.f32.mrf.mxu0 }
 0x37d   :  { %v3663_v10 = vpop.f32.mrf.mxu1  ;;  %v1052_v11 = vpop.f32.mrf.mxu0 }
 0x37f   :  { %v4751_v32 = vpop.f32.mrf.mxu1  ;;  %v3683_v33 = vpop.f32.mrf.mxu0 }
 0x381   :  { %v3666_v34 = vpop.f32.mrf.mxu1  ;;  %v1057_v16 = vpop.f32.mrf.mxu0 }
 0x382   :  { %v4782_v34 = vld [vmem:[%s6531_s16 + $0x38] sm:$0xff] }
 0x383   :  { %v4753_v35 = vpop.f32.mrf.mxu1  ;;  %v3686_v17 = vpop.f32.mrf.mxu0 }
 0x384   :  { %v4794_v17 = vld [vmem:[%s6531_s16 + $0x28] sm:$0xff] }
 0x385   :  { %v3669_v36 = vpop.f32.mrf.mxu1  ;;  %v1062_v37 = vpop.f32.mrf.mxu0 }
 0x386   :  { %v4801_v36 = vld [vmem:[%s6531_s16 + $0x20] sm:$0xff] }
 0x387   :  { %v1159_v38 = vpop.f32.mrf.mxu1  ;;  %v3689_v40 = vpop.f32.mrf.mxu0 }
 0x388   :  { %v1160_v41 = vadd.f32 %v1159_v38, %v1037_v14  ;;  %v4815_v38 = vld [vmem:[%s6531_s16 + $0x10] sm:$0xff] }
 0x389   :  { %v3703_v42 = vpop.f32.mrf.mxu1  ;;  %v1067_v43 = vpop.f32.mrf.mxu0 }
 0x38a   :  { %v1200_v44 = vadd.f32 %v3219_v39, %v1160_v41  ;;  %v3227_v41 = vld [vmem:[%s6528_s13] ss:$0 sm:$0xff] }
 0x38b   :  { %v1164_v45 = vpop.f32.mrf.mxu1  ;;  %v3692_v46 = vpop.f32.mrf.mxu0 }
 0x38c   :  { %v1207_v47 = vmax.f32 %v1200_v44, 0.0  ;;  %v1165_v18 = vadd.f32 %v1164_v45, %v1042_v5 }
 0x38d   :  { %v3706_v19 = vpop.f32.mrf.mxu1 }
 0x38e   :  { %v1201_v48 = vadd.f32 %v3219_v39, %v1165_v18  ;;  %3739 = vmatmul.mubr.msk.f32.vlgmr.msra.gmra.mxu0 %vm6543_vm2, %v1207_v47 }
 0x38f   :  { %v1169_v49 = vpop.f32.mrf.mxu1  ;;  %3741 = vmatprep.mubr.msk.f32.mxu0 %vm6541_vm0, %v6554_v0  ;;  %3789 = vmatpush3.msra.mxu0 %v4782_v34 }
 0x390   :  { %v1208_v20 = vmax.f32 %v1201_v48, 0.0  ;;  %v1170_v21 = vadd.f32 %v1169_v49, %v1047_v8  ;;  %3790 = vmatprep.subr.mxu0 %v6554_v0 }
 0x391   :  { %v3709_v62 = vpop.f32.mrf.mxu1 }
 0x392   :  { %v1202_v22 = vadd.f32 %v3219_v39, %v1170_v21  ;;  %3742 = vmatmul.mubr.msk.f32.gmra.mxu0 %vm6543_vm2, %v1208_v20 }
 0x393   :  { %v1174_v56 = vpop.f32.mrf.mxu1  ;;  %3744 = vmatprep.mubr.msk.f32.mxu0 %vm6541_vm0, %v6554_v0 }
 0x394   :  { %v1209_v57 = vmax.f32 %v1202_v22, 0.0  ;;  %v1175_v58 = vadd.f32 %v1174_v56, %v1052_v11 }
 0x395   :  { %v3712_v59 = vpop.f32.mrf.mxu1 }
 0x396   :  { %v1203_v60 = vadd.f32 %v3219_v39, %v1175_v58  ;;  %3745 = vmatmul.mubr.msk.f32.gmra.mxu0 %vm6543_vm2, %v1209_v57 }
 0x397   :  { %v1179_v61 = vpop.f32.mrf.mxu1  ;;  %3747 = vmatprep.mubr.msk.f32.mxu0 %vm6541_vm0, %v6554_v0 }
 0x398   :  { %v1210_v25 = vmax.f32 %v1203_v60, 0.0  ;;  %v1180_v63 = vadd.f32 %v1179_v61, %v1057_v16  ;;  %v4787_v16 = vld [vmem:[%s6531_s16 + $0x30] sm:$0xff]  ;;  %v910_v60 = vadd.f32 %v4618_v50, %v4745_v4  ;;  %v925_v4 = vadd.f32 %v4618_v50, %v4751_v32  ;;  %v4910_v32 = vld [vmem:[%s6533_s18 + $0xe8] sm:$0xff]  ;;  %v4926_v61 = vld [vmem:[%s6533_s18 + $0xc0] sm:$0xff] }
 0x399   :  { %v3715_v12 = vpop.f32.mrf.mxu1  ;;  %3791 = vmatpush3.msra.mxu0 %v4787_v16 }
 0x39a   :  { %v1204_v14 = vadd.f32 %v3219_v39, %v1180_v63  ;;  %3748 = vmatmul.mubr.msk.f32.gmra.mxu0 %vm6543_vm2, %v1210_v25  ;;  %3792 = vmatprep.subr.mxu0 %v6554_v0  ;;  %v4932_v25 = vld [vmem:[%s6533_s18 + $0xa8] sm:$0xff]  ;;  %v4938_v63 = vld [vmem:[%s6533_s18 + $0xa0] sm:$0xff] }
 0x39b   :  { %v1184_v15 = vpop.f32.mrf.mxu1  ;;  %3750 = vmatprep.mubr.msk.f32.mxu0 %vm6541_vm0, %v6554_v0  ;;  %3793 = vmatpush3.msra.mxu0 %v4794_v17  ;;  %v4944_v12 = vld [vmem:[%s6533_s18 + $0x88] sm:$0xff] }
 0x39c   :  { %v1211_v26 = vmax.f32 %v1204_v14, 0.0  ;;  %v1185_v27 = vadd.f32 %v1184_v15, %v1062_v37  ;;  %3794 = vmatprep.subr.mxu0 %v6554_v0  ;;  %v4808_v37 = vld [vmem:[%s6531_s16 + $0x18] sm:$0xff]  ;;  %v4950_v14 = vld [vmem:[%s6533_s18 + $0x80] sm:$0xff]  ;;  %v4956_v15 = vld [vmem:[%s6533_s18 + $0x68] sm:$0xff] }
 0x39d   :  { %v3718_v5 = vpop.f32.mrf.mxu1  ;;  %3795 = vmatpush3.msra.mxu0 %v4801_v36 }
 0x39e   :  { %v1205_v29 = vadd.f32 %v3219_v39, %v1185_v27  ;;  %3751 = vmatmul.mubr.msk.f32.gmra.mxu0 %vm6543_vm2, %v1211_v26  ;;  %3796 = vmatprep.subr.mxu0 %v6554_v0  ;;  %v4962_v26 = vld [vmem:[%s6533_s18 + $0x60] sm:$0xff]  ;;  %v4968_v27 = vld [vmem:[%s6533_s18 + $0x48] sm:$0xff] }
 0x39f   :  { %v1189_v7 = vpop.f32.mrf.mxu1  ;;  %3753 = vmatprep.mubr.msk.f32.mxu0 %vm6541_vm0, %v6554_v0  ;;  %3797 = vmatpush3.msra.mxu0 %v4808_v37  ;;  %v4974_v5 = vld [vmem:[%s6533_s18 + $0x40] sm:$0xff] }
 0x3a0   :  { %v1212_v8 = vmax.f32 %v1205_v29, 0.0  ;;  %v1190_v31 = vadd.f32 %v1189_v7, %v1067_v43  ;;  %3798 = vmatprep.subr.mxu0 %v6554_v0  ;;  %v4980_v29 = vld [vmem:[%s6533_s18 + $0x28] sm:$0xff]  ;;  %v4986_v7 = vld [vmem:[%s6533_s18 + $0x20] sm:$0xff] }
 0x3a1   :  { %v3721_v10 = vpop.f32.mrf.mxu1  ;;  %3799 = vmatpush3.msra.mxu0 %v4815_v38 }
 0x3a2   :  { %v1206_v11 = vadd.f32 %v3219_v39, %v1190_v31  ;;  %3754 = vmatmul.mubr.msk.f32.gmra.mxu0 %vm6543_vm2, %v1212_v8  ;;  %v4822_v39 = vld [vmem:[%s6531_s16 + $0x8] sm:$0xff]  ;;  %3800 = vmatprep.subr.mxu0 %v6554_v0  ;;  %v4994_v8 = vld [vmem:[%s6530_s15] ss:$0 sm:$0xff] }
 0x3a3   :  { %3756 = vmatprep.mubr.msk.f32.mxu0 %vm6541_vm0, %v6554_v0  ;;  %3801 = vmatpush3.msra.mxu0 %v4822_v39 }
 0x3a4   :  { %v1213_v33 = vmax.f32 %v1206_v11, 0.0  ;;  %3802 = vmatprep.subr.mxu0 %v6554_v0 }
 0x3a6   :  { %3757 = vmatmul.mubr.msk.f32.gmra.mxu0 %vm6543_vm2, %v1213_v33 }
 0x3a7   :  { %3804 = vmatprep.mubr.msk.f32.mxu0 %vm6541_vm0, %v6554_v0 }
 0x44e   :  { %v1309_v40 = vpop.f32.mrf.mxu0 }
 0x44f   :  { %v1343_v42 = vadd.f32 %v1309_v40, %v4630_v51 }
 0x450   :  { %v3740_v43 = vpop.f32.mrf.mxu0 }
 0x451   :  { %v1357_v44 = vadd.f32 %v3227_v41, %v1343_v42 }
 0x452   :  { %v1314_v45 = vpop.f32.mrf.mxu0 }
 0x453   :  { %v1344_v46 = vadd.f32 %v1314_v45, %v4644_v23  ;;  %3768 = vmatmul.mubr.msk.f32.vlgmr.msra.gmra.mxu1 %vm1071_vm5, %v1357_v44 }
 0x454   :  { %3826 = vmatpush3.msra.mxu1 %v4725_v1  ;;  %v3743_v47 = vpop.f32.mrf.mxu0  ;;  %3770 = vmatprep.mubr.msk.f32.mxu1 %vm6541_vm0, %v6554_v0 }
 0x455   :  { %v1358_v18 = vadd.f32 %v3227_v41, %v1344_v46  ;;  %3827 = vmatprep.subr.mxu1 %v6554_v0 }
 0x456   :  { %v1319_v19 = vpop.f32.mrf.mxu0  ;;  %3828 = vmatpush3.msra.mxu1 %v4727_v2 }
 0x457   :  { %v1345_v51 = vadd.f32 %v1319_v19, %v4655_v52  ;;  %3771 = vmatmul.mubr.msk.f32.gmra.mxu1 %vm1071_vm5, %v1358_v18  ;;  %3829 = vmatprep.subr.mxu1 %v6554_v0 }
 0x458   :  { %v3746_v23 = vpop.f32.mrf.mxu0  ;;  %3773 = vmatprep.mubr.msk.f32.mxu1 %vm6541_vm0, %v6554_v0  ;;  %3830 = vmatpush3.msra.mxu1 %v4731_v3 }
 0x459   :  { %v1359_v1 = vadd.f32 %v3227_v41, %v1345_v51  ;;  %3831 = vmatprep.subr.mxu1 %v6554_v0 }
 0x45a   :  { %v1324_v48 = vpop.f32.mrf.mxu0  ;;  %3832 = vmatpush3.msra.mxu1 %v4735_v6 }
 0x45b   :  { %v1346_v2 = vadd.f32 %v1324_v48, %v4663_v53  ;;  %3774 = vmatmul.mubr.msk.f32.gmra.mxu1 %vm1071_vm5, %v1359_v1  ;;  %1964 = vmatprep.subr.mxu1 %v4910_v32 }
 0x45c   :  { %v3749_v52 = vpop.f32.mrf.mxu0  ;;  %3776 = vmatprep.mubr.msk.f32.mxu1 %vm6541_vm0, %v6554_v0 }
 0x45d   :  { %v1360_v49 = vadd.f32 %v3227_v41, %v1346_v2 }
 0x45e   :  { %v1329_v20 = vpop.f32.mrf.mxu0 }
 0x45f   :  { %v1347_v21 = vadd.f32 %v1329_v20, %v4671_v54  ;;  %3777 = vmatmul.mubr.msk.f32.gmra.mxu1 %vm1071_vm5, %v1360_v49 }
 0x460   :  { %v3752_v3 = vpop.f32.mrf.mxu0  ;;  %3779 = vmatprep.mubr.msk.f32.mxu1 %vm6541_vm0, %v6554_v0 }
 0x461   :  { %v1361_v62 = vadd.f32 %v3227_v41, %v1347_v21 }
 0x462   :  { %v1334_v6 = vpop.f32.mrf.mxu0 }
 0x463   :  { %v1348_v53 = vadd.f32 %v1334_v6, %v4679_v24  ;;  %3780 = vmatmul.mubr.msk.f32.gmra.mxu1 %vm1071_vm5, %v1361_v62  ;;  %v900_v24 = vadd.f32 %v4618_v50, %v4741_v9  ;;  %v915_v9 = vadd.f32 %v4618_v50, %v4747_v28  ;;  %v930_v28 = vadd.f32 %v4618_v50, %v4753_v35  ;;  %v4920_v35 = vld [vmem:[%s6533_s18 + $0xc8] sm:$0xff] }
 0x464   :  { %v3755_v22 = vpop.f32.mrf.mxu0  ;;  %3782 = vmatprep.mubr.msk.f32.mxu1 %vm6541_vm0, %v6554_v0 }
 0x465   :  { %v1362_v56 = vadd.f32 %v3227_v41, %v1348_v53  ;;  %v5049_v53 = vld [vmem:[%s6533_s18 + $0xf0] sm:$0xff] }
 0x466   :  { %v1339_v57 = vpop.f32.mrf.mxu0 }
 0x467   :  { %v1349_v54 = vadd.f32 %v1339_v57, %v4687_v55  ;;  %3783 = vmatmul.mubr.msk.f32.gmra.mxu1 %vm1071_vm5, %v1362_v56  ;;  %v905_v55 = vadd.f32 %v4618_v50, %v4743_v13  ;;  %v920_v13 = vadd.f32 %v4618_v50, %v4749_v30  ;;  %v4903_v30 = vld [vmem:[%s6531_s16] sm:$0xff]  ;;  %v5054_v56 = vld [vmem:[%s6533_s18 + $0xd8] sm:$0xff] }
 0x468   :  { %v3758_v58 = vpop.f32.mrf.mxu0  ;;  %3785 = vmatprep.mubr.msk.f32.mxu1 %vm6541_vm0, %v6554_v0  ;;  %3803 = vmatpush3.msra.mxu0 %v4903_v30  ;;  %v4915_v50 = vld [vmem:[%s6533_s18 + $0xe0] sm:$0xff] }
 0x469   :  { %v1363_v59 = vadd.f32 %v3227_v41, %v1349_v54  ;;  %3854 = vmatprep.subr.mxu0 %v6554_v0  ;;  %v5061_v54 = vld [vmem:[%s6533_s18 + $0xd0] sm:$0xff] }
 0x46b   :  { %3786 = vmatmul.mubr.msk.f32.gmra.mxu1 %vm1071_vm5, %v1363_v59  ;;  %v5069_v59 = vld [vmem:[%s6533_s18 + $0xb8] sm:$0xff] }
 0x46c   :  { %3833 = vmatprep.mubr.msk.f32.mxu1 %vm6541_vm0, %v6554_v0 }
 0x46f   :  { %3834 = vmatmul.mubr.msk.f32.vlgmr.msra.gmra.mxu1 %vm1071_vm5, %v900_v24 }
 0x470   :  { %3836 = vmatprep.mubr.msk.f32.mxu1 %vm6541_vm0, %v6554_v0  ;;  %1965 = vmatpush1.msra.mxu1 %v4915_v50 }
 0x471   :  { %1966 = vmatprep.subr.mxu1 %v4920_v35 }
 0x472   :  { %1967 = vmatpush1.msra.mxu1 %v4926_v61 }
 0x473   :  { %3837 = vmatmul.mubr.msk.f32.gmra.mxu1 %vm1071_vm5, %v905_v55  ;;  %1968 = vmatprep.subr.mxu1 %v4932_v25  ;;  %v5075_v55 = vld [vmem:[%s6533_s18 + $0xb0] sm:$0xff] }
 0x474   :  { %3839 = vmatprep.mubr.msk.f32.mxu1 %vm6541_vm0, %v6554_v0  ;;  %1969 = vmatpush1.msra.mxu1 %v4938_v63 }
 0x475   :  { %1970 = vmatprep.subr.mxu1 %v4944_v12 }
 0x476   :  { %1971 = vmatpush1.msra.mxu1 %v4950_v14 }
 0x477   :  { %3840 = vmatmul.mubr.msk.f32.gmra.mxu1 %vm1071_vm5, %v910_v60  ;;  %1972 = vmatprep.subr.mxu1 %v4956_v15 }
 0x478   :  { %3842 = vmatprep.mubr.msk.f32.mxu1 %vm6541_vm0, %v6554_v0  ;;  %1973 = vmatpush1.msra.mxu1 %v4962_v26 }
 0x479   :  { %1974 = vmatprep.subr.mxu1 %v4968_v27 }
 0x47a   :  { %1975 = vmatpush1.msra.mxu1 %v4974_v5 }
 0x47b   :  { %3843 = vmatmul.mubr.msk.f32.gmra.mxu1 %vm1071_vm5, %v915_v9  ;;  %1976 = vmatprep.subr.mxu1 %v4980_v29  ;;  %v5081_v9 = vld [vmem:[%s6533_s18 + $0x98] sm:$0xff] }
 0x47c   :  { %3845 = vmatprep.mubr.msk.f32.mxu1 %vm6541_vm0, %v6554_v0  ;;  %1977 = vmatpush1.msra.mxu1 %v4986_v7 }
 0x47f   :  { %3846 = vmatmul.mubr.msk.f32.gmra.mxu1 %vm1071_vm5, %v920_v13 }
 0x480   :  { %3848 = vmatprep.mubr.msk.f32.mxu1 %vm6541_vm0, %v6554_v0 }
 0x483   :  { %3849 = vmatmul.mubr.msk.f32.gmra.mxu1 %vm1071_vm5, %v925_v4  ;;  %v5089_v4 = vld [vmem:[%s6533_s18 + $0x90] sm:$0xff] }
 0x484   :  { %3851 = vmatprep.mubr.msk.f32.mxu1 %vm6541_vm0, %v6554_v0 }
 0x487   :  { %3852 = vmatmul.mubr.msk.f32.gmra.mxu1 %vm1071_vm5, %v930_v28 }
 0x488   :  { %2012 = vmatprep.mubr.f32.mxu1 %v6554_v0 }
 0x513   :  { %v1462_v31 = vpop.f32.mrf.mxu1 }
 0x514   :  { %v1463_v10 = vadd.f32 %v4994_v8, %v1462_v31 }
 0x515   :  { %v3769_v11 = vpop.f32.mrf.mxu1 }
 0x516   :  { %v1496_v33 = vmax.f32 %v1463_v10, 0.0  ;;  %v5103_v10 = vld [vmem:[%s6533_s18 + $0x70] sm:$0xff] }
 0x517   :  { %v1467_v40 = vpop.f32.mrf.mxu1 }
 0x518   :  { %v1468_v41 = vadd.f32 %v4994_v8, %v1467_v40  ;;  %3805 = vmatmul.mubr.msk.f32.vlgmr.msra.gmra.mxu0 %vm6543_vm2, %v1496_v33  ;;  %v5109_v33 = vld [vmem:[%s6533_s18 + $0x58] sm:$0xff] }
 0x519   :  { %3855 = vmatpush3.msra.mxu0 %v4782_v34  ;;  %v3772_v42 = vpop.f32.mrf.mxu1  ;;  %3807 = vmatprep.mubr.msk.f32.mxu0 %vm6541_vm0, %v6554_v0 }
 0x51a   :  { %v1497_v43 = vmax.f32 %v1468_v41, 0.0  ;;  %3856 = vmatprep.subr.mxu0 %v6554_v0  ;;  %v5117_v41 = vld [vmem:[%s6533_s18 + $0x50] sm:$0xff] }
 0x51b   :  { %v1472_v44 = vpop.f32.mrf.mxu1  ;;  %3857 = vmatpush3.msra.mxu0 %v4787_v16 }
 0x51c   :  { %v1473_v45 = vadd.f32 %v4994_v8, %v1472_v44  ;;  %3808 = vmatmul.mubr.msk.f32.gmra.mxu0 %vm6543_vm2, %v1497_v43  ;;  %3858 = vmatprep.subr.mxu0 %v6554_v0  ;;  %v5125_v43 = vld [vmem:[%s6533_s18 + $0x38] sm:$0xff] }
 0x51d   :  { %v3775_v46 = vpop.f32.mrf.mxu1  ;;  %3810 = vmatprep.mubr.msk.f32.mxu0 %vm6541_vm0, %v6554_v0  ;;  %3859 = vmatpush3.msra.mxu0 %v4794_v17 }
 0x51e   :  { %v1498_v34 = vmax.f32 %v1473_v45, 0.0  ;;  %3860 = vmatprep.subr.mxu0 %v6554_v0 }
 0x51f   :  { %v1477_v47 = vpop.f32.mrf.mxu1  ;;  %3861 = vmatpush3.msra.mxu0 %v4801_v36 }
 0x520   :  { %v1478_v16 = vadd.f32 %v4994_v8, %v1477_v47  ;;  %3811 = vmatmul.mubr.msk.f32.gmra.mxu0 %vm6543_vm2, %v1498_v34  ;;  %3862 = vmatprep.subr.mxu0 %v6554_v0 }
 0x521   :  { %v3778_v18 = vpop.f32.mrf.mxu1  ;;  %3813 = vmatprep.mubr.msk.f32.mxu0 %vm6541_vm0, %v6554_v0  ;;  %3863 = vmatpush3.msra.mxu0 %v4808_v37  ;;  %v5029_v37 = vld [vmem:[%s6533_s18 + $0xf8] sm:$0xff] }
 0x522   :  { %v1499_v19 = vmax.f32 %v1478_v16, 0.0  ;;  %3864 = vmatprep.subr.mxu0 %v6554_v0 }
 0x523   :  { %v1482_v17 = vpop.f32.mrf.mxu1  ;;  %3865 = vmatpush3.msra.mxu0 %v4815_v38 }
 0x524   :  { %v1483_v36 = vadd.f32 %v4994_v8, %v1482_v17  ;;  %3814 = vmatmul.mubr.msk.f32.gmra.mxu0 %vm6543_vm2, %v1499_v19  ;;  %3866 = vmatprep.subr.mxu0 %v6554_v0 }
 0x525   :  { %v3781_v51 = vpop.f32.mrf.mxu1  ;;  %3816 = vmatprep.mubr.msk.f32.mxu0 %vm6541_vm0, %v6554_v0  ;;  %3867 = vmatpush3.msra.mxu0 %v4822_v39 }
 0x526   :  { %v1500_v23 = vmax.f32 %v1483_v36, 0.0  ;;  %3868 = vmatprep.subr.mxu0 %v6554_v0 }
 0x527   :  { %v1487_v38 = vpop.f32.mrf.mxu1  ;;  %3869 = vmatpush3.msra.mxu0 %v4903_v30  ;;  %v5097_v30 = vld [vmem:[%s6533_s18 + $0x78] sm:$0xff] }
 0x528   :  { %v1488_v1 = vadd.f32 %v4994_v8, %v1487_v38  ;;  %3817 = vmatmul.mubr.msk.f32.gmra.mxu0 %vm6543_vm2, %v1500_v23  ;;  %2071 = vmatprep.subr.mxu0 %v5029_v37 }
 0x529   :  { %v3784_v48 = vpop.f32.mrf.mxu1  ;;  %3819 = vmatprep.mubr.msk.f32.mxu0 %vm6541_vm0, %v6554_v0 }
 0x52a   :  { %v1501_v39 = vmax.f32 %v1488_v1, 0.0  ;;  %v2397_v1 = vlaneseq }
 0x52b   :  { %v1492_v2 = vpop.f32.mrf.mxu1 }
 0x52c   :  { %v1493_v52 = vadd.f32 %v4994_v8, %v1492_v2  ;;  %3820 = vmatmul.mubr.msk.f32.gmra.mxu0 %vm6543_vm2, %v1501_v39  ;;  %v2398_v48 = vand.u32 127, %v2397_v1  ;;  %v5147_v39 = vld [vmem:[%s6533_s18 + $0x30] sm:$0xff] }
 0x52d   :  { %v3787_v49 = vpop.f32.mrf.mxu1  ;;  %3822 = vmatprep.mubr.msk.f32.mxu0 %vm6541_vm0, %v6554_v0 }
 0x52e   :  { %v1502_v20 = vmax.f32 %v1493_v52, 0.0  ;;  %v5149_v2 = vand.u32 7, %v2398_v48  ;;  %v5160_v52 = vld [vmem:[%s6533_s18 + $0x18] sm:$0xff]  ;;  %v5167_v49 = vld [vmem:[%s6533_s18] sm:$0xff] }
 0x52f   :  { %v1726_v21 = vpop.f32.mrf.mxu1 }
 0x530   :  { %v1727_v3 = vadd.f32 %v4994_v8, %v1726_v21  ;;  %3823 = vmatmul.mubr.msk.f32.gmra.mxu0 %vm6543_vm2, %v1502_v20  ;;  %v5172_v20 = vld [vmem:[%s6533_s18 + $0x10] sm:$0xff]  ;;  %vm2613_vm6 = vcmp.gt.s32.totalorder %v5149_v2, 3  ;;  %v4048_v21 = vmov 0   ;;  %vm2491_vm7 = vcmp.gt.s32.totalorder %v5149_v2, 1 }
 0x531   :  { %v3835_v62 = vpop.f32.mrf.mxu1  ;;  %3870 = vmatprep.mubr.msk.f32.mxu0 %vm6541_vm0, %v6554_v0  ;;  %vm2735_vm8 = vcmp.gt.s32.totalorder %v5149_v2, 5  ;;  %vm6549_vm10 = vcmp.gt.s32.totalorder %v5149_v2, 0  ;;  %vm6546_vm12 = vcmp.gt.s32.totalorder %v5149_v2, 4  ;;  %vm6545_vm3 = vcmp.gt.s32.totalorder %v5149_v2, 2 }
 0x532   :  { %v1760_v6 = vmax.f32 %v1727_v3, 0.0  ;;  %v2616_v3 = vsel %vm2613_vm6, 1, %v4048_v21  ;;  %v5184_v62 = vld [vmem:[%s6532_s17] ss:$0 sm:$0xff] }
 0x533   :  { %v1731_v22 = vpop.f32.mrf.mxu1  ;;  %2617 = vrot.lane.b32.xlu1 %v2616_v3, %s4049_s8 }
 0x534   :  { %v1732_v57 = vadd.f32 %v4994_v8, %v1731_v22  ;;  %3871 = vmatmul.mubr.msk.f32.vlgmr.msra.gmra.mxu0 %vm6543_vm2, %v1760_v6 }
 0x535   :  { %v3838_v58 = vpop.f32.mrf.mxu1  ;;  %3873 = vmatprep.mubr.msk.f32.mxu0 %vm6541_vm0, %v6554_v0  ;;  %2072 = vmatpush1.msra.mxu0 %v5049_v53 }
 0x536   :  { %v1761_v24 = vmax.f32 %v1732_v57, 0.0  ;;  %2073 = vmatprep.subr.mxu0 %v5054_v56 }
 0x537   :  { %v1736_v60 = vpop.f32.mrf.mxu1  ;;  %2074 = vmatpush1.msra.mxu0 %v5061_v54 }
 0x538   :  { %v1737_v13 = vadd.f32 %v4994_v8, %v1736_v60  ;;  %3874 = vmatmul.mubr.msk.f32.gmra.mxu0 %vm6543_vm2, %v1761_v24  ;;  %2075 = vmatprep.subr.mxu0 %v5069_v59 }
 0x539   :  { %v3841_v28 = vpop.f32.mrf.mxu1  ;;  %3876 = vmatprep.mubr.msk.f32.mxu0 %vm6541_vm0, %v6554_v0  ;;  %2076 = vmatpush1.msra.mxu0 %v5075_v55 }
 0x53a   :  { %v1762_v31 = vmax.f32 %v1737_v13, 0.0  ;;  %2077 = vmatprep.subr.mxu0 %v5081_v9 }
 0x53b   :  { %v1741_v11 = vpop.f32.mrf.mxu1  ;;  %2078 = vmatpush1.msra.mxu0 %v5089_v4 }
 0x53c   :  { %v1742_v40 = vadd.f32 %v4994_v8, %v1741_v11  ;;  %3877 = vmatmul.mubr.msk.f32.gmra.mxu0 %vm6543_vm2, %v1762_v31  ;;  %2079 = vmatprep.subr.mxu0 %v5097_v30 }
 0x53d   :  { %v3844_v42 = vpop.f32.mrf.mxu1  ;;  %3879 = vmatprep.mubr.msk.f32.mxu0 %vm6541_vm0, %v6554_v0  ;;  %2080 = vmatpush1.msra.mxu0 %v5103_v10 }
 0x53e   :  { %v1763_v44 = vmax.f32 %v1742_v40, 0.0  ;;  %2081 = vmatprep.subr.mxu0 %v5109_v33 }
 0x53f   :  { %v1746_v45 = vpop.f32.mrf.mxu1  ;;  %2082 = vmatpush1.msra.mxu0 %v5117_v41 }
 0x540   :  { %v1747_v46 = vadd.f32 %v4994_v8, %v1746_v45  ;;  %3880 = vmatmul.mubr.msk.f32.gmra.mxu0 %vm6543_vm2, %v1763_v44  ;;  %2083 = vmatprep.subr.mxu0 %v5125_v43 }
 0x541   :  { %v3847_v34 = vpop.f32.mrf.mxu1  ;;  %3882 = vmatprep.mubr.msk.f32.mxu0 %vm6541_vm0, %v6554_v0  ;;  %2084 = vmatpush1.msra.mxu0 %v5147_v39 }
 0x542   :  { %v1764_v47 = vmax.f32 %v1747_v46, 0.0  ;;  %2085 = vmatprep.subr.mxu0 %v5160_v52 }
 0x543   :  { %v1751_v16 = vpop.f32.mrf.mxu1  ;;  %2086 = vmatpush1.msra.mxu0 %v5172_v20 }
 0x544   :  { %v1752_v18 = vadd.f32 %v4994_v8, %v1751_v16  ;;  %3883 = vmatmul.mubr.msk.f32.gmra.mxu0 %vm6543_vm2, %v1764_v47  ;;  %2306 = vmatprep.subr.mxu0 %v5029_v37  ;;  %v2494_v37 = vsel %vm2491_vm7, 1, %v4048_v21 }
 0x545   :  { %v3850_v19 = vpop.f32.mrf.mxu1  ;;  %3885 = vmatprep.mubr.msk.f32.mxu0 %vm6541_vm0, %v6554_v0 }
 0x546   :  { %v1765_v17 = vmax.f32 %v1752_v18, 0.0 }
 0x547   :  { %v1756_v36 = vpop.f32.mrf.mxu1 }
 0x548   :  { %v1757_v51 = vadd.f32 %v4994_v8, %v1756_v36  ;;  %3886 = vmatmul.mubr.msk.f32.gmra.mxu0 %vm6543_vm2, %v1765_v17  ;;  %v5155_v8 = vld [vmem:[%s6533_s18 + $0x8] sm:$0xff] }
 0x549   :  { %v3853_v23 = vpop.f32.mrf.mxu1  ;;  %3888 = vmatprep.mubr.msk.f32.mxu0 %vm6541_vm0, %v6554_v0  ;;  %1978 = vmatprep.subr.mxu1 %v5155_v8 }
 0x54a   :  { %v1766_v38 = vmax.f32 %v1757_v51, 0.0  ;;  %1979 = vmatpush1.msra.mxu1 %v5167_v49 }
 0x54b   :  { %2199 = vmatprep.subr.mxu1 %v4910_v32 }
 0x54c   :  { %3889 = vmatmul.mubr.msk.f32.gmra.mxu0 %vm6543_vm2, %v1766_v38 }
 0x54d   :  { %2119 = vmatprep.mubr.f32.mxu0 %v6554_v0 }
 0x5d8   :  { %v1605_v6 = vpop.f32.mrf.mxu0 }
 0x5d9   :  { %v5187_v22 = vadd.f32 %v5184_v62, %v1605_v6 }
 0x5da   :  { %v3806_v57 = vpop.f32.mrf.mxu0 }
 0x5db   :  { %2456 = vrot.lane.b32.xlu0 %v5187_v22, %s4049_s8  ;;  %3258 = vmatmul.mubr.msk.f32.vlgmr.msra.gmra.mxu1 %vm6543_vm2, %v5187_v22 }
 0x5dc   :  { %3265 = vmatmul.mubr.msk.f32.vlgmr.msra.gmra.mxu0 %vm6543_vm2, %v5187_v22  ;;  %v1610_v32 = vpop.f32.mrf.mxu0  ;;  %2200 = vmatpush1.msra.mxu1 %v4915_v50 }
 0x5dd   :  { %v5199_v58 = vadd.f32 %v5184_v62, %v1610_v32  ;;  %2018 = vmatprep.mubr.f32.mxu1 %v6554_v0  ;;  %2125 = vmatprep.mubr.f32.mxu0 %v6554_v0 }
 0x5de   :  { %v3809_v24 = vpop.f32.mrf.mxu0  ;;  %2201 = vmatprep.subr.mxu1 %v4920_v35  ;;  %2307 = vmatpush1.msra.mxu0 %v5049_v53 }
 0x5df   :  { %6618 = vst [vmem:[#allocation13_spill] sm:$0xff] %v5199_v58  ;;  %2495 = vrot.lane.b32.xlu0 %v2494_v37, %s4049_s8  ;;  %2458 = vrot.lane.b32.xlu1 %v5199_v58, %s4049_s8 }
 0x5e0   :  { %3259 = vmatmul.mubr.msk.f32.gmra.mxu1 %vm6543_vm2, %v5199_v58  ;;  %3266 = vmatmul.mubr.msk.f32.gmra.mxu0 %vm6543_vm2, %v5199_v58  ;;  %v1615_v50 = vpop.f32.mrf.mxu0 }
 0x5e1   :  { %v5213_v60 = vadd.f32 %v5184_v62, %v1615_v50  ;;  %2202 = vmatpush1.msra.mxu1 %v4926_v61  ;;  %2024 = vmatprep.mubr.f32.mxu1 %v6554_v0 }
 0x5e2   :  { %v3812_v35 = vpop.f32.mrf.mxu0  ;;  %2131 = vmatprep.mubr.f32.mxu0 %v6554_v0  ;;  %2203 = vmatprep.subr.mxu1 %v4932_v25  ;;  %v2738_v25 = vsel %vm2735_vm8, 1, %v4048_v21 }
 0x5e3   :  { %6619 = vst [vmem:[#allocation14_spill] sm:$0xff] %v5213_v60  ;;  %2460 = vrot.lane.b32.xlu0 %v5213_v60, %s4049_s8  ;;  %2204 = vmatpush1.msra.mxu1 %v4938_v63 }
 0x5e4   :  { %3260 = vmatmul.mubr.msk.f32.gmra.mxu1 %vm6543_vm2, %v5213_v60  ;;  %3267 = vmatmul.mubr.msk.f32.gmra.mxu0 %vm6543_vm2, %v5213_v60  ;;  %v1620_v61 = vpop.f32.mrf.mxu0 }
 0x5e5   :  { %v5228_v53 = vadd.f32 %v5184_v62, %v1620_v61  ;;  %2308 = vmatprep.subr.mxu0 %v5054_v56  ;;  %2030 = vmatprep.mubr.f32.mxu1 %v6554_v0 }
 0x5e6   :  { %2309 = vmatpush1.msra.mxu0 %v5061_v54  ;;  %v3815_v13 = vpop.f32.mrf.mxu0  ;;  %2137 = vmatprep.mubr.f32.mxu0 %v6554_v0 }
 0x5e7   :  { %6620 = vst [vmem:[#allocation15_spill] sm:$0xff] %v5228_v53  ;;  %2205 = vmatprep.subr.mxu1 %v4944_v12  ;;  %2310 = vmatprep.subr.mxu0 %v5069_v59 }
 0x5e8   :  { %2739 = vrot.lane.b32.xlu1 %v2738_v25, %s4049_s8  ;;  %2462 = vrot.lane.b32.xlu0 %v5228_v53, %s4049_s8  ;;  %v1625_v63 = vpop.f32.mrf.mxu0 }
 0x5e9   :  { %3261 = vmatmul.mubr.msk.f32.gmra.mxu1 %vm6543_vm2, %v5228_v53  ;;  %3268 = vmatmul.mubr.msk.f32.gmra.mxu0 %vm6543_vm2, %v5228_v53  ;;  %v5245_v56 = vadd.f32 %v5184_v62, %v1625_v63  ;;  %v6684_v63 = vmov 0 }
 0x5ea   :  { %2206 = vmatpush1.msra.mxu1 %v4950_v14  ;;  %2311 = vmatpush1.msra.mxu0 %v5075_v55  ;;  %v3818_v12 = vpop.f32.mrf.mxu0 }
 0x5eb   :  { %6621 = vst [vmem:[#allocation16_spill] sm:$0xff] %v5245_v56  ;;  %2036 = vmatprep.mubr.f32.mxu1 %v6554_v0  ;;  %2143 = vmatprep.mubr.f32.mxu0 %v6554_v0 }
 0x5ec   :  { %2207 = vmatprep.subr.mxu1 %v4956_v15  ;;  %2312 = vmatprep.subr.mxu0 %v5081_v9  ;;  %v1630_v54 = vpop.f32.mrf.mxu0 }
 0x5ed   :  { %2208 = vmatpush1.msra.mxu1 %v4962_v26  ;;  %2861 = vrot.lane.b32.xlu1 %v4048_v21, %s4049_s8  ;;  %v5263_v15 = vadd.f32 %v5184_v62, %v1630_v54  ;;  %v6725_v54 = vmov 0 }
 0x5ee   :  { %2464 = vrot.lane.b32.xlu0 %v5245_v56, %s4049_s8  ;;  %3262 = vmatmul.mubr.msk.f32.gmra.mxu1 %vm6543_vm2, %v5245_v56  ;;  %v3821_v14 = vpop.f32.mrf.mxu0 }
 0x5ef   :  { %3269 = vmatmul.mubr.msk.f32.gmra.mxu0 %vm6543_vm2, %v5245_v56  ;;  %6622 = vst [vmem:[#allocation17_spill] sm:$0xff] %v5263_v15  ;;  %2042 = vmatprep.mubr.f32.mxu1 %v6554_v0 }
 0x5f0   :  { %2313 = vmatpush1.msra.mxu0 %v5089_v4  ;;  %2149 = vmatprep.mubr.f32.mxu0 %v6554_v0  ;;  %v1635_v26 = vpop.f32.mrf.mxu0 }
 0x5f1   :  { %2209 = vmatprep.subr.mxu1 %v4968_v27  ;;  %2314 = vmatprep.subr.mxu0 %v5097_v30  ;;  %v5277_v55 = vadd.f32 %v5184_v62, %v1635_v26  ;;  %v6690_v26 = vmov 0 }
 0x5f2   :  { %2210 = vmatpush1.msra.mxu1 %v4974_v5  ;;  %2315 = vmatpush1.msra.mxu0 %v5103_v10  ;;  %v3824_v59 = vpop.f32.mrf.mxu0 }
 0x5f3   :  { %2466 = vrot.lane.b32.xlu1 %v5263_v15, %s4049_s8  ;;  %3263 = vmatmul.mubr.msk.f32.gmra.mxu1 %vm6543_vm2, %v5263_v15 }
 0x5f4   :  { %3270 = vmatmul.mubr.msk.f32.gmra.mxu0 %vm6543_vm2, %v5263_v15  ;;  %2211 = vmatprep.subr.mxu1 %v4980_v29  ;;  %v1854_v27 = vpop.f32.mrf.mxu0 }
 0x5f5   :  { %2048 = vmatprep.mubr.f32.mxu1 %v6554_v0  ;;  %2155 = vmatprep.mubr.f32.mxu0 %v6554_v0  ;;  %v1855_v5 = vadd.f32 %v5184_v62, %v1854_v27 }
 0x5f6   :  { %2212 = vmatpush1.msra.mxu1 %v4986_v7  ;;  %2316 = vmatprep.subr.mxu0 %v5109_v33  ;;  %v3872_v9 = vpop.f32.mrf.mxu0 }
 0x5f7   :  { %2317 = vmatpush1.msra.mxu0 %v5117_v41  ;;  %2468 = vrot.lane.b32.xlu0 %v5277_v55, %s4049_s8  ;;  %v5295_v4 = vmax.f32 %v5187_v22, %v1855_v5  ;;  %v6697_v9 = vmov 0 }
 0x5f8   :  { %3264 = vmatmul.mubr.msk.f32.gmra.mxu1 %vm6543_vm2, %v5277_v55  ;;  %3271 = vmatmul.mubr.msk.f32.gmra.mxu0 %vm6543_vm2, %v5277_v55  ;;  %v1859_v29 = vpop.f32.mrf.mxu0 }
 0x5f9   :  { %6623 = vst [vmem:[#allocation18_spill] sm:$0xff] %v5295_v4  ;;  %2213 = vmatprep.subr.mxu1 %v5155_v8  ;;  %2318 = vmatprep.subr.mxu0 %v5125_v43  ;;  %v1860_v7 = vadd.f32 %v5184_v62, %v1859_v29  ;;  %v6700_v29 = vmov 0 }
 0x5fa   :  { %2214 = vmatpush1.msra.mxu1 %v5167_v49  ;;  %2319 = vmatpush1.msra.mxu0 %v5147_v39  ;;  %v3875_v28 = vpop.f32.mrf.mxu0  ;;  %v5384_v49 = vpop.permute.xlu1 %2617 }
 0x5fb   :  { %2320 = vmatprep.subr.mxu0 %v5160_v52  ;;  %2247 = vmatprep.mubr.f32.mxu1 %v6554_v0  ;;  %v5307_v31 = vmax.f32 %v5199_v58, %v1860_v7 }
 0x5fc   :  { %2321 = vmatpush1.msra.mxu0 %v5172_v20  ;;  %2354 = vmatprep.mubr.f32.mxu0 %v6554_v0  ;;  %v1864_v30 = vpop.f32.mrf.mxu0 }
 0x5fd   :  { %6624 = vst [vmem:[#allocation19_spill] sm:$0xff] %v5307_v31  ;;  %3272 = vmatmul.mubr.msk.f32.vlgmr.msra.gmra.mxu1 %vm6543_vm2, %v5295_v4  ;;  %3279 = vmatmul.mubr.msk.f32.vlgmr.msra.gmra.mxu0 %vm6543_vm2, %v5295_v4  ;;  %v1865_v10 = vadd.f32 %v5184_v62, %v1864_v30  ;;  %v6732_v30 = vmov 0  ;;  %v6756_v4 = vmov 0.0  }
 0x5fe   :  { %2253 = vmatprep.mubr.f32.mxu1 %v6554_v0  ;;  %2360 = vmatprep.mubr.f32.mxu0 %v6554_v0  ;;  %v3878_v11 = vpop.f32.mrf.mxu0 }
 0x5ff   :  { %3891 = vmatprep.subr.mxu1 %v6554_v0  ;;  %v5318_v40 = vmax.f32 %v5213_v60, %v1865_v10 }
 0x600   :  { %v1869_v33 = vpop.f32.mrf.mxu0 }
 0x601   :  { %6625 = vst [vmem:[#allocation20_spill] sm:$0xff] %v5318_v40  ;;  %3273 = vmatmul.mubr.msk.f32.gmra.mxu1 %vm6543_vm2, %v5307_v31  ;;  %3280 = vmatmul.mubr.msk.f32.gmra.mxu0 %vm6543_vm2, %v5307_v31  ;;  %v1870_v41 = vadd.f32 %v5184_v62, %v1869_v33  ;;  %v2947_v31 = vld [vmem:[#allocation8 + $0x30] sm:$0xff] }
 0x602   :  { %2259 = vmatprep.mubr.f32.mxu1 %v6554_v0  ;;  %2366 = vmatprep.mubr.f32.mxu0 %v6554_v0  ;;  %v3881_v42 = vpop.f32.mrf.mxu0 }
 0x603   :  { %v5328_v44 = vmax.f32 %v5228_v53, %v1870_v41  ;;  %v6647_v41 = vmov 0  ;;  %v6650_v42 = vmov 0 }
 0x604   :  { %v1874_v43 = vpop.f32.mrf.mxu0 }
 0x605   :  { %6626 = vst [vmem:[#allocation21_spill] sm:$0xff] %v5328_v44  ;;  %3274 = vmatmul.mubr.msk.f32.gmra.mxu1 %vm6543_vm2, %v5318_v40  ;;  %3281 = vmatmul.mubr.msk.f32.gmra.mxu0 %vm6543_vm2, %v5318_v40  ;;  %v1875_v45 = vadd.f32 %v5184_v62, %v1874_v43  ;;  %v6653_v43 = vmov 0 }
 0x606   :  { %2265 = vmatprep.mubr.f32.mxu1 %v6554_v0  ;;  %2372 = vmatprep.mubr.f32.mxu0 %v6554_v0  ;;  %v3884_v46 = vpop.f32.mrf.mxu0 }
 0x607   :  { %v5338_v47 = vmax.f32 %v5245_v56, %v1875_v45 }
 0x608   :  { %v1879_v34 = vpop.f32.mrf.mxu0 }
 0x609   :  { %6627 = vst [vmem:[#allocation22_spill] sm:$0xff] %v5338_v47  ;;  %3275 = vmatmul.mubr.msk.f32.gmra.mxu1 %vm6543_vm2, %v5328_v44  ;;  %3282 = vmatmul.mubr.msk.f32.gmra.mxu0 %vm6543_vm2, %v5328_v44  ;;  %v1880_v16 = vadd.f32 %v5184_v62, %v1879_v34  ;;  %v6660_v34 = vmov 0  ;;  %v6739_v44 = vmov 0 }
 0x60a   :  { %2271 = vmatprep.mubr.f32.mxu1 %v6554_v0  ;;  %2378 = vmatprep.mubr.f32.mxu0 %v6554_v0  ;;  %v3887_v18 = vpop.f32.mrf.mxu0 }
 0x60b   :  { %v5348_v17 = vmax.f32 %v5263_v15, %v1880_v16  ;;  %v6666_v18 = vmov 0  ;;  %v6709_v16 = vmov 0 }
 0x60c   :  { %v1884_v19 = vpop.f32.mrf.mxu0 }
 0x60d   :  { %6628 = vst [vmem:[#allocation23_spill] sm:$0xff] %v5348_v17  ;;  %3276 = vmatmul.mubr.msk.f32.gmra.mxu1 %vm6543_vm2, %v5338_v47  ;;  %3283 = vmatmul.mubr.msk.f32.gmra.mxu0 %vm6543_vm2, %v5338_v47  ;;  %v1885_v36 = vadd.f32 %v5184_v62, %v1884_v19  ;;  %v6669_v19 = vmov 0 }
 0x60e   :  { %2277 = vmatprep.mubr.f32.mxu1 %v6554_v0  ;;  %2384 = vmatprep.mubr.f32.mxu0 %v6554_v0  ;;  %v3890_v51 = vpop.f32.mrf.mxu0 }
 0x60f   :  { %v5358_v23 = vmax.f32 %v5277_v55, %v1885_v36 }
 0x611   :  { %6629 = vst [vmem:[#allocation24_spill] sm:$0xff] %v5358_v23  ;;  %3277 = vmatmul.mubr.msk.f32.gmra.mxu1 %vm6543_vm2, %v5348_v17  ;;  %3284 = vmatmul.mubr.msk.f32.gmra.mxu0 %vm6543_vm2, %v5348_v17 }
 0x612   :  { %2283 = vmatprep.mubr.f32.mxu1 %v6554_v0  ;;  %2390 = vmatprep.mubr.f32.mxu0 %v6554_v0 }
 0x615   :  { %3278 = vmatmul.mubr.msk.f32.gmra.mxu1 %vm6543_vm2, %v5358_v23  ;;  %3285 = vmatmul.mubr.msk.f32.gmra.mxu0 %vm6543_vm2, %v5358_v23  ;;  %v6753_v23 = vmov 0 }
 0x616   :  { %3907 = vmatprep.mubr.msk.f32.mxu1 %vm6541_vm0, %v6554_v0 }
 0x64d   :  { %v5390_v3 = vpop.permute.xlu0 %2456 }
 0x651   :  { %v5400_v37 = vpop.permute.xlu1 %2458  ;;  %v5406_v35 = vpop.permute.xlu0 %2495 }
 0x652   :  { %vm6544_vm13 = vcmp.ne.s32.totalorder %v5406_v35, 0 }
 0x65a   :  { %v5421_v13 = vpop.permute.xlu1 %2739 }
 0x65b   :  { %vm6547_vm4 = vcmp.ne.s32.totalorder %v5421_v13, 0 }
 0x65f   :  { %v5489_v7 = vpop.permute.xlu1 %2861 }
 0x69b   :  { %v5372_v38 = vpop.f32.mrf.mxu1 }
 0x69c   :  { %v5374_v1 = vpop.f32.mrf.mxu0  ;;  %vm2418_vm9 = vcmp.eq.f32.partialorder %v5372_v38, %v5187_v22  ;;  %vm2484_vm14 = vcmp.eq.f32.partialorder %v5372_v38, %v5390_v3 }
 0x69d   :  { %v5376_v48 = vpop.f32.mrf.mxu1  ;;  %vm2683_vm11 = vcmp.eq.f32.partialorder %v5374_v1, %v5187_v22  ;;  %vm5425_vm15 = vmand %vm2418_vm9, %vm6549_vm10  ;;  %vm2728_vm6 = vcmp.eq.f32.partialorder %v5374_v1, %v5390_v3  ;;  %vm6548_vm9 = vcmp.gt.s32.totalorder %v5149_v2, 6 }
 0x69e   :  { %v5378_v39 = vpop.f32.mrf.mxu0  ;;  %vm2561_vm1 = vcmp.eq.f32.partialorder %v5376_v48, %v5187_v22  ;;  %vm5437_vm5 = vmand %vm2683_vm11, %vm6546_vm12 }
 0x69f   :  { %vm5447_vm7 = vmand %vm2484_vm14, %vm6544_vm13  ;;  %vm2805_vm8 = vcmp.eq.f32.partialorder %v5378_v39, %v5187_v22 }
 0x6a0   :  { %v5380_v8 = vpop.f32.mrf.mxu1  ;;  %v5382_v52 = vpop.f32.mrf.mxu0  ;;  %vm5458_vm11 = vmand %vm2561_vm1, %vm6545_vm3  ;;  %vm2411_vm1 = vcmp.lt.f32.partialorder %v5372_v38, %v5187_v22 }
 0x6a1   :  { %vm2419_vm0 = vcmp.eq.f32.partialorder %v5380_v8, %v5199_v58  ;;  %vm5469_vm2 = vmand %vm2728_vm6, %vm6547_vm4  ;;  %vm2684_vm13 = vcmp.eq.f32.partialorder %v5382_v52, %v5199_v58  ;;  %vm6644_vm4 = vcmp.gt.s32.totalorder %v5149_v2, 4 }
 0x6a2   :  { %v5386_v20 = vpop.f32.mrf.mxu1  ;;  %v5388_v21 = vpop.f32.mrf.mxu0  ;;  %vm5483_vm12 = vmand %vm2805_vm8, %vm6548_vm9 }
 0x6a3   :  { %vm5497_vm3 = vmand %vm2419_vm0, %vm6549_vm10  ;;  %vm2562_vm8 = vcmp.eq.f32.partialorder %v5386_v20, %v5199_v58  ;;  %vm6652_vm10 = vcmp.lt.f32.partialorder %v5372_v38, %v5390_v3  ;;  %v6712_v38 = vmov 0 }
 0x6a4   :  { %v5392_v62 = vpop.f32.mrf.mxu1  ;;  %v5394_v6 = vpop.f32.mrf.mxu0  ;;  %vm5515_vm0 = vmand %vm2684_vm13, %vm6644_vm4  ;;  %vm6649_vm13 = vcmp.lt.f32.partialorder %v5374_v1, %v5187_v22 }
 0x6a5   :  { %vm5528_vm9 = vmor %vm2411_vm1, %vm5425_vm15  ;;  %vm6655_vm15 = vcmp.ne.s32.totalorder %v5384_v49, 0  ;;  %vm6656_vm1 = vcmp.eq.f32.partialorder %v5376_v48, %v5390_v3 }
 0x6a6   :  { %v5396_v57 = vpop.f32.mrf.mxu1  ;;  %v5398_v32 = vpop.f32.mrf.mxu0  ;;  %v6648_v41 = vsel %vm5528_vm9, 4294967295, %v6647_v41  ;;  %vm5537_vm4 = vmor %vm6649_vm13, %vm5437_vm5  ;;  %vm6662_vm5 = vcmp.gt.s32.totalorder %v5149_v2, 2  ;;  %vm6743_vm9 = vcmp.gt.s32.totalorder %v5149_v2, 4 }
 0x6a7   :  { %v6651_v42 = vsel %vm5537_vm4, 4294967295, %v6650_v42  ;;  %vm5546_vm14 = vmor %vm6652_vm10, %vm5447_vm7  ;;  %vm6659_vm10 = vcmp.lt.f32.partialorder %v5374_v1, %v5390_v3 }
 0x6a8   :  { %v6654_v43 = vsel %vm5546_vm14, 4294967295, %v6653_v43  ;;  %vm5555_vm6 = vmand %vm6656_vm1, %vm6655_vm15  ;;  %vm6671_vm1 = vcmp.ne.s32.totalorder %v5489_v7, 0 }
 0x6a9   :  { %v5402_v24 = vpop.f32.mrf.mxu1  ;;  %v5404_v50 = vpop.f32.mrf.mxu0  ;;  %vm5568_vm7 = vmor %vm6659_vm10, %vm5469_vm2  ;;  %vm6665_vm10 = vcmp.lt.f32.partialorder %v5376_v48, %v5187_v22  ;;  %vm2843_vm2 = vcmp.lt.f32.partialorder %v5378_v39, %v5390_v3 }
 0x6aa   :  { %v6661_v34 = vsel %vm5568_vm7, 4294967295, %v6660_v34  ;;  %vm5583_vm14 = vmand %vm2562_vm8, %vm6662_vm5  ;;  %vm6668_vm8 = vcmp.lt.f32.partialorder %v5378_v39, %v5187_v22 }
 0x6ab   :  { %v5411_v61 = vpop.f32.mrf.mxu1  ;;  %v5413_v25 = vpop.f32.mrf.mxu0  ;;  %vm5594_vm15 = vmor %vm6665_vm10, %vm5458_vm11  ;;  %vm6672_vm11 = vcmp.eq.f32.partialorder %v5378_v39, %v5390_v3  ;;  %v6681_v39 = vmov 0 }
 0x6ac   :  { %v6667_v18 = vsel %vm5594_vm15, 4294967295, %v6666_v18  ;;  %vm5603_vm5 = vmor %vm6668_vm8, %vm5483_vm12  ;;  %vm6674_vm15 = vcmp.eq.f32.partialorder %v5388_v21, %v5199_v58 }
 0x6ad   :  { %v6670_v19 = vsel %vm5603_vm5, 4294967295, %v6669_v19  ;;  %vm2864_vm10 = vmand %vm6672_vm11, %vm6671_vm1  ;;  %vm6673_vm5 = vcmp.gt.s32.totalorder %v5149_v2, 6  ;;  %vm6677_vm11 = vcmp.lt.f32.partialorder %v5380_v8, %v5199_v58  ;;  %vm6683_vm1 = vcmp.lt.f32.partialorder %v5376_v48, %v5390_v3 }
 0x6ae   :  { %v5433_v12 = vpop.f32.mrf.mxu1  ;;  %vm5629_vm7 = vmand %vm6674_vm15, %vm6673_vm5  ;;  %vm6680_vm15 = vcmp.lt.f32.partialorder %v5382_v52, %v5199_v58 }
 0x6af   :  { %v5443_v14 = vpop.f32.mrf.mxu0  ;;  %vm5640_vm12 = vmor %vm6677_vm11, %vm5497_vm3  ;;  %vm6686_vm3 = vcmp.gt.s32.totalorder %v5149_v2, 0  ;;  %vm6687_vm11 = vcmp.eq.f32.partialorder %v5392_v62, %v5213_v60 }
 0x6b0   :  { %v5454_v59 = vpop.f32.mrf.mxu1  ;;  %vm5649_vm5 = vmor %vm6680_vm15, %vm5515_vm0  ;;  %vm2563_vm0 = vcmp.eq.f32.partialorder %v5396_v57, %v5213_v60 }
 0x6b1   :  { %v5465_v5 = vpop.f32.mrf.mxu0  ;;  %v6682_v39 = vsel %vm5649_vm5, 4294967295, %v6681_v39  ;;  %vm5658_vm8 = vmor %vm6683_vm1, %vm5555_vm6  ;;  %vm6703_vm6 = vcmp.ne.s32.totalorder %v5406_v35, 0 }
 0x6b2   :  { %v6685_v63 = vsel %vm5658_vm8, 4294967295, %v6684_v63  ;;  %vm5667_vm13 = vmand %vm6687_vm11, %vm6686_vm3  ;;  %vm6692_vm8 = vcmp.gt.s32.totalorder %v5149_v2, 4  ;;  %vm6693_vm3 = vcmp.eq.f32.partialorder %v5394_v6, %v5213_v60 }
 0x6b3   :  { %v5491_v28 = vpop.f32.mrf.mxu1  ;;  %vm5673_vm15 = vmor %vm2843_vm2, %vm2864_vm10  ;;  %vm6696_vm10 = vcmp.lt.f32.partialorder %v5386_v20, %v5199_v58  ;;  %vm6715_vm2 = vcmp.ne.s32.totalorder %v5421_v13, 0 }
 0x6b4   :  { %v5504_v10 = vpop.f32.mrf.mxu0  ;;  %v6691_v26 = vsel %vm5673_vm15, 4294967295, %v6690_v26  ;;  %vm5686_vm11 = vmand %vm6693_vm3, %vm6692_vm8  ;;  %vm6699_vm8 = vcmp.lt.f32.partialorder %v5388_v21, %v5199_v58  ;;  %vm6716_vm15 = vcmp.eq.f32.partialorder %v5382_v52, %v5400_v37 }
 0x6b5   :  { %v5521_v33 = vpop.f32.mrf.mxu1  ;;  %vm5701_vm1 = vmor %vm6696_vm10, %vm5583_vm14  ;;  %vm6704_vm14 = vcmp.eq.f32.partialorder %v5380_v8, %v5400_v37 }
 0x6b6   :  { %v5561_v46 = vpop.f32.mrf.mxu0  ;;  %v6698_v9 = vsel %vm5701_vm1, 4294967295, %v6697_v9  ;;  %vm5710_vm3 = vmor %vm6699_vm8, %vm5629_vm7  ;;  %vm2722_vm1 = vcmp.lt.f32.partialorder %v5382_v52, %v5400_v37  ;;  %vm6705_vm7 = vcmp.gt.s32.totalorder %v5149_v2, 2 }
 0x6b7   :  { %v6701_v29 = vsel %vm5710_vm3, 4294967295, %v6700_v29  ;;  %vm2499_vm10 = vmand %vm6704_vm14, %vm6703_vm6  ;;  %vm6708_vm6 = vcmp.lt.f32.partialorder %v5392_v62, %v5213_v60 }
 0x6b8   :  { %v5616_v36 = vpop.f32.mrf.mxu1  ;;  %v5618_v51 = vpop.f32.mrf.mxu0  ;;  %6702 = vst [vmem:[#allocation25_spill] sm:$0xff] %v6701_v29  ;;  %vm5727_vm8 = vmand %vm2563_vm0, %vm6705_vm7  ;;  %vm6711_vm0 = vcmp.lt.f32.partialorder %v5394_v6, %v5213_v60 }
 0x6b9   :  { %vm5742_vm14 = vmor %vm6708_vm6, %vm5667_vm13  ;;  %vm6718_vm6 = vcmp.lt.f32.partialorder %v5380_v8, %v5400_v37  ;;  %vm6737_vm13 = vcmp.eq.f32.partialorder %v5402_v24, %v5228_v53 }
 0x6ba   :  { %v5692_v3 = vpop.f32.mrf.mxu1  ;;  %v5694_v27 = vpop.f32.mrf.mxu0  ;;  %v6710_v16 = vsel %vm5742_vm14, 4294967295, %v6709_v16  ;;  %vm5751_vm7 = vmor %vm6711_vm0, %vm5686_vm11  ;;  %vm6717_vm11 = vnez %v6654_v43 }
 0x6bb   :  { %v6713_v38 = vsel %vm5751_vm7, 4294967295, %v6712_v38  ;;  %vm2743_vm3 = vmand %vm6716_vm15, %vm6715_vm2  ;;  %vm6782_vm7 = vcmp.ne.s32.totalorder %v5421_v13, 0 }
 0x6bc   :  { %6714 = vst [vmem:[#allocation26_spill] sm:$0xff] %v6713_v38  ;;  %vm5774_vm0 = vmor %vm6718_vm6, %vm2499_vm10  ;;  %vm6727_vm10 = vcmp.gt.s32.totalorder %v5149_v2, 6  ;;  %vm6728_vm6 = vcmp.eq.f32.partialorder %v5398_v32, %v5213_v60 }
 0x6bd   :  { %v5733_v11 = vpop.f32.mrf.mxu1  ;;  %v5735_v45 = vpop.f32.mrf.mxu0  ;;  %vm5778_vm15 = vmor %vm2722_vm1, %vm2743_vm3  ;;  %vm6724_vm1 = vcmp.lt.f32.partialorder %v5396_v57, %v5213_v60 }
 0x6be   :  { %v2512_v0 = vsel %vm6717_vm11, %v5733_v11, -1e+30  ;;  %vm6723_vm11 = vnez %v6661_v34  ;;  %vm5797_vm3 = vmor %vm6724_vm1, %vm5727_vm8  ;;  %vm6731_vm1 = vcmp.lt.f32.partialorder %v5398_v32, %v5213_v60  ;;  %v2948_v60 = vld [vmem:[#allocation8 + $0x38] sm:$0xff] }
 0x6bf   :  { %2526 = vrot.lane.b32.xlu1 %v2512_v0, %s4049_s8  ;;  %v5785_v48 = vpop.f32.mrf.mxu1  ;;  %v2756_v43 = vsel %vm6723_vm11, %v5735_v45, -1e+30  ;;  %v5790_v8 = vpop.f32.mrf.mxu0  ;;  %v6726_v54 = vsel %vm5797_vm3, 4294967295, %v6725_v54  ;;  %vm2817_vm2 = vmand %vm6728_vm6, %vm6727_vm10  ;;  %vm2414_vm11 = vcmp.lt.f32.partialorder %v5402_v24, %v5228_v53  ;;  %vm2686_vm10 = vcmp.eq.f32.partialorder %v5404_v50, %v5228_v53  ;;  %3892 = vmatpush3.msra.mxu1 %v2948_v60  ;;  %v2946_v60 = vld [vmem:[#allocation8 + $0x28] sm:$0xff] }
 0x6c0   :  { %2770 = vrot.lane.b32.xlu0 %v2756_v43, %s4049_s8  ;;  %vm5818_vm4 = vmor %vm6731_vm1, %vm2817_vm2  ;;  %vm6736_vm6 = vcmp.gt.s32.totalorder %v5149_v2, 0  ;;  %vm6738_vm2 = vnez %v6685_v63  ;;  %3893 = vmatprep.subr.mxu1 %v6756_v4  ;;  %vm2803_vm3 = vcmp.lt.f32.partialorder %v5561_v46, %v5263_v15 }
 0x6c1   :  { %v6733_v30 = vsel %vm5818_vm4, 4294967295, %v6732_v30  ;;  %v5824_v17 = vpop.f32.mrf.mxu1  ;;  %v5826_v47 = vpop.f32.mrf.mxu0  ;;  %vm2431_vm8 = vmand %vm6737_vm13, %vm6736_vm6  ;;  %v2634_v0 = vsel %vm6738_vm2, %v5785_v48, -1e+30  ;;  %vm6742_vm6 = vnez %v6691_v26  ;;  %v6747_v26 = vmov 0  ;;  %3894 = vmatpush3.msra.mxu1 %v2947_v31  ;;  %v2945_v31 = vld [vmem:[#allocation8 + $0x20] sm:$0xff] }
 0x6c2   :  { %6734 = vst [vmem:[#allocation27_spill] sm:$0xff] %v6733_v30  ;;  %6735 = vst [vmem:[#allocation28_spill] sm:$0xff] %v5826_v47  ;;  %v2878_v43 = vsel %vm6742_vm6, %v5790_v8, -1e+30  ;;  %vm6746_vm6 = vcmp.lt.f32.partialorder %v5404_v50, %v5228_v53  ;;  %3895 = vmatprep.subr.mxu1 %v6756_v4 }
 0x6c3   :  { %vm5844_vm1 = vmor %vm2414_vm11, %vm2431_vm8  ;;  %2648 = vrot.lane.b32.xlu1 %v2634_v0, %s4049_s8  ;;  %v5851_v40 = vpop.f32.mrf.mxu1  ;;  %v5856_v34 = vpop.f32.mrf.mxu0  ;;  %vm2600_vm11 = vcmp.lt.f32.partialorder %v5386_v20, %v5400_v37  ;;  %v2513_v0 = vsel %vm5774_vm0, %v5824_v17, -1e+30  ;;  %3896 = vmatpush3.msra.mxu1 %v2946_v60 }
 0x6c4   :  { %v6740_v44 = vsel %vm5844_vm1, 4294967295, %v6739_v44  ;;  %vm2696_vm2 = vmand %vm2686_vm10, %vm6743_vm9  ;;  %2892 = vrot.lane.b32.xlu0 %v2878_v43, %s4049_s8  ;;  %v2757_v43 = vsel %vm5778_vm15, %v5826_v47, -1e+30  ;;  %vm6750_vm10 = vcmp.gt.s32.totalorder %v5149_v2, 2  ;;  %vm6752_vm15 = vcmp.lt.f32.partialorder %v5411_v61, %v5228_v53  ;;  %3897 = vmatprep.subr.mxu1 %v6756_v4 }
 0x6c5   :  { %6741 = vst [vmem:[#allocation29_spill] sm:$0xff] %v6740_v44  ;;  %vm5872_vm5 = vmor %vm6746_vm6, %vm2696_vm2  ;;  %v5878_v58 = vpop.f32.mrf.mxu1  ;;  %v5880_v63 = vpop.f32.mrf.mxu0  ;;  %vm6751_vm2 = vcmp.eq.f32.partialorder %v5411_v61, %v5228_v53  ;;  %3898 = vmatpush3.msra.mxu1 %v2945_v31  ;;  %v2944_v31 = vld [vmem:[#allocation8 + $0x18] sm:$0xff]  ;;  %v6778_v44 = vmov 0 }
 0x6c6   :  { %v6748_v26 = vsel %vm5872_vm5, 4294967295, %v6747_v26  ;;  %vm2574_vm6 = vmand %vm6751_vm2, %vm6750_vm10  ;;  %vm6757_vm2 = vcmp.ne.s32.totalorder %v5384_v49, 0  ;;  %vm6762_vm10 = vcmp.eq.f32.partialorder %v5388_v21, %v5400_v37  ;;  %3899 = vmatprep.subr.mxu1 %v6756_v4 }
 0x6c7   :  { %6749 = vst [vmem:[#allocation30_spill] sm:$0xff] %v6748_v26  ;;  %vm5901_vm9 = vmor %vm6752_vm15, %vm2574_vm6  ;;  %v5908_v47 = vpop.f32.mrf.mxu1  ;;  %2772 = vrot.lane.b32.xlu1 %v2757_v43, %s4049_s8  ;;  %v5914_v29 = vpop.f32.mrf.mxu0  ;;  %vm6758_vm6 = vcmp.eq.f32.partialorder %v5386_v20, %v5400_v37  ;;  %3900 = vmatpush3.msra.mxu1 %v2944_v31  ;;  %v2942_v26 = vld [vmem:[#allocation8 + $0x8] sm:$0xff] }
 0x6c8   :  { %v6754_v23 = vsel %vm5901_vm9, 4294967295, %v6753_v23  ;;  %vm2621_vm15 = vmand %vm6758_vm6, %vm6757_vm2  ;;  %2528 = vrot.lane.b32.xlu0 %v2513_v0, %s4049_s8  ;;  %vm2808_vm2 = vcmp.eq.f32.partialorder %v5413_v25, %v5228_v53  ;;  %vm6761_vm6 = vcmp.ne.s32.totalorder %v5489_v7, 0  ;;  %3901 = vmatprep.subr.mxu1 %v6756_v4 }
 0x6c9   :  { %6755 = vst [vmem:[#allocation31_spill] sm:$0xff] %v6754_v23  ;;  %vm5933_vm0 = vmor %vm2600_vm11, %vm2621_vm15  ;;  %v5940_v38 = vpop.f32.mrf.mxu1  ;;  %v5942_v0 = vpop.f32.mrf.mxu0  ;;  %vm6763_vm15 = vcmp.lt.f32.partialorder %v5388_v21, %v5400_v37  ;;  %vm6764_vm11 = vcmp.gt.s32.totalorder %v5149_v2, 6  ;;  %v6766_v37 = vmov 0  ;;  %v6770_v21 = vmov 0 }
 0x6ca   :  { %vm2865_vm4 = vmand %vm6762_vm10, %vm6761_vm6  ;;  %v2635_v30 = vsel %vm5933_vm0, %v5851_v40, -1e+30  ;;  %vm2422_vm6 = vcmp.eq.f32.partialorder %v5433_v12, %v5245_v56  ;;  %v6774_v23 = vmov 0 }
 0x6cb   :  { %vm2872_vm10 = vmor %vm6763_vm15, %vm2865_vm4  ;;  %v5966_v60 = vpop.f32.mrf.mxu1  ;;  %2650 = vrot.lane.b32.xlu1 %v2635_v30, %s4049_s8  ;;  %v5970_v52 = vpop.f32.mrf.mxu0  ;;  %vm2415_vm4 = vcmp.lt.f32.partialorder %v5433_v12, %v5245_v56  ;;  %vm6765_vm15 = vcmp.lt.f32.partialorder %v5413_v25, %v5228_v53 }
 0x6cc   :  { %v2879_v20 = vsel %vm2872_vm10, %v5856_v34, -1e+30  ;;  %vm2818_vm0 = vmand %vm2808_vm2, %vm6764_vm11  ;;  %vm2687_vm2 = vcmp.eq.f32.partialorder %v5443_v14, %v5245_v56  ;;  %vm6769_vm11 = vcmp.gt.s32.totalorder %v5149_v2, 0  ;;  %v6013_v30 = vpop.permute.xlu0 %2460 }
 0x6cd   :  { %2894 = vrot.lane.b32.xlu0 %v2879_v20, %s4049_s8  ;;  %vm5986_vm10 = vmor %vm6765_vm15, %vm2818_vm0  ;;  %v5996_v43 = vpop.f32.mrf.mxu1  ;;  %vm2680_vm15 = vcmp.lt.f32.partialorder %v5443_v14, %v5245_v56  ;;  %v2943_v20 = vld [vmem:[#allocation8 + $0x10] sm:$0xff]  ;;  %v6009_v53 = vpop.f32.mrf.mxu0  ;;  %vm2486_vm9 = vcmp.eq.f32.partialorder %v5392_v62, %v6013_v30 }
 0x6ce   :  { %v6767_v37 = vsel %vm5986_vm10, 4294967295, %v6766_v37  ;;  %vm2432_vm0 = vmand %vm2422_vm6, %vm6769_vm11  ;;  %vm2565_vm10 = vcmp.eq.f32.partialorder %v5454_v59, %v5245_v56  ;;  %vm6773_vm6 = vcmp.gt.s32.totalorder %v5149_v2, 4  ;;  %3902 = vmatpush3.msra.mxu1 %v2943_v20 }
 0x6cf   :  { %6768 = vst [vmem:[#allocation32_spill] sm:$0xff] %v6767_v37  ;;  %vm6005_vm5 = vmor %vm2415_vm4, %vm2432_vm0  ;;  %vm2558_vm4 = vcmp.lt.f32.partialorder %v5454_v59, %v5245_v56  ;;  %v6027_v31 = vpop.f32.mrf.mxu1  ;;  %3903 = vmatprep.subr.mxu1 %v6756_v4  ;;  %v6792_v37 = vmov 0 }
 0x6d0   :  { %v6771_v21 = vsel %vm6005_vm5, 4294967295, %v6770_v21  ;;  %vm2697_vm11 = vmand %vm2687_vm2, %vm6773_vm6  ;;  %vm6777_vm2 = vcmp.gt.s32.totalorder %v5149_v2, 2  ;;  %vm2479_vm5 = vcmp.lt.f32.partialorder %v5392_v62, %v6013_v30  ;;  %3904 = vmatpush3.msra.mxu1 %v2942_v26  ;;  %v6061_v26 = vpop.f32.mrf.mxu0 }
 0x6d1   :  { %6772 = vst [vmem:[#allocation33_spill] sm:$0xff] %v6771_v21  ;;  %vm6023_vm0 = vmor %vm2680_vm15, %vm2697_vm11  ;;  %v2941_v21 = vld [vmem:[#allocation8] sm:$0xff]  ;;  %vm2730_vm11 = vcmp.eq.f32.partialorder %v5394_v6, %v6013_v30  ;;  %3905 = vmatprep.subr.mxu1 %v6756_v4 }
 0x6d2   :  { %v6775_v23 = vsel %vm6023_vm0, 4294967295, %v6774_v23  ;;  %vm2575_vm6 = vmand %vm2565_vm10, %vm6777_vm2  ;;  %vm6781_vm10 = vcmp.ne.s32.totalorder %v5406_v35, 0  ;;  %vm2723_vm0 = vcmp.lt.f32.partialorder %v5394_v6, %v6013_v30  ;;  %3906 = vmatpush3.msra.mxu1 %v2941_v21  ;;  %v6784_v21 = vmov 0  ;;  %v6090_v20 = vpop.f32.mrf.mxu0 }
 0x6d3   :  { %6776 = vst [vmem:[#allocation34_spill] sm:$0xff] %v6775_v23  ;;  %vm6039_vm15 = vmor %vm2558_vm4, %vm2575_vm6  ;;  %vm2809_vm6 = vcmp.eq.f32.partialorder %v5465_v5, %v5245_v56  ;;  %v6109_v23 = vpop.permute.xlu0 %2462 }
 0x6d4   :  { %v6779_v44 = vsel %vm6039_vm15, 4294967295, %v6778_v44  ;;  %vm2500_vm2 = vmand %vm2486_vm9, %vm6781_vm10  ;;  %vm2802_vm15 = vcmp.lt.f32.partialorder %v5465_v5, %v5245_v56  ;;  %vm6783_vm10 = vcmp.gt.s32.totalorder %v5149_v2, 6  ;;  %v6139_v56 = vpop.f32.mrf.mxu0 }
 0x6d5   :  { %6780 = vst [vmem:[#allocation35_spill] sm:$0xff] %v6779_v44  ;;  %vm2507_vm4 = vmor %vm2479_vm5, %vm2500_vm2  ;;  %vm2423_vm5 = vcmp.eq.f32.partialorder %v5491_v28, %v5263_v15  ;;  %v6802_v44 = vmov 0 }
 0x6d6   :  { %v2514_v62 = vsel %vm2507_vm4, %v5878_v58, -1e+30  ;;  %vm2744_vm1 = vmand %vm2730_vm11, %vm6782_vm7  ;;  %vm2416_vm4 = vcmp.lt.f32.partialorder %v5491_v28, %v5263_v15 }
 0x6d7   :  { %2530 = vrot.lane.b32.xlu0 %v2514_v62, %s4049_s8  ;;  %vm2751_vm9 = vmor %vm2723_vm0, %vm2744_vm1  ;;  %v6075_v62 = vpop.f32.mrf.mxu1  ;;  %vm2688_vm1 = vcmp.eq.f32.partialorder %v5504_v10, %v5263_v15  ;;  %vm6787_vm0 = vcmp.gt.s32.totalorder %v5149_v2, 0 }
 0x6d8   :  { %v2758_v6 = vsel %vm2751_vm9, %v5880_v63, -1e+30  ;;  %vm2819_vm2 = vmand %vm2809_vm6, %vm6783_vm10  ;;  %vm2681_vm6 = vcmp.lt.f32.partialorder %v5504_v10, %v5263_v15  ;;  %vm6791_vm10 = vcmp.gt.s32.totalorder %v5149_v2, 4 }
 0x6d9   :  { %2774 = vrot.lane.b32.xlu1 %v2758_v6, %s4049_s8  ;;  %vm6071_vm7 = vmor %vm2802_vm15, %vm2819_vm2  ;;  %v6788_v6 = vmov 0  ;;  %vm2566_vm15 = vcmp.eq.f32.partialorder %v5521_v33, %v5263_v15 }
 0x6da   :  { %v6785_v21 = vsel %vm6071_vm7, 4294967295, %v6784_v21  ;;  %vm2433_vm11 = vmand %vm2423_vm5, %vm6787_vm0  ;;  %vm2559_vm5 = vcmp.lt.f32.partialorder %v5521_v33, %v5263_v15  ;;  %vm6799_vm7 = vcmp.ne.s32.totalorder %v5384_v49, 0 }
 0x6db   :  { %6786 = vst [vmem:[#allocation36_spill] sm:$0xff] %v6785_v21  ;;  %vm6086_vm9 = vmor %vm2416_vm4, %vm2433_vm11  ;;  %v6105_v21 = vpop.f32.mrf.mxu1  ;;  %vm2608_vm4 = vcmp.eq.f32.partialorder %v5396_v57, %v6013_v30 }
 0x6dc   :  { %v6789_v6 = vsel %vm6086_vm9, 4294967295, %v6788_v6  ;;  %vm2698_vm2 = vmand %vm2688_vm1, %vm6791_vm10  ;;  %vm6795_vm1 = vcmp.gt.s32.totalorder %v5149_v2, 2 }
 0x6dd   :  { %6790 = vst [vmem:[#allocation37_spill] sm:$0xff] %v6789_v6  ;;  %vm6101_vm0 = vmor %vm2681_vm6, %vm2698_vm2  ;;  %vm2601_vm6 = vcmp.lt.f32.partialorder %v5396_v57, %v6013_v30  ;;  %v6796_v6 = vmov 0  ;;  %vm2487_vm2 = vcmp.eq.f32.partialorder %v5402_v24, %v6109_v23 }
 0x6de   :  { %v6793_v37 = vsel %vm6101_vm0, 4294967295, %v6792_v37  ;;  %vm2576_vm11 = vmand %vm2566_vm15, %vm6795_vm1  ;;  %vm2480_vm15 = vcmp.lt.f32.partialorder %v5402_v24, %v6109_v23 }
 0x6df   :  { %6794 = vst [vmem:[#allocation38_spill] sm:$0xff] %v6793_v37  ;;  %vm6118_vm10 = vmor %vm2559_vm5, %vm2576_vm11  ;;  %vm2810_vm5 = vcmp.eq.f32.partialorder %v5561_v46, %v5263_v15  ;;  %vm6800_vm11 = vcmp.ne.s32.totalorder %v5406_v35, 0  ;;  %v6168_v37 = vpop.f32.mrf.mxu0  ;;  %v6809_v15 = vmov 0 }
 0x6e0   :  { %v6797_v6 = vsel %vm6118_vm10, 4294967295, %v6796_v6  ;;  %vm2622_vm0 = vmand %vm2608_vm4, %vm6799_vm7  ;;  %vm2424_vm7 = vcmp.eq.f32.partialorder %v5616_v36, %v5277_v55 }
 0x6e1   :  { %6798 = vst [vmem:[#allocation39_spill] sm:$0xff] %v6797_v6  ;;  %vm2629_vm1 = vmor %vm2601_vm6, %vm2622_vm0  ;;  %vm6801_vm0 = vcmp.gt.s32.totalorder %v5149_v2, 6  ;;  %vm2417_vm6 = vcmp.lt.f32.partialorder %v5616_v36, %v5277_v55 }
 0x6e2   :  { %v2636_v57 = vsel %vm2629_vm1, %v5908_v47, -1e+30  ;;  %vm2501_vm9 = vmand %vm2487_vm2, %vm6800_vm11  ;;  %vm2682_vm1 = vcmp.lt.f32.partialorder %v5618_v51, %v5277_v55 }
 0x6e3   :  { %2652 = vrot.lane.b32.xlu0 %v2636_v57, %s4049_s8  ;;  %vm2508_vm10 = vmor %vm2480_vm15, %vm2501_vm9  ;;  %v6153_v57 = vpop.f32.mrf.mxu1  ;;  %vm2689_vm9 = vcmp.eq.f32.partialorder %v5618_v51, %v5277_v55 }
 0x6e4   :  { %v2515_v24 = vsel %vm2508_vm10, %v5940_v38, -1e+30  ;;  %vm2820_vm4 = vmand %vm2810_vm5, %vm6801_vm0  ;;  %vm6805_vm10 = vcmp.gt.s32.totalorder %v5149_v2, 0 }
 0x6e5   :  { %2532 = vrot.lane.b32.xlu1 %v2515_v24, %s4049_s8  ;;  %vm6149_vm2 = vmor %vm2803_vm3, %vm2820_vm4  ;;  %v6806_v24 = vmov 0  ;;  %vm6808_vm3 = vcmp.gt.s32.totalorder %v5149_v2, 4  ;;  %vm2845_vm4 = vcmp.lt.f32.partialorder %v5398_v32, %v6013_v30 }
 0x6e6   :  { %v6803_v44 = vsel %vm6149_vm2, 4294967295, %v6802_v44  ;;  %vm2434_vm15 = vmand %vm2424_vm7, %vm6805_vm10  ;;  %vm2852_vm7 = vcmp.eq.f32.partialorder %v5398_v32, %v6013_v30  ;;  %vm6811_vm10 = vcmp.ne.s32.totalorder %v5489_v7, 0  ;;  %vm2804_vm2 = vcmp.lt.f32.partialorder %v5694_v27, %v5277_v55  ;;  %v6200_v32 = vpop.f32.mrf.mxu0 }
 0x6e7   :  { %6804 = vst [vmem:[#allocation40_spill] sm:$0xff] %v6803_v44  ;;  %vm6164_vm5 = vmor %vm2417_vm6, %vm2434_vm15  ;;  %vm2731_vm6 = vcmp.eq.f32.partialorder %v5404_v50, %v6109_v23  ;;  %vm2724_vm15 = vcmp.lt.f32.partialorder %v5404_v50, %v6109_v23  ;;  %v2465_v44 = vpop.permute.xlu0 %2464 }
 0x6e8   :  { %v6807_v24 = vsel %vm6164_vm5, 4294967295, %v6806_v24  ;;  %vm2699_vm11 = vmand %vm2689_vm9, %vm6808_vm3  ;;  %vm2811_vm3 = vcmp.eq.f32.partialorder %v5694_v27, %v5277_v55  ;;  %vm2732_vm14 = vcmp.eq.f32.partialorder %v5443_v14, %v2465_v44 }
 0x6e9   :  { %vm6175_vm0 = vmor %vm2682_vm1, %vm2699_vm11  ;;  %vm6812_vm11 = vcmp.ne.s32.totalorder %v5421_v13, 0 }
 0x6ea   :  { %v6810_v15 = vsel %vm6175_vm0, 4294967295, %v6809_v15  ;;  %vm2866_vm9 = vmand %vm2852_vm7, %vm6811_vm10  ;;  %vm6813_vm7 = vcmp.gt.s32.totalorder %v5149_v2, 6 }
 0x6eb   :  { %vm2873_vm1 = vmor %vm2845_vm4, %vm2866_vm9  ;;  %vm6816_vm9 = vcmp.ne.s32.totalorder %v5384_v49, 0 }
 0x6ec   :  { %v2880_v6 = vsel %vm2873_vm1, %v5914_v29, -1e+30  ;;  %vm2745_vm0 = vmand %vm2731_vm6, %vm6812_vm11  ;;  %vm2609_vm6 = vcmp.eq.f32.partialorder %v5411_v61, %v6109_v23  ;;  %vm6817_vm11 = vcmp.ne.s32.totalorder %v5406_v35, 0 }
 0x6ed   :  { %2896 = vrot.lane.b32.xlu0 %v2880_v6, %s4049_s8  ;;  %vm2752_vm5 = vmor %vm2724_vm15, %vm2745_vm0  ;;  %vm2488_vm0 = vcmp.eq.f32.partialorder %v5433_v12, %v2465_v44 }
 0x6ee   :  { %v2759_v30 = vsel %vm2752_vm5, %v5942_v0, -1e+30  ;;  %vm2821_vm4 = vmand %vm2811_vm3, %vm6813_vm7  ;;  %vm2602_vm5 = vcmp.lt.f32.partialorder %v5411_v61, %v6109_v23  ;;  %vm2853_vm3 = vcmp.eq.f32.partialorder %v5413_v25, %v6109_v23 }
 0x6ef   :  { %2776 = vrot.lane.b32.xlu1 %v2759_v30, %s4049_s8  ;;  %vm6206_vm10 = vmor %vm2804_vm2, %vm2821_vm4  ;;  %vm2481_vm2 = vcmp.lt.f32.partialorder %v5433_v12, %v2465_v44  ;;  %vm2846_vm4 = vcmp.lt.f32.partialorder %v5413_v25, %v6109_v23  ;;  %v6236_v12 = vpop.permute.xlu1 %2466  ;;  %v2469_v23 = vpop.permute.xlu0 %2468 }
 0x6f0   :  { %v2835_v6 = vsel %vm6206_vm10, %v6200_v32, -1e+30  ;;  %vm2623_vm15 = vmand %vm2609_vm6, %vm6816_vm9  ;;  %vm6818_vm6 = vcmp.ne.s32.totalorder %v5489_v7, 0  ;;  %vm2725_vm9 = vcmp.lt.f32.partialorder %v5443_v14, %v2465_v44  ;;  %vm2734_vm8 = vcmp.eq.f32.partialorder %v5618_v51, %v2469_v23 }
 0x6f1   :  { %vm2630_vm1 = vmor %vm2602_vm5, %vm2623_vm15 }
 0x6f2   :  { %v2637_v30 = vsel %vm2630_vm1, %v5966_v60, -1e+30  ;;  %vm2502_vm7 = vmand %vm2488_vm0, %vm6817_vm11  ;;  %vm2610_vm0 = vcmp.eq.f32.partialorder %v5454_v59, %v2465_v44  ;;  %vm2603_vm11 = vcmp.lt.f32.partialorder %v5454_v59, %v2465_v44 }
 0x6f3   :  { %2654 = vrot.lane.b32.xlu0 %v2637_v30, %s4049_s8  ;;  %vm2509_vm10 = vmor %vm2481_vm2, %vm2502_vm7  ;;  %vm6819_vm2 = vcmp.ne.s32.totalorder %v5421_v13, 0  ;;  %vm6820_vm7 = vcmp.ne.s32.totalorder %v5384_v49, 0 }
 0x6f4   :  { %v2516_v61 = vsel %vm2509_vm10, %v5996_v43, -1e+30  ;;  %vm2867_vm5 = vmand %vm2853_vm3, %vm6818_vm6  ;;  %vm2489_vm3 = vcmp.eq.f32.partialorder %v5491_v28, %v6236_v12  ;;  %vm2482_vm6 = vcmp.lt.f32.partialorder %v5491_v28, %v6236_v12 }
 0x6f5   :  { %2534 = vrot.lane.b32.xlu1 %v2516_v61, %s4049_s8  ;;  %vm2874_vm15 = vmor %vm2846_vm4, %vm2867_vm5 }
 0x6f6   :  { %v2881_v25 = vsel %vm2874_vm15, %v5970_v52, -1e+30  ;;  %vm2746_vm1 = vmand %vm2732_vm14, %vm6819_vm2  ;;  %vm2611_vm14 = vcmp.eq.f32.partialorder %v5521_v33, %v6236_v12  ;;  %vm2604_vm2 = vcmp.lt.f32.partialorder %v5521_v33, %v6236_v12 }
 0x6f7   :  { %2898 = vrot.lane.b32.xlu0 %v2881_v25, %s4049_s8  ;;  %vm2753_vm10 = vmor %vm2725_vm9, %vm2746_vm1  ;;  %vm6821_vm9 = vcmp.ne.s32.totalorder %v5406_v35, 0  ;;  %vm2854_vm1 = vcmp.eq.f32.partialorder %v5465_v5, %v2465_v44 }
 0x6f8   :  { %v2760_v14 = vsel %vm2753_vm10, %v6009_v53, -1e+30  ;;  %vm2624_vm4 = vmand %vm2610_vm0, %vm6820_vm7  ;;  %vm2856_vm10 = vcmp.eq.f32.partialorder %v5694_v27, %v2469_v23 }
 0x6f9   :  { %2778 = vrot.lane.b32.xlu1 %v2760_v14, %s4049_s8  ;;  %vm2631_vm5 = vmor %vm2603_vm11, %vm2624_vm4  ;;  %vm2847_vm4 = vcmp.lt.f32.partialorder %v5465_v5, %v2465_v44 }
 0x6fa   :  { %v2638_v59 = vsel %vm2631_vm5, %v6027_v31, -1e+30  ;;  %vm2503_vm15 = vmand %vm2489_vm3, %vm6821_vm9  ;;  %vm2490_vm5 = vcmp.eq.f32.partialorder %v5616_v36, %v2469_v23 }
 0x6fb   :  { %2656 = vrot.lane.b32.xlu0 %v2638_v59, %s4049_s8  ;;  %vm2510_vm0 = vmor %vm2482_vm6, %vm2503_vm15  ;;  %vm6823_vm6 = vcmp.ne.s32.totalorder %v5489_v7, 0  ;;  %vm2483_vm15 = vcmp.lt.f32.partialorder %v5616_v36, %v2469_v23 }
 0x6fc   :  { %v2517_v28 = vsel %vm2510_vm0, %v6075_v62, -1e+30  ;;  %vm6822_vm11 = vmmov %vm6820_vm7 }
 0x6fd   :  { %vm2625_vm7 = vmand %vm2611_vm14, %vm6822_vm11  ;;  %2536 = vrot.lane.b32.xlu1 %v2517_v28, %s4049_s8  ;;  %vm6827_vm11 = vcmp.ne.s32.totalorder %v5406_v35, 0 }
 0x6fe   :  { %vm2632_vm3 = vmor %vm2604_vm2, %vm2625_vm7  ;;  %vm2733_vm2 = vcmp.eq.f32.partialorder %v5504_v10, %v6236_v12 }
 0x6ff   :  { %v2639_v33 = vsel %vm2632_vm3, %v6105_v21, -1e+30  ;;  %vm2868_vm9 = vmand %vm2854_vm1, %vm6823_vm6  ;;  %vm2726_vm1 = vcmp.lt.f32.partialorder %v5504_v10, %v6236_v12  ;;  %vm6828_vm3 = vcmp.ne.s32.totalorder %v5421_v13, 0  ;;  %v6296_v10 = vpop.f32.mrf.mxu1 }
 0x700   :  { %vm6824_vm13 = vmmov %vm6823_vm6  ;;  %2658 = vrot.lane.b32.xlu0 %v2639_v33, %s4049_s8 }
 0x701   :  { %vm6273_vm0 = vmand %vm2856_vm10, %vm6824_vm13  ;;  %vm2612_vm10 = vcmp.eq.f32.partialorder %v5692_v3, %v2469_v23 }
 0x702   :  { %vm2875_vm14 = vmor %vm2847_vm4, %vm2868_vm9  ;;  %vm2605_vm4 = vcmp.lt.f32.partialorder %v5692_v3, %v2469_v23 }
 0x703   :  { %v2882_v44 = vsel %vm2875_vm14, %v6061_v26, -1e+30  ;;  %vm2504_vm7 = vmand %vm2490_vm5, %vm6827_vm11  ;;  %vm6829_vm5 = vcmp.ne.s32.totalorder %v5384_v49, 0  ;;  %vm2727_vm11 = vcmp.lt.f32.partialorder %v5618_v51, %v2469_v23 }
 0x704   :  { %2900 = vrot.lane.b32.xlu1 %v2882_v44, %s4049_s8  ;;  %vm2511_vm13 = vmor %vm2483_vm15, %vm2504_vm7 }
 0x705   :  { %vm2747_vm6 = vmand %vm2733_vm2, %vm6828_vm3  ;;  %v2518_v5 = vsel %vm2511_vm13, %v6153_v57, -1e+30  ;;  %vm2855_vm2 = vcmp.eq.f32.partialorder %v5561_v46, %v6236_v12  ;;  %vm2849_vm13 = vcmp.lt.f32.partialorder %v5694_v27, %v2469_v23 }
 0x706   :  { %vm2754_vm9 = vmor %vm2726_vm1, %vm2747_vm6  ;;  %vm6831_vm6 = vcmp.ne.s32.totalorder %v5489_v7, 0 }
 0x707   :  { %v2761_v35 = vsel %vm2754_vm9, %v6090_v20, -1e+30  ;;  %vm2626_vm14 = vmand %vm2612_vm10, %vm6829_vm5  ;;  %vm2848_vm10 = vcmp.lt.f32.partialorder %v5561_v46, %v6236_v12  ;;  %vm6832_vm5 = vnez %v6648_v41  ;;  %v6838_v41 = vsel %vm5640_vm12, %v5824_v17, -1e+30 }
 0x708   :  { %2538 = vrot.lane.b32.xlu1 %v2518_v5, %s4049_s8  ;;  %2780 = vrot.lane.b32.xlu0 %v2761_v35, %s4049_s8  ;;  %vm2633_vm15 = vmor %vm2605_vm4, %vm2626_vm14  ;;  %v6833_v7 = vsel %vm6832_vm5, %v5733_v11, -1e+30  ;;  %vm6834_vm14 = vnez %v6667_v18  ;;  %v2450_v11 = vmax.f32 %v6838_v41, -1e+30  ;;  %vm6843_vm12 = vnez %v6682_v39 }
 0x709   :  { %vm6830_vm7 = vmmov %vm6828_vm3  ;;  %v2640_v49 = vsel %vm2633_vm15, %v6296_v10, -1e+30  ;;  %v2449_v46 = vmax.f32 %v6833_v7, -1e+30  ;;  %v6835_v25 = vsel %vm6834_vm14, %v5785_v48, -1e+30  ;;  %vm6841_vm15 = vnez %v6698_v9 }
 0x70a   :  { %vm2748_vm1 = vmand %vm2734_vm8, %vm6830_vm7  ;;  %vm6850_vm7 = vcmask 523264  }
 0x70b   :  { %vm2755_vm3 = vmor %vm2727_vm11, %vm2748_vm1  ;;  %vm6839_vm11 = vnez %v6670_v19 }
 0x70c   :  { %v2762_v36 = vsel %vm2755_vm3, %v6168_v37, -1e+30  ;;  %vm2869_vm9 = vmand %vm2855_vm2, %vm6831_vm6  ;;  %2660 = vrot.lane.b32.xlu1 %v2640_v49, %s4049_s8  ;;  %v6840_v48 = vsel %vm6839_vm11, %v5790_v8, -1e+30  ;;  %vm6854_vm3 = vmmov 0  }
 0x70d   :  { %2782 = vrot.lane.b32.xlu0 %v2762_v36, %s4049_s8  ;;  %vm2877_vm8 = vmor %vm2849_vm13, %vm6273_vm0  ;;  %vm6836_vm0 = vnez %v6651_v42  ;;  %v6842_v42 = vsel %vm6841_vm15, %v5851_v40, -1e+30  ;;  %vm6852_vm13 = vnez %v6710_v16 }
 0x70e   :  { %vm2876_vm4 = vmor %vm2848_vm10, %vm2869_vm9  ;;  %v2884_v13 = vsel %vm2877_vm8, %v6200_v32, -1e+30  ;;  %v6837_v33 = vsel %vm6836_vm0, %v5735_v45, -1e+30  ;;  %vm6857_vm10 = vnez %v6726_v54 }
 0x70f   :  { %v2883_v51 = vsel %vm2876_vm4, %v6139_v56, -1e+30  ;;  %vm6851_vm1 = vmmov %vm6850_vm7 }
 0x710   :  { %2902 = vrot.lane.b32.xlu1 %v2883_v51, %s4049_s8  ;;  %v6844_v51 = vld [vmem:[#allocation28_spill] sm:$0xff]  ;;  %vm6859_vm6 = vmmov %vm6851_vm1 }
 0x711   :  { %2904 = vrot.lane.b32.xlu0 %v2884_v13, %s4049_s8  ;;  %v6845_v7 = vsel %vm6843_vm12, %v6844_v51, -1e+30  ;;  %vm6860_vm9 = vmmov %vm6851_vm1 }
 0x712   :  { %vm6878_vm11 = vmmov %vm6851_vm1 }
 0x713   :  { %vm6879_vm15 = vmmov %vm6851_vm1 }
 0x731   :  { %v2527_v27 = vpop.permute.xlu1 %2526 }
 0x732   :  { %v2547_v61 = vmax.f32 %v2449_v46, %v2527_v27  ;;  %v2771_v12 = vpop.permute.xlu0 %2770  ;;  %v6846_v27 = vld [vmem:[#allocation18_spill] sm:$0xff] }
 0x734   :  { %v2592_v14 = vmax.f32 %v2547_v61, %v6835_v25  ;;  %v6847_v25 = vld [vmem:[#allocation25_spill] sm:$0xff] }
 0x735   :  { %v2649_v59 = vpop.permute.xlu1 %2648  ;;  %vm6848_vm2 = vnez %v6847_v25 }
 0x736   :  { %v2669_v23 = vmax.f32 %v2592_v14, %v2649_v59  ;;  %v2893_v28 = vpop.permute.xlu0 %2892  ;;  %v6849_v40 = vsel %vm6848_vm2, %v5856_v34, -1e+30  ;;  %v6856_v34 = vld [vmem:[#allocation19_spill] sm:$0xff] }
 0x738   :  { %v2714_v30 = vmax.f32 %v2669_v23, %v6837_v33 }
 0x739   :  { %v2773_v44 = vpop.permute.xlu1 %2772 }
 0x73a   :  { %v2791_v5 = vmax.f32 %v2714_v30, %v2771_v12  ;;  %v2529_v35 = vpop.permute.xlu0 %2528 }
 0x73b   :  { %v2548_v18 = vmax.f32 %v2450_v11, %v2529_v35  ;;  %v6858_v11 = vsel %vm6857_vm10, %v5908_v47, -1e+30  ;;  %v6864_v47 = vld [vmem:[#allocation26_spill] sm:$0xff]  ;;  %vm2567_vm10 = vcmp.eq.f32.partialorder %v5692_v3, %v5277_v55 }
 0x73c   :  { %v2836_v49 = vmax.f32 %v2791_v5, %v6840_v48  ;;  %vm6865_vm4 = vnez %v6864_v47 }
 0x73d   :  { %v2593_v45 = vmax.f32 %v2548_v18, %v6842_v42  ;;  %v2651_v36 = vpop.permute.xlu1 %2650  ;;  %v6861_v18 = vld [vmem:[#allocation29_spill] sm:$0xff] }
 0x73e   :  { %v2913_v13 = vmax.f32 %v2836_v49, %v2893_v28  ;;  %v6855_v28 = vld [vmem:[#allocation13_spill] sm:$0xff]  ;;  %vm6862_vm8 = vnez %v6861_v18 }
 0x73f   :  { %v2670_v1 = vmax.f32 %v2593_v45, %v2651_v36  ;;  %v2895_v61 = vpop.permute.xlu0 %2894  ;;  %v6863_v48 = vsel %vm6862_vm8, %v5940_v38, -1e+30  ;;  %v6866_v45 = vsel %vm6865_vm4, %v5880_v63, -1e+30  ;;  %vm2560_vm8 = vcmp.lt.f32.partialorder %v5692_v3, %v5277_v55 }
 0x740   :  { %v2920_v17 = vmax.f32 %v5187_v22, %v2913_v13  ;;  %v6853_v22 = vsel %vm6852_vm13, %v5878_v58, -1e+30  ;;  %v2452_v49 = vmax.f32 %v6863_v48, -1e+30  ;;  %vm6903_vm4 = vcmp.gt.s32.totalorder %v5149_v2, 2  ;;  %v6910_v2 = vld [vmem:[#allocation16_spill] sm:$0xff] }
 0x741   :  { %v2715_v46 = vmax.f32 %v2670_v1, %v6845_v7  ;;  %v2451_v39 = vmax.f32 %v6853_v22, -1e+30  ;;  %v6875_v22 = vld [vmem:[#allocation33_spill] sm:$0xff] }
 0x742   :  { %v2927_v19 = vsub.f32 %v6846_v27, %v2920_v17  ;;  %v6867_v17 = vld [vmem:[#allocation31_spill] sm:$0xff]  ;;  %vm6876_vm0 = vnez %v6875_v22 }
 0x743   :  { %v2792_v8 = vmax.f32 %v2715_v46, %v2773_v44  ;;  %vm6868_vm5 = vnez %v6867_v17  ;;  %v6870_v46 = vld [vmem:[#allocation27_spill] sm:$0xff] }
 0x744   :  { %v2934_v12 = vmax.f32 %v2927_v19, 0.0  ;;  %v6869_v51 = vsel %vm6868_vm5, %v5966_v60, -1e+30  ;;  %vm6871_vm14 = vnez %v6870_v46  ;;  %vm2577_vm5 = vmand %vm2567_vm10, %vm6903_vm4 }
 0x745   :  { %v2837_v9 = vmax.f32 %v2792_v8, %v6849_v40  ;;  %v6872_v27 = vsel %vm6871_vm14, %v5914_v29, -1e+30  ;;  %v6873_v8 = vld [vmem:[#allocation14_spill] sm:$0xff]  ;;  %v6874_v40 = vld [vmem:[#allocation20_spill] sm:$0xff]  ;;  %vm6904_vm14 = vnez %v6807_v24 }
 0x746   :  { %3908 = vmatmul.mubr.msk.f32.vlgmr.msra.gmra.mxu1 %vm6850_vm7, %v2934_v12  ;;  %v3091_v14 = vsel %vm6851_vm1, %v2934_v12, 0.0 }
 0x747   :  { %v2914_v59 = vmax.f32 %v2837_v9, %v2895_v61  ;;  %3092 = vadd.xlane.f32.xlu1 %v3091_v14  ;;  %3910 = vmatprep.mubr.msk.f32.mxu1 %vm6854_vm3, %v6756_v4 }
 0x749   :  { %v2531_v23 = vpop.permute.xlu0 %2530  ;;  %v2921_v33 = vmax.f32 %v6855_v28, %v2914_v59  ;;  %v6880_v28 = vld [vmem:[#allocation30_spill] sm:$0xff] }
 0x74a   :  { %v2549_v30 = vmax.f32 %v2451_v39, %v2531_v23  ;;  %v6877_v39 = vsel %vm6876_vm0, %v5996_v43, -1e+30  ;;  %vm6881_vm12 = vnez %v6880_v28  ;;  %v6883_v43 = vld [vmem:[#allocation35_spill] sm:$0xff] }
 0x74b   :  { %v2928_v41 = vsub.f32 %v6856_v34, %v2921_v33  ;;  %v2775_v5 = vpop.permute.xlu1 %2774  ;;  %v2453_v60 = vmax.f32 %v6877_v39, -1e+30  ;;  %v6882_v33 = vsel %vm6881_vm12, %v5942_v0, -1e+30  ;;  %vm6884_vm2 = vnez %v6883_v43  ;;  %vm2584_vm12 = vmor %vm2560_vm8, %vm2577_vm5 }
 0x74c   :  { %v2594_v44 = vmax.f32 %v2549_v30, %v6858_v11 }
 0x74d   :  { %v2935_v16 = vmax.f32 %v2928_v41, 0.0 }
 0x74f   :  { %3911 = vmatmul.mubr.msk.f32.gmra.mxu1 %vm6859_vm6, %v2935_v16  ;;  %v3094_v58 = vsel %vm6860_vm9, %v2935_v16, 0.0 }
 0x750   :  { %3095 = vadd.xlane.f32.xlu0 %v3094_v58  ;;  %3913 = vmatprep.mubr.msk.f32.mxu1 %vm6854_vm3, %v6756_v4 }
 0x755   :  { %v2653_v35 = vpop.permute.xlu0 %2652 }
 0x756   :  { %v2671_v54 = vmax.f32 %v2594_v44, %v2653_v35  ;;  %v6885_v44 = vsel %vm6884_vm2, %v6027_v31, -1e+30 }
 0x757   :  { %v2533_v42 = vpop.permute.xlu1 %2532 }
 0x758   :  { %v2716_v36 = vmax.f32 %v2671_v54, %v6866_v45  ;;  %v2550_v13 = vmax.f32 %v2452_v49, %v2533_v42  ;;  %v6889_v49 = vld [vmem:[#allocation37_spill] sm:$0xff] }
 0x759   :  { %vm6890_vm1 = vnez %v6889_v49  ;;  %v6921_v49 = vld [vmem:[#allocation23_spill] sm:$0xff] }
 0x75a   :  { %v2793_v1 = vmax.f32 %v2716_v36, %v2775_v5  ;;  %v2595_v7 = vmax.f32 %v2550_v13, %v6869_v51  ;;  %v6886_v5 = vld [vmem:[#allocation32_spill] sm:$0xff]  ;;  %v6891_v0 = vsel %vm6890_vm1, %v6075_v62, -1e+30  ;;  %v6892_v36 = vld [vmem:[#allocation15_spill] sm:$0xff]  ;;  %vm6917_vm1 = vmmov %vm6878_vm11 }
 0x75b   :  { %vm6887_vm7 = vnez %v6886_v5  ;;  %v2454_v54 = vmax.f32 %v6891_v0, -1e+30  ;;  %vm6925_vm8 = vmmov %vm6917_vm1 }
 0x75c   :  { %v2838_v38 = vmax.f32 %v2793_v1, %v6872_v27  ;;  %v6888_v35 = vsel %vm6887_vm7, %v5970_v52, -1e+30  ;;  %v6893_v1 = vld [vmem:[#allocation34_spill] sm:$0xff]  ;;  %v6896_v52 = vld [vmem:[#allocation21_spill] sm:$0xff]  ;;  %v6897_v27 = vld [vmem:[#allocation39_spill] sm:$0xff]  ;;  %vm6915_vm7 = vnez %v6810_v15 }
 0x75d   :  { %vm6894_vm13 = vnez %v6893_v1  ;;  %vm6898_vm6 = vnez %v6897_v27  ;;  %vm6926_vm4 = vmmov %vm6917_vm1 }
 0x75e   :  { %v6895_v31 = vsel %vm6894_vm13, %v6009_v53, -1e+30  ;;  %v6899_v62 = vsel %vm6898_vm6, %v6105_v21, -1e+30  ;;  %v6905_v21 = vsel %vm6904_vm14, %v6153_v57, -1e+30  ;;  %vm6918_vm13 = vmmov %vm6917_vm1 }
 0x75f   :  { %v2897_v19 = vpop.permute.xlu0 %2896  ;;  %vm6923_vm6 = vmmov %vm6917_vm1 }
 0x760   :  { %v2915_v61 = vmax.f32 %v2838_v38, %v2897_v19  ;;  %vm6927_vm5 = vmmov %vm6917_vm1 }
 0x761   :  { %v2777_v25 = vpop.permute.xlu1 %2776  ;;  %vm6928_vm14 = vmmov %vm6917_vm1 }
 0x762   :  { %v2922_v12 = vmax.f32 %v6873_v8, %v2915_v61 }
 0x764   :  { %v2929_v63 = vsub.f32 %v6874_v40, %v2922_v12 }
 0x765   :  { %v2655_v14 = vpop.permute.xlu0 %2654 }
 0x766   :  { %v2936_v9 = vmax.f32 %v2929_v63, 0.0  ;;  %v2672_v59 = vmax.f32 %v2595_v7, %v2655_v14  ;;  %v2455_v63 = vmax.f32 %v6905_v21, -1e+30  ;;  %v6906_v14 = vld [vmem:[#allocation38_spill] sm:$0xff] }
 0x767   :  { %v2535_v23 = vpop.permute.xlu1 %2534  ;;  %vm6907_vm0 = vnez %v6906_v14 }
 0x768   :  { %3914 = vmatmul.mubr.msk.f32.gmra.mxu1 %vm6878_vm11, %v2936_v9  ;;  %v3097_v29 = vsel %vm6879_vm15, %v2936_v9, 0.0  ;;  %v2717_v30 = vmax.f32 %v2672_v59, %v6882_v33  ;;  %v2551_v34 = vmax.f32 %v2453_v60, %v2535_v23  ;;  %v6908_v22 = vsel %vm6907_vm0, %v6090_v20, -1e+30  ;;  %vm6909_vm15 = vmmov %vm6878_vm11  ;;  %v6911_v23 = vld [vmem:[#allocation22_spill] sm:$0xff]  ;;  %v6912_v33 = vld [vmem:[#allocation40_spill] sm:$0xff] }
 0x769   :  { %3098 = vadd.xlane.f32.xlu0 %v3097_v29  ;;  %3916 = vmatprep.mubr.msk.f32.mxu1 %vm6854_vm3, %v6756_v4  ;;  %v2899_v41 = vpop.permute.xlu0 %2898  ;;  %v2591_v29 = vsel %vm2584_vm12, %v6296_v10, -1e+30  ;;  %vm6913_vm2 = vnez %v6912_v33  ;;  %vm6929_vm0 = vmmov %vm6917_vm1 }
 0x76a   :  { %v2794_v11 = vmax.f32 %v2717_v30, %v2777_v25  ;;  %v2596_v16 = vmax.f32 %v2551_v34, %v6885_v44  ;;  %v6900_v25 = vld [vmem:[#allocation36_spill] sm:$0xff]  ;;  %v6914_v30 = vsel %vm6913_vm2, %v6139_v56, -1e+30  ;;  %vm6933_vm12 = vmmov %vm6929_vm0  ;;  %vm3144_vm2 = vcmask 7168  }
 0x76b   :  { %v2779_v58 = vpop.permute.xlu1 %2778  ;;  %vm6901_vm9 = vnez %v6900_v25 }
 0x76c   :  { %v2839_v18 = vmax.f32 %v2794_v11, %v6888_v35  ;;  %v6902_v53 = vsel %vm6901_vm9, %v6061_v26, -1e+30  ;;  %vm6924_vm9 = vmmov %vm6917_vm1 }
 0x76d   :  { %v2657_v48 = vpop.permute.xlu0 %2656 }
 0x76e   :  { %v2916_v42 = vmax.f32 %v2839_v18, %v2899_v41  ;;  %v2673_v47 = vmax.f32 %v2596_v16, %v2657_v48  ;;  %v6916_v16 = vsel %vm6915_vm7, %v6168_v37, -1e+30  ;;  %v6919_v18 = vld [vmem:[#allocation17_spill] sm:$0xff] }
 0x76f   :  { %v2537_v45 = vpop.permute.xlu1 %2536 }
 0x770   :  { %v2923_v13 = vmax.f32 %v6892_v36, %v2916_v42  ;;  %v2718_v17 = vmax.f32 %v2673_v47, %v6895_v31  ;;  %v2552_v51 = vmax.f32 %v2454_v54, %v2537_v45  ;;  %v6922_v45 = vld [vmem:[#allocation24_spill] sm:$0xff] }
 0x772   :  { %v2659_v7 = vpop.permute.xlu0 %2658  ;;  %v2930_v46 = vsub.f32 %v6896_v52, %v2923_v13  ;;  %v2597_v38 = vmax.f32 %v2552_v51, %v6899_v62  ;;  %v2795_v19 = vmax.f32 %v2718_v17, %v2779_v58 }
 0x774   :  { %v2937_v8 = vmax.f32 %v2930_v46, 0.0  ;;  %v2674_v12 = vmax.f32 %v2597_v38, %v2659_v7  ;;  %v2840_v40 = vmax.f32 %v2795_v19, %v6902_v53 }
 0x776   :  { %v2901_v61 = vpop.permute.xlu1 %2900  ;;  %v2719_v39 = vmax.f32 %v2674_v12, %v6908_v22  ;;  %3917 = vmatmul.mubr.msk.f32.gmra.mxu1 %vm6878_vm11, %v2937_v8  ;;  %v3100_v26 = vsel %vm6909_vm15, %v2937_v8, 0.0  ;;  %vm6931_vm11 = vmmov %vm6929_vm0 }
 0x777   :  { %v2917_v9 = vmax.f32 %v2840_v40, %v2901_v61  ;;  %3101 = vadd.xlane.f32.xlu1 %v3100_v26  ;;  %3919 = vmatprep.mubr.msk.f32.mxu1 %vm6854_vm3, %v6756_v4  ;;  %vm6932_vm15 = vmmov %vm6929_vm0 }
 0x779   :  { %v2924_v57 = vmax.f32 %v6910_v2, %v2917_v9 }
 0x77a   :  { %v2539_v60 = vpop.permute.xlu1 %2538  ;;  %v2781_v3 = vpop.permute.xlu0 %2780 }
 0x77b   :  { %v2553_v24 = vmax.f32 %v2455_v63, %v2539_v60  ;;  %v2796_v59 = vmax.f32 %v2719_v39, %v2781_v3  ;;  %v2931_v20 = vsub.f32 %v6911_v23, %v2924_v57  ;;  %v3129_v60 = vstv %s3128_s3 }
 0x77c   :  { %v3120_v3 = vstv %s6535_s20 }
 0x77d   :  { %v2598_v28 = vmax.f32 %v2553_v24, %v2591_v29  ;;  %v2841_v34 = vmax.f32 %v2796_v59, %v6914_v30  ;;  %v2938_v11 = vmax.f32 %v2931_v20, 0.0 }
 0x77e   :  { %v2661_v41 = vpop.permute.xlu1 %2660 }
 0x77f   :  { %v2675_v43 = vmax.f32 %v2598_v28, %v2661_v41  ;;  %v2783_v44 = vpop.permute.xlu0 %2782  ;;  %3920 = vmatmul.mubr.msk.f32.gmra.mxu1 %vm6917_vm1, %v2938_v11  ;;  %v3103_v10 = vsel %vm6918_vm13, %v2938_v11, 0.0 }
 0x780   :  { %3104 = vadd.xlane.f32.xlu0 %v3103_v10  ;;  %3922 = vmatprep.mubr.msk.f32.mxu1 %vm6854_vm3, %v6756_v4 }
 0x781   :  { %v2720_v58 = vmax.f32 %v2675_v43, %v6916_v16 }
 0x782   :  { %v2903_v5 = vpop.permute.xlu1 %2902 }
 0x783   :  { %v2797_v56 = vmax.f32 %v2720_v58, %v2783_v44  ;;  %v2918_v35 = vmax.f32 %v2841_v34, %v2903_v5  ;;  %v2905_v37 = vpop.permute.xlu0 %2904 }
 0x785   :  { %v2925_v48 = vmax.f32 %v6919_v18, %v2918_v35  ;;  %v2842_v15 = vmax.f32 %v2797_v56, %v2835_v6 }
 0x787   :  { %v2932_v0 = vsub.f32 %v6921_v49, %v2925_v48  ;;  %v2919_v54 = vmax.f32 %v2842_v15, %v2905_v37 }
 0x789   :  { %v2939_v42 = vmax.f32 %v2932_v0, 0.0  ;;  %v2926_v47 = vmax.f32 %v5277_v55, %v2919_v54 }
 0x78b   :  { %v2933_v36 = vsub.f32 %v6922_v45, %v2926_v47  ;;  %3923 = vmatmul.mubr.msk.f32.gmra.mxu1 %vm6923_vm6, %v2939_v42  ;;  %v3106_v13 = vsel %vm6924_vm9, %v2939_v42, 0.0 }
 0x78c   :  { %3107 = vadd.xlane.f32.xlu1 %v3106_v13  ;;  %3925 = vmatprep.mubr.msk.f32.mxu1 %vm6854_vm3, %v6756_v4  ;;  %vm6930_vm3 = vmmov %vm6929_vm0 }
 0x78d   :  { %v2940_v50 = vmax.f32 %v2933_v36, 0.0 }
 0x78f   :  { %3926 = vmatmul.mubr.msk.f32.gmra.mxu1 %vm6925_vm8, %v2940_v50  ;;  %v3109_v32 = vsel %vm6926_vm4, %v2940_v50, 0.0 }
 0x790   :  { %3110 = vadd.xlane.f32.xlu0 %v3109_v32 }
 0x7d0   :  { %v3093_v63 = vpop.xlane.xlu1 %3092 }
 0x7d1   :  { %v3112_v39 = vmul.f32 0.125, %v3093_v63 }
 0x7d3   :  { %v3130_v57 = vmul.f32 %v3129_v60, %v3112_v39 }
 0x7d9   :  { %v3096_v14 = vpop.xlane.xlu0 %3095 }
 0x7da   :  { %v3113_v20 = vmul.f32 0.125, %v3096_v14 }
 0x7dc   :  { %v3131_v33 = vmul.f32 %v3129_v60, %v3113_v20 }
 0x7f2   :  { %v3099_v26 = vpop.xlane.xlu0 %3098 }
 0x7f3   :  { %v3114_v41 = vmul.f32 0.125, %v3099_v26 }
 0x7f5   :  { %v3132_v43 = vmul.f32 %v3129_v60, %v3114_v41 }
 0x800   :  { %v3102_v9 = vpop.xlane.xlu1 %3101 }
 0x801   :  { %v3115_v58 = vmul.f32 0.125, %v3102_v9 }
 0x803   :  { %v3133_v5 = vmul.f32 %v3129_v60, %v3115_v58 }
 0x806   :  { %v3036_v6 = vpop.f32.mrf.mxu1 }
 0x807   :  { %v3070_v1 = vsel %vm6927_vm5, %v3036_v6, -inf }
 0x808   :  { %v3909_v55 = vpop.f32.mrf.mxu1  ;;  %3071 = vmax.xlane.f32.xlu1 %v3070_v1 }
 0x809   :  { %v3105_v24 = vpop.xlane.xlu0 %3104 }
 0x80a   :  { %v3116_v18 = vmul.f32 0.125, %v3105_v24 }
 0x80c   :  { %v3134_v15 = vmul.f32 %v3129_v60, %v3116_v18 }
 0x80f   :  { %v3041_v31 = vpop.f32.mrf.mxu1 }
 0x810   :  { %v3073_v17 = vsel %vm6928_vm14, %v3041_v31, -inf }
 0x811   :  { %v3912_v51 = vpop.f32.mrf.mxu1  ;;  %3074 = vmax.xlane.f32.xlu0 %v3073_v17 }
 0x815   :  { %v3108_v22 = vpop.xlane.xlu1 %3107 }
 0x816   :  { %v3117_v0 = vmul.f32 0.125, %v3108_v22 }
 0x818   :  { %v3135_v42 = vmul.f32 %v3129_v60, %v3117_v0 }
 0x819   :  { %v3111_v23 = vpop.xlane.xlu0 %3110 }
 0x81a   :  { %v3118_v47 = vmul.f32 0.125, %v3111_v23 }
 0x81c   :  { %v3136_v50 = vmul.f32 %v3129_v60, %v3118_v47 }
 0x828   :  { %v3046_v7 = vpop.f32.mrf.mxu1 }
 0x829   :  { %v3076_v52 = vsel %vm6929_vm0, %v3046_v7, -inf }
 0x82a   :  { %v3915_v4 = vpop.f32.mrf.mxu1  ;;  %3077 = vmax.xlane.f32.xlu1 %v3076_v52 }
 0x836   :  { %v3051_v46 = vpop.f32.mrf.mxu1 }
 0x837   :  { %v3079_v27 = vsel %vm6930_vm3, %v3051_v46, -inf }
 0x838   :  { %v3918_v62 = vpop.f32.mrf.mxu1  ;;  %3080 = vmax.xlane.f32.xlu0 %v3079_v27 }
 0x83f   :  { %v3056_v38 = vpop.f32.mrf.mxu1 }
 0x840   :  { %v3082_v19 = vsel %vm6931_vm11, %v3056_v38, -inf }
 0x841   :  { %v3921_v61 = vpop.f32.mrf.mxu1  ;;  %3083 = vmax.xlane.f32.xlu1 %v3082_v19 }
 0x84b   :  { %v3061_v8 = vpop.f32.mrf.mxu1 }
 0x84c   :  { %v3085_v12 = vsel %vm6932_vm15, %v3061_v8, -inf }
 0x84d   :  { %v3924_v25 = vpop.f32.mrf.mxu1  ;;  %3086 = vmax.xlane.f32.xlu0 %v3085_v12 }
 0x84f   :  { %v3066_v53 = vpop.f32.mrf.mxu1 }
 0x850   :  { %v3088_v40 = vsel %vm6933_vm12, %v3066_v53, -inf }
 0x851   :  { %3089 = vmax.xlane.f32.xlu1 %v3088_v40  ;;  %v3927_v21 = vpop.f32.mrf.mxu1 }
 0x891   :  { %v3072_v2 = vpop.xlane.xlu1 %3071 }
 0x892   :  { %v3121_v59 = vmul.f32 %v3120_v3, %v3072_v2 }
 0x894   :  { %v3137_v29 = vadd.f32 %v3130_v57, %v3121_v59 }
 0x896   :  { %3145 = vst.msk [vmem:[%s6536_s21] sm:$0xff] %vm3144_vm2, %v3137_v29 }
 0x89a   :  { %v3075_v28 = vpop.xlane.xlu0 %3074 }
 0x89b   :  { %v3122_v30 = vmul.f32 %v3120_v3, %v3075_v28 }
 0x89d   :  { %v3138_v34 = vadd.f32 %v3131_v33, %v3122_v30 }
 0x89f   :  { %3146 = vst.msk [vmem:[%s6536_s21 + $0x8] sm:$0xff] %vm3144_vm2, %v3138_v34 }
 0x8b3   :  { %v3078_v11 = vpop.xlane.xlu1 %3077 }
 0x8b4   :  { %v3123_v44 = vmul.f32 %v3120_v3, %v3078_v11 }
 0x8b6   :  { %v3139_v16 = vadd.f32 %v3132_v43, %v3123_v44 }
 0x8b8   :  { %3147 = vst.msk [vmem:[%s6536_s21 + $0x10] sm:$0xff] %vm3144_vm2, %v3139_v16 }
 0x8c1   :  { %v3081_v10 = vpop.xlane.xlu0 %3080 }
 0x8c2   :  { %v3124_v56 = vmul.f32 %v3120_v3, %v3081_v10 }
 0x8c4   :  { %v3140_v35 = vadd.f32 %v3133_v5, %v3124_v56 }
 0x8c6   :  { %3148 = vst.msk [vmem:[%s6536_s21 + $0x18] sm:$0xff] %vm3144_vm2, %v3140_v35 }
 0x8ca   :  { %v3084_v48 = vpop.xlane.xlu1 %3083 }
 0x8cb   :  { %v3125_v37 = vmul.f32 %v3120_v3, %v3084_v48 }
 0x8cd   :  { %v3141_v49 = vadd.f32 %v3134_v15, %v3125_v37 }
 0x8cf   :  { %3149 = vst.msk [vmem:[%s6536_s21 + $0x20] sm:$0xff] %vm3144_vm2, %v3141_v49 }
 0x8d6   :  { %v3087_v54 = vpop.xlane.xlu0 %3086 }
 0x8d7   :  { %v3126_v45 = vmul.f32 %v3120_v3, %v3087_v54 }
 0x8d9   :  { %v3142_v36 = vadd.f32 %v3135_v42, %v3126_v45 }
 0x8da   :  { %v3090_v13 = vpop.xlane.xlu1 %3089 }
 0x8db   :  { %3150 = vst.msk [vmem:[%s6536_s21 + $0x28] sm:$0xff] %vm3144_vm2, %v3142_v36  ;;  %v3127_v32 = vmul.f32 %v3120_v3, %v3090_v13 }
 0x8dd   :  { %v3143_v6 = vadd.f32 %v3136_v50, %v3127_v32 }
 0x8df   :  { %3151 = vst.msk [vmem:[%s6536_s21 + $0x30] sm:$0xff] %vm3144_vm2, %v3143_v6 }
 0x8e0   :  { %3156 = vsyncpa [#allocation4], 1 }
 0x8e1   :  { %3157 = vsyncpa [#allocation6], 1 }
 0x8e2   :  { %3158 = vsyncpa [#allocation9], 1 }

</bundles_post_ra>
